<compile_context>
chip_gen: v7x
topology: tpu7x:2x2x1
jax: 0.10.0
libtpu: 0.0.40
codegen_flags: <defaults>
</compile_context>

<pallas_src>
import math

import numpy as np
import jax
import jax.numpy as jnp
from jax import lax
from jax.experimental import pallas as pl
from jax.experimental.pallas import tpu as pltpu


# ----------------------------------------------------------------------------
# Helpers
# ----------------------------------------------------------------------------
def _fast_recip(x):
    """EUP approximate reciprocal + one Newton step (keeps the divide off the
    VALU while retaining ~f32 accuracy for the parity check)."""
    r = pl.reciprocal(x, approx=True)
    return r * (2.0 - x * r)


def _full_spec(shape):
    """BlockSpec mapping the whole (small) array regardless of grid step."""
    nd = len(shape)
    return pl.BlockSpec(tuple(shape), lambda *_, _nd=nd: (0,) * _nd)


def _compiler_params(est_bytes, semantics):
    """Raise the scoped VMEM limit only when the footprint actually needs it;
    cap it generation-aware (v7x has 64 MiB physical vs 128 MiB on v5e/v6e)."""
    vmem_limit = None
    if est_bytes > (8 << 20):
        try:
            cap = int(pltpu.get_tpu_info().vmem_capacity_bytes)
        except Exception:
            cap = 64 << 20
        vmem_limit = min(int(est_bytes) + (4 << 20), (cap * 3) // 4)
    return pltpu.CompilerParams(dimension_semantics=semantics,
                                vmem_limit_bytes=vmem_limit)


# ----------------------------------------------------------------------------
# Fused CA_Block + SA_Block + 1x1 "cr" conv + 7x7 "map" conv kernel
#   per grid step (one batch element):
#     in : x (C, N), small weights/biases (VMEM), [gamma_ca, gamma_sa, bmap] (SMEM)
#     out: cab, sab, mix (C, N) and map (1, N)
# ----------------------------------------------------------------------------
def _positioning_fused(xf, params, H, W):
    B, C, N = xf.shape
    C8 = params["wq"].shape[0]
    KH, KW = params["wmap"].shape[2], params["wmap"].shape[3]
    KK = KH * KW
    f32 = jnp.float32

    # --- weight prep (tiny, trace-time / XLA side) ---------------------------
    wcr = params["wcr"].astype(f32)
    wc1, wc2, wc3 = wcr[:, :C], wcr[:, C:2 * C], wcr[:, 2 * C:]
    wq = params["wq"].astype(f32)
    wk = params["wk"].astype(f32)
    wv = params["wv"].astype(f32)
    bq = params["bq"].reshape(C8, 1).astype(f32)
    bk = params["bk"].reshape(C8, 1).astype(f32)
    bv = params["bv"].reshape(C, 1).astype(f32)
    bcr = params["bcr"].reshape(C, 1).astype(f32)
    # map weights as (49, C): 784 scalars -- no pre-broadcast slab.
    wmap_tc = jnp.transpose(params["wmap"].reshape(C, KK)).astype(f32)

    # scalars for SMEM scalar-prefetch: [gamma_ca, gamma_sa, map bias]
    scal = jnp.concatenate(
        [params["gamma_ca"], params["gamma_sa"], params["bmap"]]).astype(f32)

    # Static per-tap lane offsets + pre-rolled zero-padding boundary masks.
    # mask is folded into the per-tap rows BEFORE rolling, so the tap loop is
    # just roll + add.
    yy = np.arange(N) // W
    xx = np.arange(N) % W
    offs, masks = [], []
    for ky in range(KH):
        for kx in range(KW):
            dy, dx = ky - KH // 2, kx - KW // 2
            off = dy * W + dx
            valid = ((yy + dy >= 0) & (yy + dy < H) &
                     (xx + dx >= 0) & (xx + dx < W)).astype(np.float32)
            offs.append(off)
            masks.append(np.roll(valid, off))   # premask[m] = valid[(m-off) % N]
    maskpre = jnp.asarray(np.stack(masks))      # (49, N)

    def kernel(scal_ref, x_ref,
               wq_ref, bq_ref, wk_ref, bk_ref, wv_ref, bv_ref,
               wc1_ref, wc2_ref, wc3_ref, bcr_ref,
               wmap_ref, mpre_ref,
               cab_ref, sab_ref, mix_ref, map_ref):
        x = x_ref[...].astype(f32)                                   # (C, N)

        def cmm(w_ref, inp):
            # (O, C) x (C, N) -> (O, N): one MXU pass, full lane width N.
            return jnp.dot(w_ref[...], inp, preferred_element_type=f32)

        # ---- CA_Block: channel attention ------------------------------------
        # energy[c,d] = sum_n x[c,n] * x[d,n]   (contract trailing axis; no x.T)
        energy = jnp.einsum("cn,dn->cd", x, x, preferred_element_type=f32)
        p = jnp.exp(energy - jnp.max(energy, axis=-1, keepdims=True))
        l = jnp.sum(p, axis=-1, keepdims=True)                        # (C, 1)
        ca_out = jnp.dot(p, x, preferred_element_type=f32)            # (C, N)
        cab = scal_ref[0] * (ca_out * _fast_recip(l)) + x
        cab_ref[...] = cab.astype(cab_ref.dtype)

        # ---- SA_Block: spatial attention on cab ------------------------------
        q = cmm(wq_ref, cab) + bq_ref[...]                            # (C8, N)
        k = cmm(wk_ref, cab) + bk_ref[...]                            # (C8, N)
        v = cmm(wv_ref, cab) + bv_ref[...]                            # (C,  N)
        e2 = jnp.einsum("ci,cj->ij", q, k, preferred_element_type=f32)  # (N, N)
        p2 = jnp.exp(e2 - jnp.max(e2, axis=-1, keepdims=True))
        # Deferred normalization: contract un-normalized p2 with v, then scale
        # the (C,N) result by 1/rowsum -- no (N,N) normalization multiply.
        un = jnp.einsum("cj,ij->ci", v, p2, preferred_element_type=f32)   # (C, N)
        ones_row = jnp.ones((1, N), f32)
        l2 = jnp.einsum("oj,ij->oi", ones_row, p2,
                        preferred_element_type=f32)                   # (1, N)
        sab = scal_ref[1] * (un * _fast_recip(l2)) + cab
        sab_ref[...] = sab.astype(sab_ref.dtype)

        # ---- cr: 1x1 conv on concat(x, cab, sab); weights pre-split ----------
        mix = (cmm(wc1_ref, x) + cmm(wc2_ref, cab) + cmm(wc3_ref, sab)
               + bcr_ref[...])
        mix_ref[...] = mix.astype(mix_ref.dtype)

        # ---- map: 7x7 conv (C -> 1) in lane-dense flattened layout -----------
        # Channel reduction first (one MXU pass): s[t, m] = sum_c w[t,c]*mix[c,m]
        s = jnp.dot(wmap_ref[...], mix, preferred_element_type=f32)   # (49, N)
        s = s * mpre_ref[...]             # pre-rolled zero-pad boundary masks
        acc = jnp.zeros((1, N), f32)
        for t in range(KK):               # static unroll: 49 XLU lane rolls
            acc = acc + pltpu.roll(s[t:t + 1, :], shift=(-offs[t]) % N, axis=1)
        map_ref[...] = (acc + scal_ref[2]).astype(map_ref.dtype)

    io3 = lambda b, s: (b, 0, 0)
    in_specs = [
        pl.BlockSpec((None, C, N), io3),            # x, one batch element/step
        _full_spec((C8, C)), _full_spec((C8, 1)),   # wq, bq
        _full_spec((C8, C)), _full_spec((C8, 1)),   # wk, bk
        _full_spec((C, C)), _full_spec((C, 1)),     # wv, bv
        _full_spec((C, C)), _full_spec((C, C)),     # wc1, wc2
        _full_spec((C, C)), _full_spec((C, 1)),     # wc3, bcr
        _full_spec((KK, C)), _full_spec((KK, N)),   # wmap taps, pre-rolled masks
    ]
    out_specs = [pl.BlockSpec((None, C, N), io3),
                 pl.BlockSpec((None, C, N), io3),
                 pl.BlockSpec((None, C, N), io3),
                 pl.BlockSpec((None, 1, N), io3)]
    out_shape = (jax.ShapeDtypeStruct((B, C, N), xf.dtype),
                 jax.ShapeDtypeStruct((B, C, N), xf.dtype),
                 jax.ShapeDtypeStruct((B, C, N), xf.dtype),
                 jax.ShapeDtypeStruct((B, 1, N), xf.dtype))

    # Rough per-step f32 footprint: e2/p2 + activation slabs + taps/masks + I/O.
    est = 4 * (3 * N * N + 14 * C * N + 3 * KK * N + 4 * N)

    cab, sab, mix, mp = pl.pallas_call(
        kernel,
        out_shape=out_shape,
        grid_spec=pltpu.PrefetchScalarGridSpec(
            num_scalar_prefetch=1,
            grid=(B,),
            in_specs=in_specs,
            out_specs=out_specs),
        compiler_params=_compiler_params(est, ("parallel",)),
    )(scal, xf, wq, bq, wk, bk, wv, bv, wc1, wc2, wc3, bcr, wmap_tc, maskpre)
    return cab, sab, mix, mp


# ----------------------------------------------------------------------------
# Full Positioning forward (Pallas path) and pure-JAX reference
# ----------------------------------------------------------------------------
@jax.jit
def positioning_forward(x, params):
    B, C, H, W = x.shape
    N = H * W
    cab, sab, mix, mp = _positioning_fused(x.reshape(B, C, N), params, H, W)
    return (mix.reshape(B, C, H, W), mp.reshape(B, 1, H, W),
            cab.reshape(B, C, H, W), sab.reshape(B, C, H, W))


def positioning_ref(x, p):
    """Pure-JAX reference mirroring the PyTorch Positioning.forward."""
    hp = jax.lax.Precision.HIGHEST
    B, C, H, W = x.shape
    N = H * W

    # CA_Block
    xf = x.reshape(B, C, N)
    energy = jnp.einsum("bcn,bdn->bcd", xf, xf, precision=hp)
    attn = jax.nn.softmax(energy, axis=-1)
    cab = (p["gamma_ca"][0] * jnp.einsum("bcd,bdn->bcn", attn, xf, precision=hp)
           + xf).reshape(B, C, H, W)

    # SA_Block (input is cab)
    cf = cab.reshape(B, C, N)
    q = jnp.einsum("oc,bcn->bon", p["wq"], cf, precision=hp) + p["bq"][None, :, None]
    k = jnp.einsum("oc,bcn->bon", p["wk"], cf, precision=hp) + p["bk"][None, :, None]
    v = jnp.einsum("oc,bcn->bon", p["wv"], cf, precision=hp) + p["bv"][None, :, None]
    energy2 = jnp.einsum("bci,bcj->bij", q, k, precision=hp)
    attn2 = jax.nn.softmax(energy2, axis=-1)
    sab = (p["gamma_sa"][0] * jnp.einsum("bcj,bij->bci", v, attn2, precision=hp)
           + cf).reshape(B, C, H, W)

    # cr: 1x1 conv on channel concat
    mixcat = jnp.concatenate([x, cab, sab], axis=1).reshape(B, 3 * C, N)
    mix = (jnp.einsum("oc,bcn->bon", p["wcr"], mixcat, precision=hp)
           + p["bcr"][None, :, None]).reshape(B, C, H, W)

    # map: 7x7 conv, stride 1, padding 3
    mp = lax.conv_general_dilated(
        mix, p["wmap"], window_strides=(1, 1), padding=((3, 3), (3, 3)),
        dimension_numbers=("NCHW", "OIHW", "NCHW"), precision=hp) + p["bmap"][0]
    return mix, mp, cab, sab


def init_params(key, C):
    """Deterministic stand-ins for the PyTorch layer parameters."""
    C8 = max(C // 8, 1)
    ks = jax.random.split(key, 10)

    def u(k, shape, fan_in):
        b = 1.0 / math.sqrt(fan_in)
        return jax.random.uniform(k, shape, jnp.float32, -b, b)

    return dict(
        gamma_ca=jnp.ones((1,), jnp.float32),   # nn.Parameter(torch.ones(1))
        gamma_sa=jnp.ones((1,), jnp.float32),
        wq=u(ks[0], (C8, C), C), bq=u(ks[1], (C8,), C),
        wk=u(ks[2], (C8, C), C), bk=u(ks[3], (C8,), C),
        wv=u(ks[4], (C, C), C), bv=u(ks[5], (C,), C),
        wcr=u(ks[6], (C, 3 * C), 3 * C), bcr=u(ks[7], (C,), 3 * C),
        wmap=u(ks[8], (1, C, 7, 7), C * 49), bmap=u(ks[9], (1,), C * 49),
    )


if __name__ == "__main__":
    # The module requires in_dim // 8 >= 1 (SA_Block q/k convs), so channels=16.
    # N = H*W = 256 is a multiple of 128 and C a multiple of 8 (aligned tiles).
    B, C, H, W = 2, 16, 16, 16
    key = jax.random.PRNGKey(0)
    kx, kp = jax.random.split(key)
    x = jax.random.normal(kx, (B, C, H, W), dtype=jnp.float32)
    params = init_params(kp, C)

    mix, mp, cab, sab = jax.block_until_ready(positioning_forward(x, params))
    mix_r, mp_r, cab_r, sab_r = positioning_ref(x, params)

    # 1e-3 tolerance: the fused kernel reorders reductions (MXU pass structure,
    # deferred softmax normalization via approx reciprocal) vs the XLA ref.
    for name, got, want in (("cab", cab, cab_r), ("sab", sab, sab_r),
                            ("mix", mix, mix_r), ("map", mp, mp_r)):
        assert got.shape == want.shape, f"{name}: {got.shape} vs {want.shape}"
        assert jnp.allclose(got, want, atol=1e-3, rtol=1e-3), f"{name} mismatch"
    print("KERNEL_OK")
</pallas_src>

<mosaic_0001>
module attributes {stable_mosaic.version = 11 : i64} {
  func.func @kernel(%arg0: i32, %arg1: memref<3xf32, #tpu.memory_space<smem>>, %arg2: memref<1x16x256xf32, #tpu.memory_space<vmem>>, %arg3: memref<2x16xf32, #tpu.memory_space<vmem>>, %arg4: memref<2x1xf32, #tpu.memory_space<vmem>>, %arg5: memref<2x16xf32, #tpu.memory_space<vmem>>, %arg6: memref<2x1xf32, #tpu.memory_space<vmem>>, %arg7: memref<16x16xf32, #tpu.memory_space<vmem>>, %arg8: memref<16x1xf32, #tpu.memory_space<vmem>>, %arg9: memref<16x16xf32, #tpu.memory_space<vmem>>, %arg10: memref<16x16xf32, #tpu.memory_space<vmem>>, %arg11: memref<16x16xf32, #tpu.memory_space<vmem>>, %arg12: memref<16x1xf32, #tpu.memory_space<vmem>>, %arg13: memref<49x16xf32, #tpu.memory_space<vmem>>, %arg14: memref<49x256xf32, #tpu.memory_space<vmem>>, %arg15: memref<1x16x256xf32, #tpu.memory_space<vmem>>, %arg16: memref<1x16x256xf32, #tpu.memory_space<vmem>>, %arg17: memref<1x16x256xf32, #tpu.memory_space<vmem>>, %arg18: memref<1x1x256xf32, #tpu.memory_space<vmem>>) attributes {dimension_semantics = [#tpu.dimension_semantics<parallel>], iteration_bounds = array<i64: 2>, scalar_prefetch = 1 : i64, scratch_operands = 0 : i64, tpu.core_type = #tpu.core_type<tc>, window_params = [{transform_indices = @transform_0, window_bounds = array<i64: 1, 16, 256>}, {pipeline_mode = #tpu.pipeline_mode<synchronous>, transform_indices = @transform_1, window_bounds = array<i64: 2, 16>}, {pipeline_mode = #tpu.pipeline_mode<synchronous>, transform_indices = @transform_2, window_bounds = array<i64: 2, 1>}, {pipeline_mode = #tpu.pipeline_mode<synchronous>, transform_indices = @transform_3, window_bounds = array<i64: 2, 16>}, {pipeline_mode = #tpu.pipeline_mode<synchronous>, transform_indices = @transform_4, window_bounds = array<i64: 2, 1>}, {pipeline_mode = #tpu.pipeline_mode<synchronous>, transform_indices = @transform_5, window_bounds = array<i64: 16, 16>}, {pipeline_mode = #tpu.pipeline_mode<synchronous>, transform_indices = @transform_6, window_bounds = array<i64: 16, 1>}, {pipeline_mode = #tpu.pipeline_mode<synchronous>, transform_indices = @transform_7, window_bounds = array<i64: 16, 16>}, {pipeline_mode = #tpu.pipeline_mode<synchronous>, transform_indices = @transform_8, window_bounds = array<i64: 16, 16>}, {pipeline_mode = #tpu.pipeline_mode<synchronous>, transform_indices = @transform_9, window_bounds = array<i64: 16, 16>}, {pipeline_mode = #tpu.pipeline_mode<synchronous>, transform_indices = @transform_10, window_bounds = array<i64: 16, 1>}, {pipeline_mode = #tpu.pipeline_mode<synchronous>, transform_indices = @transform_11, window_bounds = array<i64: 49, 16>}, {pipeline_mode = #tpu.pipeline_mode<synchronous>, transform_indices = @transform_12, window_bounds = array<i64: 49, 256>}, {transform_indices = @transform_13, window_bounds = array<i64: 1, 16, 256>}, {transform_indices = @transform_14, window_bounds = array<i64: 1, 16, 256>}, {transform_indices = @transform_15, window_bounds = array<i64: 1, 16, 256>}, {transform_indices = @transform_16, window_bounds = array<i64: 1, 1, 256>}]} {
    %c0 = arith.constant 0 : index
    %c0_0 = arith.constant 0 : index
    %c0_1 = arith.constant 0 : index
    %0 = vector.load %arg2[%c0, %c0_0, %c0_1] : memref<1x16x256xf32, #tpu.memory_space<vmem>>, vector<1x16x256xf32>
    %1 = vector.shape_cast %0 : vector<1x16x256xf32> to vector<16x256xf32>
    "tpu.trace_start"() <{level = 10 : i32, message = "cn,dn->cd"}> : () -> ()
    %cst = arith.constant dense<0.000000e+00> : vector<16x16xf32>
    %2 = tpu.matmul %1, %1, %cst {dimension_numbers = #tpu.dot_dimension_numbers<[1], [1], [0], [0], [0, 0, 1, 0], [], []>} : vector<16x256xf32>, vector<16x256xf32>, vector<16x16xf32> -> vector<16x16xf32>
    "tpu.trace_stop"() : () -> ()
    %cst_2 = arith.constant dense<0xFF800000> : vector<16xf32>
    %3 = vector.multi_reduction <maximumf>, %2, %cst_2 [1] : vector<16x16xf32> to vector<16xf32>
    %4 = vector.shape_cast %3 : vector<16xf32> to vector<16x1xf32>
    %5 = vector.broadcast %4 : vector<16x1xf32> to vector<16x16xf32>
    %6 = arith.subf %2, %5 : vector<16x16xf32>
    %7 = math.exp %6 : vector<16x16xf32>
    %cst_3 = arith.constant dense<0.000000e+00> : vector<16xf32>
    %8 = vector.multi_reduction <add>, %7, %cst_3 [1] : vector<16x16xf32> to vector<16xf32>
    %9 = vector.shape_cast %8 : vector<16xf32> to vector<16x1xf32>
    %cst_4 = arith.constant dense<0.000000e+00> : vector<16x256xf32>
    %10 = tpu.matmul %7, %1, %cst_4 {dimension_numbers = #tpu.dot_dimension_numbers<[1], [0], [0], [1], [0, 0, 1, 1], [], []>} : vector<16x16xf32>, vector<16x256xf32>, vector<16x256xf32> -> vector<16x256xf32>
    %c0_5 = arith.constant 0 : index
    %11 = memref.load %arg1[%c0_5] : memref<3xf32, #tpu.memory_space<smem>>
    %12 = tpu.reciprocal %9 {approx = true} : vector<16x1xf32> -> vector<16x1xf32>
    %13 = arith.mulf %9, %12 : vector<16x1xf32>
    %cst_6 = arith.constant 2.000000e+00 : f32
    %14 = vector.broadcast %cst_6 : f32 to vector<16x1xf32>
    %15 = arith.subf %14, %13 : vector<16x1xf32>
    %16 = arith.mulf %12, %15 : vector<16x1xf32>
    %17 = vector.broadcast %16 : vector<16x1xf32> to vector<16x256xf32>
    %18 = arith.mulf %10, %17 : vector<16x256xf32>
    %19 = vector.broadcast %11 : f32 to vector<16x256xf32>
    %20 = arith.mulf %19, %18 : vector<16x256xf32>
    %21 = arith.addf %20, %1 : vector<16x256xf32>
    %c0_7 = arith.constant 0 : index
    %c0_8 = arith.constant 0 : index
    %c0_9 = arith.constant 0 : index
    %22 = vector.load %arg15[%c0_7, %c0_8, %c0_9] : memref<1x16x256xf32, #tpu.memory_space<vmem>>, vector<1x16x256xf32>
    %23 = vector.shape_cast %22 : vector<1x16x256xf32> to vector<16x256xf32>
    %24 = vector.shape_cast %21 : vector<16x256xf32> to vector<1x16x256xf32>
    tpu.vector_store %arg15[%c0_7, %c0_8, %c0_9], %24 {strides = array<i32>} : memref<1x16x256xf32, #tpu.memory_space<vmem>>, vector<1x16x256xf32>,
    %c0_10 = arith.constant 0 : index
    %c0_11 = arith.constant 0 : index
    %25 = vector.load %arg3[%c0_10, %c0_11] : memref<2x16xf32, #tpu.memory_space<vmem>>, vector<2x16xf32>
    %cst_12 = arith.constant dense<0.000000e+00> : vector<2x256xf32>
    %26 = tpu.matmul %25, %21, %cst_12 {dimension_numbers = #tpu.dot_dimension_numbers<[1], [0], [0], [1], [0, 0, 1, 1], [], []>} : vector<2x16xf32>, vector<16x256xf32>, vector<2x256xf32> -> vector<2x256xf32>
    %c0_13 = arith.constant 0 : index
    %c0_14 = arith.constant 0 : index
    %27 = vector.load %arg4[%c0_13, %c0_14] : memref<2x1xf32, #tpu.memory_space<vmem>>, vector<2x1xf32>
    %28 = vector.broadcast %27 : vector<2x1xf32> to vector<2x256xf32>
    %29 = arith.addf %26, %28 : vector<2x256xf32>
    %c0_15 = arith.constant 0 : index
    %c0_16 = arith.constant 0 : index
    %30 = vector.load %arg5[%c0_15, %c0_16] : memref<2x16xf32, #tpu.memory_space<vmem>>, vector<2x16xf32>
    %cst_17 = arith.constant dense<0.000000e+00> : vector<2x256xf32>
    %31 = tpu.matmul %30, %21, %cst_17 {dimension_numbers = #tpu.dot_dimension_numbers<[1], [0], [0], [1], [0, 0, 1, 1], [], []>} : vector<2x16xf32>, vector<16x256xf32>, vector<2x256xf32> -> vector<2x256xf32>
    %c0_18 = arith.constant 0 : index
    %c0_19 = arith.constant 0 : index
    %32 = vector.load %arg6[%c0_18, %c0_19] : memref<2x1xf32, #tpu.memory_space<vmem>>, vector<2x1xf32>
    %33 = vector.broadcast %32 : vector<2x1xf32> to vector<2x256xf32>
    %34 = arith.addf %31, %33 : vector<2x256xf32>
    %c0_20 = arith.constant 0 : index
    %c0_21 = arith.constant 0 : index
    %35 = vector.load %arg7[%c0_20, %c0_21] : memref<16x16xf32, #tpu.memory_space<vmem>>, vector<16x16xf32>
    %cst_22 = arith.constant dense<0.000000e+00> : vector<16x256xf32>
    %36 = tpu.matmul %35, %21, %cst_22 {dimension_numbers = #tpu.dot_dimension_numbers<[1], [0], [0], [1], [0, 0, 1, 1], [], []>} : vector<16x16xf32>, vector<16x256xf32>, vector<16x256xf32> -> vector<16x256xf32>
    %c0_23 = arith.constant 0 : index
    %c0_24 = arith.constant 0 : index
    %37 = vector.load %arg8[%c0_23, %c0_24] : memref<16x1xf32, #tpu.memory_space<vmem>>, vector<16x1xf32>
    %38 = vector.broadcast %37 : vector<16x1xf32> to vector<16x256xf32>
    %39 = arith.addf %36, %38 : vector<16x256xf32>
    "tpu.trace_start"() <{level = 10 : i32, message = "ci,cj->ij"}> : () -> ()
    %cst_25 = arith.constant dense<0.000000e+00> : vector<256x256xf32>
    %40 = tpu.matmul %29, %34, %cst_25 {dimension_numbers = #tpu.dot_dimension_numbers<[0], [0], [1], [1], [0, 1, 1, 1], [], []>} : vector<2x256xf32>, vector<2x256xf32>, vector<256x256xf32> -> vector<256x256xf32>
    "tpu.trace_stop"() : () -> ()
    %cst_26 = arith.constant dense<0xFF800000> : vector<256xf32>
    %41 = vector.multi_reduction <maximumf>, %40, %cst_26 [1] : vector<256x256xf32> to vector<256xf32>
    %42 = vector.shape_cast %41 : vector<256xf32> to vector<256x1xf32>
    %43 = vector.broadcast %42 : vector<256x1xf32> to vector<256x256xf32>
    %44 = arith.subf %40, %43 : vector<256x256xf32>
    %45 = math.exp %44 : vector<256x256xf32>
    "tpu.trace_start"() <{level = 10 : i32, message = "cj,ij->ci"}> : () -> ()
    %cst_27 = arith.constant dense<0.000000e+00> : vector<16x256xf32>
    %46 = tpu.matmul %39, %45, %cst_27 {dimension_numbers = #tpu.dot_dimension_numbers<[1], [1], [0], [0], [0, 0, 1, 0], [], []>} : vector<16x256xf32>, vector<256x256xf32>, vector<16x256xf32> -> vector<16x256xf32>
    %cst_28 = arith.constant 1.000000e+00 : f32
    "tpu.trace_stop"() : () -> ()
    %47 = vector.broadcast %cst_28 : f32 to vector<1x256xf32>
    "tpu.trace_start"() <{level = 10 : i32, message = "oj,ij->oi"}> : () -> ()
    %cst_29 = arith.constant dense<0.000000e+00> : vector<1x256xf32>
    %48 = tpu.matmul %47, %45, %cst_29 {dimension_numbers = #tpu.dot_dimension_numbers<[1], [1], [0], [0], [0, 0, 1, 0], [], []>} : vector<1x256xf32>, vector<256x256xf32>, vector<1x256xf32> -> vector<1x256xf32>
    "tpu.trace_stop"() : () -> ()
    %c1 = arith.constant 1 : index
    %49 = memref.load %arg1[%c1] : memref<3xf32, #tpu.memory_space<smem>>
    %50 = tpu.reciprocal %48 {approx = true} : vector<1x256xf32> -> vector<1x256xf32>
    %51 = arith.mulf %48, %50 : vector<1x256xf32>
    %cst_30 = arith.constant 2.000000e+00 : f32
    %52 = vector.broadcast %cst_30 : f32 to vector<1x256xf32>
    %53 = arith.subf %52, %51 : vector<1x256xf32>
    %54 = arith.mulf %50, %53 : vector<1x256xf32>
    %55 = vector.broadcast %54 : vector<1x256xf32> to vector<16x256xf32>
    %56 = arith.mulf %46, %55 : vector<16x256xf32>
    %57 = vector.broadcast %49 : f32 to vector<16x256xf32>
    %58 = arith.mulf %57, %56 : vector<16x256xf32>
    %59 = arith.addf %58, %21 : vector<16x256xf32>
    %c0_31 = arith.constant 0 : index
    %c0_32 = arith.constant 0 : index
    %c0_33 = arith.constant 0 : index
    %60 = vector.load %arg16[%c0_31, %c0_32, %c0_33] : memref<1x16x256xf32, #tpu.memory_space<vmem>>, vector<1x16x256xf32>
    %61 = vector.shape_cast %60 : vector<1x16x256xf32> to vector<16x256xf32>
    %62 = vector.shape_cast %59 : vector<16x256xf32> to vector<1x16x256xf32>
    tpu.vector_store %arg16[%c0_31, %c0_32, %c0_33], %62 {strides = array<i32>} : memref<1x16x256xf32, #tpu.memory_space<vmem>>, vector<1x16x256xf32>,
    %c0_34 = arith.constant 0 : index
    %c0_35 = arith.constant 0 : index
    %63 = vector.load %arg9[%c0_34, %c0_35] : memref<16x16xf32, #tpu.memory_space<vmem>>, vector<16x16xf32>
    %cst_36 = arith.constant dense<0.000000e+00> : vector<16x256xf32>
    %64 = tpu.matmul %63, %1, %cst_36 {dimension_numbers = #tpu.dot_dimension_numbers<[1], [0], [0], [1], [0, 0, 1, 1], [], []>} : vector<16x16xf32>, vector<16x256xf32>, vector<16x256xf32> -> vector<16x256xf32>
    %c0_37 = arith.constant 0 : index
    %c0_38 = arith.constant 0 : index
    %65 = vector.load %arg10[%c0_37, %c0_38] : memref<16x16xf32, #tpu.memory_space<vmem>>, vector<16x16xf32>
    %cst_39 = arith.constant dense<0.000000e+00> : vector<16x256xf32>
    %66 = tpu.matmul %65, %21, %cst_39 {dimension_numbers = #tpu.dot_dimension_numbers<[1], [0], [0], [1], [0, 0, 1, 1], [], []>} : vector<16x16xf32>, vector<16x256xf32>, vector<16x256xf32> -> vector<16x256xf32>
    %67 = arith.addf %64, %66 : vector<16x256xf32>
    %c0_40 = arith.constant 0 : index
    %c0_41 = arith.constant 0 : index
    %68 = vector.load %arg11[%c0_40, %c0_41] : memref<16x16xf32, #tpu.memory_space<vmem>>, vector<16x16xf32>
    %cst_42 = arith.constant dense<0.000000e+00> : vector<16x256xf32>
    %69 = tpu.matmul %68, %59, %cst_42 {dimension_numbers = #tpu.dot_dimension_numbers<[1], [0], [0], [1], [0, 0, 1, 1], [], []>} : vector<16x16xf32>, vector<16x256xf32>, vector<16x256xf32> -> vector<16x256xf32>
    %70 = arith.addf %67, %69 : vector<16x256xf32>
    %c0_43 = arith.constant 0 : index
    %c0_44 = arith.constant 0 : index
    %71 = vector.load %arg12[%c0_43, %c0_44] : memref<16x1xf32, #tpu.memory_space<vmem>>, vector<16x1xf32>
    %72 = vector.broadcast %71 : vector<16x1xf32> to vector<16x256xf32>
    %73 = arith.addf %70, %72 : vector<16x256xf32>
    %c0_45 = arith.constant 0 : index
    %c0_46 = arith.constant 0 : index
    %c0_47 = arith.constant 0 : index
    %74 = vector.load %arg17[%c0_45, %c0_46, %c0_47] : memref<1x16x256xf32, #tpu.memory_space<vmem>>, vector<1x16x256xf32>
    %75 = vector.shape_cast %74 : vector<1x16x256xf32> to vector<16x256xf32>
    %76 = vector.shape_cast %73 : vector<16x256xf32> to vector<1x16x256xf32>
    tpu.vector_store %arg17[%c0_45, %c0_46, %c0_47], %76 {strides = array<i32>} : memref<1x16x256xf32, #tpu.memory_space<vmem>>, vector<1x16x256xf32>,
    %c0_48 = arith.constant 0 : index
    %c0_49 = arith.constant 0 : index
    %77 = vector.load %arg13[%c0_48, %c0_49] : memref<49x16xf32, #tpu.memory_space<vmem>>, vector<49x16xf32>
    %cst_50 = arith.constant dense<0.000000e+00> : vector<49x256xf32>
    %78 = tpu.matmul %77, %73, %cst_50 {dimension_numbers = #tpu.dot_dimension_numbers<[1], [0], [0], [1], [0, 0, 1, 1], [], []>} : vector<49x16xf32>, vector<16x256xf32>, vector<49x256xf32> -> vector<49x256xf32>
    %c0_51 = arith.constant 0 : index
    %c0_52 = arith.constant 0 : index
    %79 = vector.load %arg14[%c0_51, %c0_52] : memref<49x256xf32, #tpu.memory_space<vmem>>, vector<49x256xf32>
    %80 = arith.mulf %78, %79 : vector<49x256xf32>
    %cst_53 = arith.constant 0.000000e+00 : f32
    %81 = vector.broadcast %cst_53 : f32 to vector<1x256xf32>
    %82 = vector.extract_strided_slice %80 {offsets = [0, 0], sizes = [1, 256], strides = [1, 1]} : vector<49x256xf32> to vector<1x256xf32>
    %c51_i32 = arith.constant 51 : i32
    %83 = tpu.dynamic_rotate %82 by %c51_i32 dim 1 : vector<1x256xf32>, i32 -> vector<1x256xf32>
    %84 = arith.addf %81, %83 : vector<1x256xf32>
    %85 = vector.extract_strided_slice %80 {offsets = [1, 0], sizes = [1, 256], strides = [1, 1]} : vector<49x256xf32> to vector<1x256xf32>
    %c50_i32 = arith.constant 50 : i32
    %86 = tpu.dynamic_rotate %85 by %c50_i32 dim 1 : vector<1x256xf32>, i32 -> vector<1x256xf32>
    %87 = arith.addf %84, %86 : vector<1x256xf32>
    %88 = vector.extract_strided_slice %80 {offsets = [2, 0], sizes = [1, 256], strides = [1, 1]} : vector<49x256xf32> to vector<1x256xf32>
    %c49_i32 = arith.constant 49 : i32
    %89 = tpu.dynamic_rotate %88 by %c49_i32 dim 1 : vector<1x256xf32>, i32 -> vector<1x256xf32>
    %90 = arith.addf %87, %89 : vector<1x256xf32>
    %91 = vector.extract_strided_slice %80 {offsets = [3, 0], sizes = [1, 256], strides = [1, 1]} : vector<49x256xf32> to vector<1x256xf32>
    %c48_i32 = arith.constant 48 : i32
    %92 = tpu.dynamic_rotate %91 by %c48_i32 dim 1 : vector<1x256xf32>, i32 -> vector<1x256xf32>
    %93 = arith.addf %90, %92 : vector<1x256xf32>
    %94 = vector.extract_strided_slice %80 {offsets = [4, 0], sizes = [1, 256], strides = [1, 1]} : vector<49x256xf32> to vector<1x256xf32>
    %c47_i32 = arith.constant 47 : i32
    %95 = tpu.dynamic_rotate %94 by %c47_i32 dim 1 : vector<1x256xf32>, i32 -> vector<1x256xf32>
    %96 = arith.addf %93, %95 : vector<1x256xf32>
    %97 = vector.extract_strided_slice %80 {offsets = [5, 0], sizes = [1, 256], strides = [1, 1]} : vector<49x256xf32> to vector<1x256xf32>
    %c46_i32 = arith.constant 46 : i32
    %98 = tpu.dynamic_rotate %97 by %c46_i32 dim 1 : vector<1x256xf32>, i32 -> vector<1x256xf32>
    %99 = arith.addf %96, %98 : vector<1x256xf32>
    %100 = vector.extract_strided_slice %80 {offsets = [6, 0], sizes = [1, 256], strides = [1, 1]} : vector<49x256xf32> to vector<1x256xf32>
    %c45_i32 = arith.constant 45 : i32
    %101 = tpu.dynamic_rotate %100 by %c45_i32 dim 1 : vector<1x256xf32>, i32 -> vector<1x256xf32>
    %102 = arith.addf %99, %101 : vector<1x256xf32>
    %103 = vector.extract_strided_slice %80 {offsets = [7, 0], sizes = [1, 256], strides = [1, 1]} : vector<49x256xf32> to vector<1x256xf32>
    %c35_i32 = arith.constant 35 : i32
    %104 = tpu.dynamic_rotate %103 by %c35_i32 dim 1 : vector<1x256xf32>, i32 -> vector<1x256xf32>
    %105 = arith.addf %102, %104 : vector<1x256xf32>
    %106 = vector.extract_strided_slice %80 {offsets = [8, 0], sizes = [1, 256], strides = [1, 1]} : vector<49x256xf32> to vector<1x256xf32>
    %c34_i32 = arith.constant 34 : i32
    %107 = tpu.dynamic_rotate %106 by %c34_i32 dim 1 : vector<1x256xf32>, i32 -> vector<1x256xf32>
    %108 = arith.addf %105, %107 : vector<1x256xf32>
    %109 = vector.extract_strided_slice %80 {offsets = [9, 0], sizes = [1, 256], strides = [1, 1]} : vector<49x256xf32> to vector<1x256xf32>
    %c33_i32 = arith.constant 33 : i32
    %110 = tpu.dynamic_rotate %109 by %c33_i32 dim 1 : vector<1x256xf32>, i32 -> vector<1x256xf32>
    %111 = arith.addf %108, %110 : vector<1x256xf32>
    %112 = vector.extract_strided_slice %80 {offsets = [10, 0], sizes = [1, 256], strides = [1, 1]} : vector<49x256xf32> to vector<1x256xf32>
    %c32_i32 = arith.constant 32 : i32
    %113 = tpu.dynamic_rotate %112 by %c32_i32 dim 1 : vector<1x256xf32>, i32 -> vector<1x256xf32>
    %114 = arith.addf %111, %113 : vector<1x256xf32>
    %115 = vector.extract_strided_slice %80 {offsets = [11, 0], sizes = [1, 256], strides = [1, 1]} : vector<49x256xf32> to vector<1x256xf32>
    %c31_i32 = arith.constant 31 : i32
    %116 = tpu.dynamic_rotate %115 by %c31_i32 dim 1 : vector<1x256xf32>, i32 -> vector<1x256xf32>
    %117 = arith.addf %114, %116 : vector<1x256xf32>
    %118 = vector.extract_strided_slice %80 {offsets = [12, 0], sizes = [1, 256], strides = [1, 1]} : vector<49x256xf32> to vector<1x256xf32>
    %c30_i32 = arith.constant 30 : i32
    %119 = tpu.dynamic_rotate %118 by %c30_i32 dim 1 : vector<1x256xf32>, i32 -> vector<1x256xf32>
    %120 = arith.addf %117, %119 : vector<1x256xf32>
    %121 = vector.extract_strided_slice %80 {offsets = [13, 0], sizes = [1, 256], strides = [1, 1]} : vector<49x256xf32> to vector<1x256xf32>
    %c29_i32 = arith.constant 29 : i32
    %122 = tpu.dynamic_rotate %121 by %c29_i32 dim 1 : vector<1x256xf32>, i32 -> vector<1x256xf32>
    %123 = arith.addf %120, %122 : vector<1x256xf32>
    %124 = vector.extract_strided_slice %80 {offsets = [14, 0], sizes = [1, 256], strides = [1, 1]} : vector<49x256xf32> to vector<1x256xf32>
    %c19_i32 = arith.constant 19 : i32
    %125 = tpu.dynamic_rotate %124 by %c19_i32 dim 1 : vector<1x256xf32>, i32 -> vector<1x256xf32>
    %126 = arith.addf %123, %125 : vector<1x256xf32>
    %127 = vector.extract_strided_slice %80 {offsets = [15, 0], sizes = [1, 256], strides = [1, 1]} : vector<49x256xf32> to vector<1x256xf32>
    %c18_i32 = arith.constant 18 : i32
    %128 = tpu.dynamic_rotate %127 by %c18_i32 dim 1 : vector<1x256xf32>, i32 -> vector<1x256xf32>
    %129 = arith.addf %126, %128 : vector<1x256xf32>
    %130 = vector.extract_strided_slice %80 {offsets = [16, 0], sizes = [1, 256], strides = [1, 1]} : vector<49x256xf32> to vector<1x256xf32>
    %c17_i32 = arith.constant 17 : i32
    %131 = tpu.dynamic_rotate %130 by %c17_i32 dim 1 : vector<1x256xf32>, i32 -> vector<1x256xf32>
    %132 = arith.addf %129, %131 : vector<1x256xf32>
    %133 = vector.extract_strided_slice %80 {offsets = [17, 0], sizes = [1, 256], strides = [1, 1]} : vector<49x256xf32> to vector<1x256xf32>
    %c16_i32 = arith.constant 16 : i32
    %134 = tpu.dynamic_rotate %133 by %c16_i32 dim 1 : vector<1x256xf32>, i32 -> vector<1x256xf32>
    %135 = arith.addf %132, %134 : vector<1x256xf32>
    %136 = vector.extract_strided_slice %80 {offsets = [18, 0], sizes = [1, 256], strides = [1, 1]} : vector<49x256xf32> to vector<1x256xf32>
    %c15_i32 = arith.constant 15 : i32
    %137 = tpu.dynamic_rotate %136 by %c15_i32 dim 1 : vector<1x256xf32>, i32 -> vector<1x256xf32>
    %138 = arith.addf %135, %137 : vector<1x256xf32>
    %139 = vector.extract_strided_slice %80 {offsets = [19, 0], sizes = [1, 256], strides = [1, 1]} : vector<49x256xf32> to vector<1x256xf32>
    %c14_i32 = arith.constant 14 : i32
    %140 = tpu.dynamic_rotate %139 by %c14_i32 dim 1 : vector<1x256xf32>, i32 -> vector<1x256xf32>
    %141 = arith.addf %138, %140 : vector<1x256xf32>
    %142 = vector.extract_strided_slice %80 {offsets = [20, 0], sizes = [1, 256], strides = [1, 1]} : vector<49x256xf32> to vector<1x256xf32>
    %c13_i32 = arith.constant 13 : i32
    %143 = tpu.dynamic_rotate %142 by %c13_i32 dim 1 : vector<1x256xf32>, i32 -> vector<1x256xf32>
    %144 = arith.addf %141, %143 : vector<1x256xf32>
    %145 = vector.extract_strided_slice %80 {offsets = [21, 0], sizes = [1, 256], strides = [1, 1]} : vector<49x256xf32> to vector<1x256xf32>
    %c3_i32 = arith.constant 3 : i32
    %146 = tpu.dynamic_rotate %145 by %c3_i32 dim 1 : vector<1x256xf32>, i32 -> vector<1x256xf32>
    %147 = arith.addf %144, %146 : vector<1x256xf32>
    %148 = vector.extract_strided_slice %80 {offsets = [22, 0], sizes = [1, 256], strides = [1, 1]} : vector<49x256xf32> to vector<1x256xf32>
    %c2_i32 = arith.constant 2 : i32
    %149 = tpu.dynamic_rotate %148 by %c2_i32 dim 1 : vector<1x256xf32>, i32 -> vector<1x256xf32>
    %150 = arith.addf %147, %149 : vector<1x256xf32>
    %151 = vector.extract_strided_slice %80 {offsets = [23, 0], sizes = [1, 256], strides = [1, 1]} : vector<49x256xf32> to vector<1x256xf32>
    %c1_i32 = arith.constant 1 : i32
    %152 = tpu.dynamic_rotate %151 by %c1_i32 dim 1 : vector<1x256xf32>, i32 -> vector<1x256xf32>
    %153 = arith.addf %150, %152 : vector<1x256xf32>
    %154 = vector.extract_strided_slice %80 {offsets = [24, 0], sizes = [1, 256], strides = [1, 1]} : vector<49x256xf32> to vector<1x256xf32>
    %c0_i32 = arith.constant 0 : i32
    %155 = tpu.dynamic_rotate %154 by %c0_i32 dim 1 : vector<1x256xf32>, i32 -> vector<1x256xf32>
    %156 = arith.addf %153, %155 : vector<1x256xf32>
    %157 = vector.extract_strided_slice %80 {offsets = [25, 0], sizes = [1, 256], strides = [1, 1]} : vector<49x256xf32> to vector<1x256xf32>
    %c255_i32 = arith.constant 255 : i32
    %158 = tpu.dynamic_rotate %157 by %c255_i32 dim 1 : vector<1x256xf32>, i32 -> vector<1x256xf32>
    %159 = arith.addf %156, %158 : vector<1x256xf32>
    %160 = vector.extract_strided_slice %80 {offsets = [26, 0], sizes = [1, 256], strides = [1, 1]} : vector<49x256xf32> to vector<1x256xf32>
    %c254_i32 = arith.constant 254 : i32
    %161 = tpu.dynamic_rotate %160 by %c254_i32 dim 1 : vector<1x256xf32>, i32 -> vector<1x256xf32>
    %162 = arith.addf %159, %161 : vector<1x256xf32>
    %163 = vector.extract_strided_slice %80 {offsets = [27, 0], sizes = [1, 256], strides = [1, 1]} : vector<49x256xf32> to vector<1x256xf32>
    %c253_i32 = arith.constant 253 : i32
    %164 = tpu.dynamic_rotate %163 by %c253_i32 dim 1 : vector<1x256xf32>, i32 -> vector<1x256xf32>
    %165 = arith.addf %162, %164 : vector<1x256xf32>
    %166 = vector.extract_strided_slice %80 {offsets = [28, 0], sizes = [1, 256], strides = [1, 1]} : vector<49x256xf32> to vector<1x256xf32>
    %c243_i32 = arith.constant 243 : i32
    %167 = tpu.dynamic_rotate %166 by %c243_i32 dim 1 : vector<1x256xf32>, i32 -> vector<1x256xf32>
    %168 = arith.addf %165, %167 : vector<1x256xf32>
    %169 = vector.extract_strided_slice %80 {offsets = [29, 0], sizes = [1, 256], strides = [1, 1]} : vector<49x256xf32> to vector<1x256xf32>
    %c242_i32 = arith.constant 242 : i32
    %170 = tpu.dynamic_rotate %169 by %c242_i32 dim 1 : vector<1x256xf32>, i32 -> vector<1x256xf32>
    %171 = arith.addf %168, %170 : vector<1x256xf32>
    %172 = vector.extract_strided_slice %80 {offsets = [30, 0], sizes = [1, 256], strides = [1, 1]} : vector<49x256xf32> to vector<1x256xf32>
    %c241_i32 = arith.constant 241 : i32
    %173 = tpu.dynamic_rotate %172 by %c241_i32 dim 1 : vector<1x256xf32>, i32 -> vector<1x256xf32>
    %174 = arith.addf %171, %173 : vector<1x256xf32>
    %175 = vector.extract_strided_slice %80 {offsets = [31, 0], sizes = [1, 256], strides = [1, 1]} : vector<49x256xf32> to vector<1x256xf32>
    %c240_i32 = arith.constant 240 : i32
    %176 = tpu.dynamic_rotate %175 by %c240_i32 dim 1 : vector<1x256xf32>, i32 -> vector<1x256xf32>
    %177 = arith.addf %174, %176 : vector<1x256xf32>
    %178 = vector.extract_strided_slice %80 {offsets = [32, 0], sizes = [1, 256], strides = [1, 1]} : vector<49x256xf32> to vector<1x256xf32>
    %c239_i32 = arith.constant 239 : i32
    %179 = tpu.dynamic_rotate %178 by %c239_i32 dim 1 : vector<1x256xf32>, i32 -> vector<1x256xf32>
    %180 = arith.addf %177, %179 : vector<1x256xf32>
    %181 = vector.extract_strided_slice %80 {offsets = [33, 0], sizes = [1, 256], strides = [1, 1]} : vector<49x256xf32> to vector<1x256xf32>
    %c238_i32 = arith.constant 238 : i32
    %182 = tpu.dynamic_rotate %181 by %c238_i32 dim 1 : vector<1x256xf32>, i32 -> vector<1x256xf32>
    %183 = arith.addf %180, %182 : vector<1x256xf32>
    %184 = vector.extract_strided_slice %80 {offsets = [34, 0], sizes = [1, 256], strides = [1, 1]} : vector<49x256xf32> to vector<1x256xf32>
    %c237_i32 = arith.constant 237 : i32
    %185 = tpu.dynamic_rotate %184 by %c237_i32 dim 1 : vector<1x256xf32>, i32 -> vector<1x256xf32>
    %186 = arith.addf %183, %185 : vector<1x256xf32>
    %187 = vector.extract_strided_slice %80 {offsets = [35, 0], sizes = [1, 256], strides = [1, 1]} : vector<49x256xf32> to vector<1x256xf32>
    %c227_i32 = arith.constant 227 : i32
    %188 = tpu.dynamic_rotate %187 by %c227_i32 dim 1 : vector<1x256xf32>, i32 -> vector<1x256xf32>
    %189 = arith.addf %186, %188 : vector<1x256xf32>
    %190 = vector.extract_strided_slice %80 {offsets = [36, 0], sizes = [1, 256], strides = [1, 1]} : vector<49x256xf32> to vector<1x256xf32>
    %c226_i32 = arith.constant 226 : i32
    %191 = tpu.dynamic_rotate %190 by %c226_i32 dim 1 : vector<1x256xf32>, i32 -> vector<1x256xf32>
    %192 = arith.addf %189, %191 : vector<1x256xf32>
    %193 = vector.extract_strided_slice %80 {offsets = [37, 0], sizes = [1, 256], strides = [1, 1]} : vector<49x256xf32> to vector<1x256xf32>
    %c225_i32 = arith.constant 225 : i32
    %194 = tpu.dynamic_rotate %193 by %c225_i32 dim 1 : vector<1x256xf32>, i32 -> vector<1x256xf32>
    %195 = arith.addf %192, %194 : vector<1x256xf32>
    %196 = vector.extract_strided_slice %80 {offsets = [38, 0], sizes = [1, 256], strides = [1, 1]} : vector<49x256xf32> to vector<1x256xf32>
    %c224_i32 = arith.constant 224 : i32
    %197 = tpu.dynamic_rotate %196 by %c224_i32 dim 1 : vector<1x256xf32>, i32 -> vector<1x256xf32>
    %198 = arith.addf %195, %197 : vector<1x256xf32>
    %199 = vector.extract_strided_slice %80 {offsets = [39, 0], sizes = [1, 256], strides = [1, 1]} : vector<49x256xf32> to vector<1x256xf32>
    %c223_i32 = arith.constant 223 : i32
    %200 = tpu.dynamic_rotate %199 by %c223_i32 dim 1 : vector<1x256xf32>, i32 -> vector<1x256xf32>
    %201 = arith.addf %198, %200 : vector<1x256xf32>
    %202 = vector.extract_strided_slice %80 {offsets = [40, 0], sizes = [1, 256], strides = [1, 1]} : vector<49x256xf32> to vector<1x256xf32>
    %c222_i32 = arith.constant 222 : i32
    %203 = tpu.dynamic_rotate %202 by %c222_i32 dim 1 : vector<1x256xf32>, i32 -> vector<1x256xf32>
    %204 = arith.addf %201, %203 : vector<1x256xf32>
    %205 = vector.extract_strided_slice %80 {offsets = [41, 0], sizes = [1, 256], strides = [1, 1]} : vector<49x256xf32> to vector<1x256xf32>
    %c221_i32 = arith.constant 221 : i32
    %206 = tpu.dynamic_rotate %205 by %c221_i32 dim 1 : vector<1x256xf32>, i32 -> vector<1x256xf32>
    %207 = arith.addf %204, %206 : vector<1x256xf32>
    %208 = vector.extract_strided_slice %80 {offsets = [42, 0], sizes = [1, 256], strides = [1, 1]} : vector<49x256xf32> to vector<1x256xf32>
    %c211_i32 = arith.constant 211 : i32
    %209 = tpu.dynamic_rotate %208 by %c211_i32 dim 1 : vector<1x256xf32>, i32 -> vector<1x256xf32>
    %210 = arith.addf %207, %209 : vector<1x256xf32>
    %211 = vector.extract_strided_slice %80 {offsets = [43, 0], sizes = [1, 256], strides = [1, 1]} : vector<49x256xf32> to vector<1x256xf32>
    %c210_i32 = arith.constant 210 : i32
    %212 = tpu.dynamic_rotate %211 by %c210_i32 dim 1 : vector<1x256xf32>, i32 -> vector<1x256xf32>
    %213 = arith.addf %210, %212 : vector<1x256xf32>
    %214 = vector.extract_strided_slice %80 {offsets = [44, 0], sizes = [1, 256], strides = [1, 1]} : vector<49x256xf32> to vector<1x256xf32>
    %c209_i32 = arith.constant 209 : i32
    %215 = tpu.dynamic_rotate %214 by %c209_i32 dim 1 : vector<1x256xf32>, i32 -> vector<1x256xf32>
    %216 = arith.addf %213, %215 : vector<1x256xf32>
    %217 = vector.extract_strided_slice %80 {offsets = [45, 0], sizes = [1, 256], strides = [1, 1]} : vector<49x256xf32> to vector<1x256xf32>
    %c208_i32 = arith.constant 208 : i32
    %218 = tpu.dynamic_rotate %217 by %c208_i32 dim 1 : vector<1x256xf32>, i32 -> vector<1x256xf32>
    %219 = arith.addf %216, %218 : vector<1x256xf32>
    %220 = vector.extract_strided_slice %80 {offsets = [46, 0], sizes = [1, 256], strides = [1, 1]} : vector<49x256xf32> to vector<1x256xf32>
    %c207_i32 = arith.constant 207 : i32
    %221 = tpu.dynamic_rotate %220 by %c207_i32 dim 1 : vector<1x256xf32>, i32 -> vector<1x256xf32>
    %222 = arith.addf %219, %221 : vector<1x256xf32>
    %223 = vector.extract_strided_slice %80 {offsets = [47, 0], sizes = [1, 256], strides = [1, 1]} : vector<49x256xf32> to vector<1x256xf32>
    %c206_i32 = arith.constant 206 : i32
    %224 = tpu.dynamic_rotate %223 by %c206_i32 dim 1 : vector<1x256xf32>, i32 -> vector<1x256xf32>
    %225 = arith.addf %222, %224 : vector<1x256xf32>
    %226 = vector.extract_strided_slice %80 {offsets = [48, 0], sizes = [1, 256], strides = [1, 1]} : vector<49x256xf32> to vector<1x256xf32>
    %c205_i32 = arith.constant 205 : i32
    %227 = tpu.dynamic_rotate %226 by %c205_i32 dim 1 : vector<1x256xf32>, i32 -> vector<1x256xf32>
    %228 = arith.addf %225, %227 : vector<1x256xf32>
    %c2 = arith.constant 2 : index
    %229 = memref.load %arg1[%c2] : memref<3xf32, #tpu.memory_space<smem>>
    %230 = vector.broadcast %229 : f32 to vector<1x256xf32>
    %231 = arith.addf %228, %230 : vector<1x256xf32>
    %c0_54 = arith.constant 0 : index
    %c0_55 = arith.constant 0 : index
    %c0_56 = arith.constant 0 : index
    %232 = vector.load %arg18[%c0_54, %c0_55, %c0_56] : memref<1x1x256xf32, #tpu.memory_space<vmem>>, vector<1x1x256xf32>
    %233 = vector.shape_cast %232 : vector<1x1x256xf32> to vector<1x256xf32>
    %234 = vector.shape_cast %231 : vector<1x256xf32> to vector<1x1x256xf32>
    tpu.vector_store %arg18[%c0_54, %c0_55, %c0_56], %234 {strides = array<i32>} : memref<1x1x256xf32, #tpu.memory_space<vmem>>, vector<1x1x256xf32>,
    return
  }
  func.func @transform_0(%arg0: i32, %arg1: memref<3xf32, #tpu.memory_space<smem>>) -> (i32, i32, i32) {
    %c0_i32 = arith.constant 0 : i32
    %c0_i32_0 = arith.constant 0 : i32
    %c0_i32_1 = arith.constant 0 : i32
    return %arg0, %c0_i32, %c0_i32_0 : i32, i32, i32
  }
  func.func @transform_1(%arg0: i32, %arg1: memref<3xf32, #tpu.memory_space<smem>>) -> (i32, i32) {
    %c0_i32 = arith.constant 0 : i32
    %c0_i32_0 = arith.constant 0 : i32
    %c0_i32_1 = arith.constant 0 : i32
    return %c0_i32, %c0_i32_0 : i32, i32
  }
  func.func @transform_2(%arg0: i32, %arg1: memref<3xf32, #tpu.memory_space<smem>>) -> (i32, i32) {
    %c0_i32 = arith.constant 0 : i32
    %c0_i32_0 = arith.constant 0 : i32
    %c0_i32_1 = arith.constant 0 : i32
    return %c0_i32, %c0_i32_0 : i32, i32
  }
  func.func @transform_3(%arg0: i32, %arg1: memref<3xf32, #tpu.memory_space<smem>>) -> (i32, i32) {
    %c0_i32 = arith.constant 0 : i32
    %c0_i32_0 = arith.constant 0 : i32
    %c0_i32_1 = arith.constant 0 : i32
    return %c0_i32, %c0_i32_0 : i32, i32
  }
  func.func @transform_4(%arg0: i32, %arg1: memref<3xf32, #tpu.memory_space<smem>>) -> (i32, i32) {
    %c0_i32 = arith.constant 0 : i32
    %c0_i32_0 = arith.constant 0 : i32
    %c0_i32_1 = arith.constant 0 : i32
    return %c0_i32, %c0_i32_0 : i32, i32
  }
  func.func @transform_5(%arg0: i32, %arg1: memref<3xf32, #tpu.memory_space<smem>>) -> (i32, i32) {
    %c0_i32 = arith.constant 0 : i32
    %c0_i32_0 = arith.constant 0 : i32
    %c0_i32_1 = arith.constant 0 : i32
    return %c0_i32, %c0_i32_0 : i32, i32
  }
  func.func @transform_6(%arg0: i32, %arg1: memref<3xf32, #tpu.memory_space<smem>>) -> (i32, i32) {
    %c0_i32 = arith.constant 0 : i32
    %c0_i32_0 = arith.constant 0 : i32
    %c0_i32_1 = arith.constant 0 : i32
    return %c0_i32, %c0_i32_0 : i32, i32
  }
  func.func @transform_7(%arg0: i32, %arg1: memref<3xf32, #tpu.memory_space<smem>>) -> (i32, i32) {
    %c0_i32 = arith.constant 0 : i32
    %c0_i32_0 = arith.constant 0 : i32
    %c0_i32_1 = arith.constant 0 : i32
    return %c0_i32, %c0_i32_0 : i32, i32
  }
  func.func @transform_8(%arg0: i32, %arg1: memref<3xf32, #tpu.memory_space<smem>>) -> (i32, i32) {
    %c0_i32 = arith.constant 0 : i32
    %c0_i32_0 = arith.constant 0 : i32
    %c0_i32_1 = arith.constant 0 : i32
    return %c0_i32, %c0_i32_0 : i32, i32
  }
  func.func @transform_9(%arg0: i32, %arg1: memref<3xf32, #tpu.memory_space<smem>>) -> (i32, i32) {
    %c0_i32 = arith.constant 0 : i32
    %c0_i32_0 = arith.constant 0 : i32
    %c0_i32_1 = arith.constant 0 : i32
    return %c0_i32, %c0_i32_0 : i32, i32
  }
  func.func @transform_10(%arg0: i32, %arg1: memref<3xf32, #tpu.memory_space<smem>>) -> (i32, i32) {
    %c0_i32 = arith.constant 0 : i32
    %c0_i32_0 = arith.constant 0 : i32
    %c0_i32_1 = arith.constant 0 : i32
    return %c0_i32, %c0_i32_0 : i32, i32
  }
  func.func @transform_11(%arg0: i32, %arg1: memref<3xf32, #tpu.memory_space<smem>>) -> (i32, i32) {
    %c0_i32 = arith.constant 0 : i32
    %c0_i32_0 = arith.constant 0 : i32
    %c0_i32_1 = arith.constant 0 : i32
    return %c0_i32, %c0_i32_0 : i32, i32
  }
  func.func @transform_12(%arg0: i32, %arg1: memref<3xf32, #tpu.memory_space<smem>>) -> (i32, i32) {
    %c0_i32 = arith.constant 0 : i32
    %c0_i32_0 = arith.constant 0 : i32
    %c0_i32_1 = arith.constant 0 : i32
    return %c0_i32, %c0_i32_0 : i32, i32
  }
  func.func @transform_13(%arg0: i32, %arg1: memref<3xf32, #tpu.memory_space<smem>>) -> (i32, i32, i32) {
    %c0_i32 = arith.constant 0 : i32
    %c0_i32_0 = arith.constant 0 : i32
    %c0_i32_1 = arith.constant 0 : i32
    return %arg0, %c0_i32, %c0_i32_0 : i32, i32, i32
  }
  func.func @transform_14(%arg0: i32, %arg1: memref<3xf32, #tpu.memory_space<smem>>) -> (i32, i32, i32) {
    %c0_i32 = arith.constant 0 : i32
    %c0_i32_0 = arith.constant 0 : i32
    %c0_i32_1 = arith.constant 0 : i32
    return %arg0, %c0_i32, %c0_i32_0 : i32, i32, i32
  }
  func.func @transform_15(%arg0: i32, %arg1: memref<3xf32, #tpu.memory_space<smem>>) -> (i32, i32, i32) {
    %c0_i32 = arith.constant 0 : i32
    %c0_i32_0 = arith.constant 0 : i32
    %c0_i32_1 = arith.constant 0 : i32
    return %arg0, %c0_i32, %c0_i32_0 : i32, i32, i32
  }
  func.func @transform_16(%arg0: i32, %arg1: memref<3xf32, #tpu.memory_space<smem>>) -> (i32, i32, i32) {
    %c0_i32 = arith.constant 0 : i32
    %c0_i32_0 = arith.constant 0 : i32
    %c0_i32_1 = arith.constant 0 : i32
    return %arg0, %c0_i32, %c0_i32_0 : i32, i32, i32
  }
}

</mosaic_0001>

<bundles_post_ra>
// kernel: positioning_forward.1
= control target key start
LH: loop header
LB: loop body
LE: loop exit
PB: predicated region body
PF: predicated region fallthrough
CT: control target
= control target key end

     0   :  { %s4620_s0 = inlined_call_operand.vmem [shape: f32[3], index: 0, kind: input, shape index: {}]   ;;  %s4621_s1 = inlined_call_operand.vmem [shape: f32[2,16,256], index: 1, kind: input, shape index: {}]   ;;  %s4622_s2 = inlined_call_operand.vmem [shape: f32[2,16], index: 2, kind: input, shape index: {}]   ;;  %s4623_s3 = inlined_call_operand.vmem [shape: f32[2,1], index: 3, kind: input, shape index: {}]   ;;  %s4624_s4 = inlined_call_operand.vmem [shape: f32[2,16], index: 4, kind: input, shape index: {}]   ;;  %s4625_s5 = inlined_call_operand.vmem [shape: f32[2,1], index: 5, kind: input, shape index: {}]   ;;  %s4626_s6 = inlined_call_operand.vmem [shape: f32[16,16], index: 6, kind: input, shape index: {}]   ;;  %s4627_s7 = inlined_call_operand.vmem [shape: f32[16,1], index: 7, kind: input, shape index: {}]   ;;  %s4628_s8 = inlined_call_operand.vmem [shape: f32[16,16], index: 8, kind: input, shape index: {}]   ;;  %s4629_s9 = inlined_call_operand.vmem [shape: f32[16,16], index: 9, kind: input, shape index: {}]   ;;  %s4630_s10 = inlined_call_operand.vmem [shape: f32[16,16], index: 10, kind: input, shape index: {}]   ;;  %s4631_s11 = inlined_call_operand.vmem [shape: f32[16,1], index: 11, kind: input, shape index: {}]   ;;  %s4632_s12 = inlined_call_operand.vmem [shape: f32[49,16], index: 12, kind: input, shape index: {}]   ;;  %s4633_s13 = inlined_call_operand.vmem [shape: f32[49,256], index: 13, kind: input, shape index: {}]   ;;  %s4634_s14 = inlined_call_operand.vmem [shape: f32[2,16,256], index: 14, kind: output, shape index: {0}]   ;;  %s4635_s15 = inlined_call_operand.vmem [shape: f32[2,16,256], index: 15, kind: output, shape index: {1}]   ;;  %s4636_s16 = inlined_call_operand.vmem [shape: f32[2,16,256], index: 16, kind: output, shape index: {2}]   ;;  %s4637_s17 = inlined_call_operand.vmem [shape: f32[2,1,256], index: 17, kind: output, shape index: {3}]  }
   0x1   :  { %4658 = sst [smem:[#allocation26_spill]] %s4620_s0 }
   0x2   :  { %4659 = sst [smem:[#allocation27_spill]] %s4621_s1  ;;  %s4661_s26 = sld [smem:[#allocation26_spill]] }
   0x3   :  { %4660 = sst [smem:[#allocation28_spill]] %s4630_s10 }
   0x8   :  { %s23_s10 = sshll.u32 %s4661_s26, 4  ;;  %s24_s10 = int_to_ptr.vmem [resolvable:$true] %s23_s10 }
   0x9   :  { %s3616_s27 = scalar_lea.vmem %s24_s10, 16  ;;  %p3621_p1 = scmp.lt.s32.totalorder %s24_s10, %s24_s10 }
   0xa   :  { %p3617_p0 = scmp.ne.s32.totalorder %s24_s10, %s3616_s27  ;;  %p3622_p2 = scmp.lt.s32.totalorder %s3616_s27, %s3616_s27 }
   0xc   :  { %p3623_p3 = por %p3622_p2, %p3621_p1 }
   0xe   :  { %p3624_p4 = pnand %p3623_p3, %p3617_p0 }
  0x10   :  { %3627 = shalt.err (!%p3624_p4)  }
  0x11   :  { %s3638_s28 = smov [#allocation3]  }
  0x12   :  { %26 = dma.vmem_to_smem %s24_s10, 16, %s3638_s28, [#allocation2] }
  0x13   :  { %3632 = dma.done.wait [#allocation2], 16 }
  0x14   :  { %3633 = vsyncadd [#allocation2], 4294967280 }
  0x15   :  { %28 = sfence }
  0x16   :  { %s3784_s29 = smov 0  }
  0x17 LB: > { %s3162_s0 = sadd.s32 4294967295, %s3636_s29   ;;  %p3166_p5 = scmp.ge.s32.totalorder %s3636_s29, 1  ;;  %s3636_s29 = sphi %s3784_s29, %s34_s29  }
  0x18   : > { %p476_p6 = scmp.lt.s32.totalorder %s3636_s29, 3 }
  0x1a   : > { %p477_p7 = pnand %p3166_p5, %p476_p6 }
  0x1c   : > { %480 = sbr.rel (%p477_p7) target bundleno = 2501 (0x9c5), region = 72 }
  0x23   : > { %p540_p8 = scmp.lt.s32.totalorder %s3162_s0, 1  ;;  %s4662_s19 = sld [smem:[#allocation27_spill]]  ;;  %vm643_vm0 = vcmask 130048   ;;  %v4639_v12 = vmov 0.0   ;;  %v772_v23 = vld [vmem:[%s4623_s3] sm:$0x3] }
  0x24   : > { %732 = vmatprep.mubr.f32.mxu1 %v4639_v12  ;;  %v3640_v24 = vmov 0   ;;  %v853_v25 = vld [vmem:[%s4625_s5] sm:$0x3]  ;;  %s745_s24 = sld [smem:[#allocation3]]  ;;  %vm1191_vm1 = vcmask 1041408   ;;  %vm1094_vm2 = vcmask 15360  }
  0x25   : > { %s4708_s0 = smov (!%p540_p8, %s3162_s0), 1  ;;  %3470 = vset.pattern.permute.xlu0 %v3640_v24  ;;  %3471 = vset.pattern.permute.xlu1 %v3640_v24  ;;  %v771_v55 = vld [vmem:[%s4622_s2] sm:$0x3]  ;;  %s3216_s28 = sld [smem:[#allocation3 + $0x1]] }
  0x26   : > { %s3795_s10 = sshll.u32 %s4708_s0, 5  ;;  %v852_v56 = vld [vmem:[%s4624_s4] sm:$0x3]  ;;  %s4706_s21 = sld [smem:[#allocation28_spill]] }
  0x27   : > { %s3845_s27 = scalar_lea.vmem %s4634_s14, %s3795_s10  ;;  %s559_s25 = scalar_lea.vmem %s4636_s16, %s3795_s10 }
  0x28   : > { %s3644_s20 = smov 49   ;;  %s3645_s22 = smov 48  }
  0x29   : > { %s544_s1 = scalar_lea.vmem %s4662_s19, %s3795_s10  ;;  %s554_s19 = scalar_lea.vmem %s4635_s15, %s3795_s10 }
  0x2a   : > { %v3801_v0 = vld [vmem:[%s544_s1 + $0x8] sm:$0xff]  ;;  %v3803_v1 = vld [vmem:[%s544_s1 + $0x18] sm:$0xff]  ;;  %v3805_v2 = vld [vmem:[%s544_s1] sm:$0xff]  ;;  %v758_v36 = vstv %s745_s24  ;;  %s3647_s23 = smov 46   ;;  %s3648_s24 = smov 45  }
  0x2b   : > { %v3809_v3 = vpack.c.bf16 %v3803_v1, %v3801_v0  ;;  %v3811_v4 = vld [vmem:[%s544_s1 + $0x10] sm:$0xff]  ;;  %632 = vmatprep.mubr.f32.mxu0 %v3801_v0  ;;  %s3643_s1 = smov 50   ;;  %s3649_s30 = smov 35  }
  0x2c   : > { %v3816_v5 = vpack.c.bf16 %v3811_v4, %v3805_v2  ;;  %s3650_s18 = smov 34   ;;  %s3657_s10 = smov 18  }
  0x2d   : > { %4663 = vst [vmem:[#allocation5_spill] sm:$0xff] %v3809_v3  ;;  %3238 = vmatprep.subr.bf16.mxu0 %v3809_v3  ;;  %3242 = vmatprep.subr.bf16.mxu1 %v3809_v3  ;;  %s3664_s26 = smov 2  }
  0x2e   : > { %4664 = vst [vmem:[#allocation6_spill] sm:$0xff] %v3816_v5  ;;  %3240 = vmatpush1.bf16.xpose.msra.mxu0 %v3816_v5  ;;  %3244 = vmatpush1.bf16.msra.mxu1 %v3816_v5 }
  0x35   : > { %633 = vmatmul.mubr.f32.vlgmr.msra.gmra.mrb[0].mxu0 %v3805_v2 }
  0x36   : > { %637 = vmatprep.mubr.f32.mxu0 %v3803_v1 }
  0x39   : > { %638 = vmatmul.mubr.f32.gmra.mrb[2].mxu0 %v3811_v4 }
  0x3a   : > { %926 = vmatprep.mubr.f32.mxu0 %v4639_v12 }
 0x108   : > { %v634_v6 = vpop.f32.mrb[0].mxu0 }
 0x109   : > { %v636_v7 = vpop.f32.mrb[1].mxu0  ;;  %v644_v8 = vsel %vm643_vm0, %v634_v6, -inf }
 0x10a   : > { %645 = vmax.xlane.f32.xlu0 %v644_v8 }
 0x10c   : > { %v639_v9 = vpop.f32.mrb[2].mxu0 }
 0x10d   : > { %v641_v10 = vpop.f32.mrb[3].mxu0  ;;  %v647_v11 = vsel %vm643_vm0, %v639_v9, -inf }
 0x10e   : > { %648 = vmax.xlane.f32.xlu0 %v647_v11 }
 0x124   : > { %775 = vperm.xlu0 %3470, %v772_v23  }
 0x197   : > { %v646_v13 = vpop.xlane.xlu0 %645 }
 0x198   : > { %v650_v14 = vsub.f32 %v634_v6, %v646_v13 }
 0x19a   : > { %v652_v15 = vmul.f32 1.442695, %v650_v14 }
 0x19b   : > { %v649_v16 = vpop.xlane.xlu0 %648 }
 0x19c   : > { %3472 = vpow2.f32 %v652_v15  ;;  %v651_v17 = vsub.f32 %v639_v9, %v649_v16 }
 0x19e   : > { %v654_v18 = vmul.f32 1.442695, %v651_v17 }
 0x1a0   : > { %3474 = vpow2.f32 %v654_v18 }
 0x1a3   : > { %v776_v57 = vpop.permute.xlu0 %775 }
 0x1a6   : > { %v3473_v19 = vpop.eup %3472 }
 0x1a7   : > { %3176 = vmatmul.mubr.msk.f32.vlgmr.msra.gmra.mrb[0].mxu1 %vm643_vm0, %v3473_v19  ;;  %v656_v20 = vsel %vm643_vm0, %v3473_v19, 0.0 }
 0x1a8   : > { %657 = vadd.xlane.f32.xlu1 %v656_v20  ;;  %738 = vmatprep.mubr.f32.mxu1 %v4639_v12 }
 0x1aa   : > { %v3475_v21 = vpop.eup %3474 }
 0x1ab   : > { %3177 = vmatmul.mubr.msk.f32.gmra.mrb[2].mxu1 %vm643_vm0, %v3475_v21  ;;  %v659_v22 = vsel %vm643_vm0, %v3475_v21, 0.0 }
 0x1ac   : > { %660 = vadd.xlane.f32.xlu1 %v659_v22  ;;  %845 = vmatprep.mubr.f32.mxu1 %v4639_v12 }
 0x1bd   : > { %856 = vperm.xlu1 %3471, %v853_v25  }
 0x235   : > { %v658_v26 = vpop.xlane.xlu1 %657 }
 0x236   : > { %3476 = vrcp.f32 %v658_v26 }
 0x239   : > { %v661_v27 = vpop.xlane.xlu1 %660 }
 0x23a   : > { %3478 = vrcp.f32 %v661_v27 }
 0x23d   : > { %v857_v58 = vpop.permute.xlu1 %856 }
 0x240   : > { %v3477_v28 = vpop.eup %3476 }
 0x241   : > { %v748_v29 = vmul.f32 %v3477_v28, %v658_v26 }
 0x243   : > { %v750_v31 = vsub.f32 2.0, %v748_v29 }
 0x244   : > { %v3479_v30 = vpop.eup %3478 }
 0x245   : > { %v749_v32 = vmul.f32 %v3479_v30, %v661_v27  ;;  %v752_v34 = vmul.f32 %v3477_v28, %v750_v31 }
 0x247   : > { %v751_v33 = vsub.f32 2.0, %v749_v32 }
 0x249   : > { %v753_v41 = vmul.f32 %v3479_v30, %v751_v33 }
 0x27a   : > { %v734_v35 = vpop.f32.mrb[0].mxu1 }
 0x27b   : > { %v754_v37 = vmul.f32 %v752_v34, %v734_v35  ;;  %v736_v38 = vpop.f32.mrb[1].mxu1 }
 0x27c   : > { %v755_v39 = vmul.f32 %v752_v34, %v736_v38  ;;  %v933_v38 = vld [vmem:[%s4626_s6] sm:$0xff] }
 0x27d   : > { %v759_v40 = vmul.f32 %v758_v36, %v754_v37 }
 0x27e   : > { %v760_v42 = vmul.f32 %v758_v36, %v755_v39  ;;  %v740_v43 = vpop.f32.mrb[2].mxu1  ;;  %v934_v39 = vld [vmem:[%s4626_s6 + $0x8] sm:$0xff] }
 0x27f   : > { %v763_v44 = vadd.f32 %v759_v40, %v3805_v2  ;;  %v756_v45 = vmul.f32 %v753_v41, %v740_v43  ;;  %v742_v46 = vpop.f32.mrb[3].mxu1 }
 0x280   : > { %v764_v47 = vadd.f32 %v760_v42, %v3801_v0  ;;  %v757_v48 = vmul.f32 %v753_v41, %v742_v46 }
 0x281   : > { %767 = vst [vmem:[%s3845_s27] sm:$0xff] %v763_v44  ;;  %v761_v49 = vmul.f32 %v758_v36, %v756_v45 }
 0x282   : > { %768 = vst [vmem:[%s3845_s27 + $0x8] sm:$0xff] %v764_v47  ;;  %v762_v50 = vmul.f32 %v758_v36, %v757_v48 }
 0x283   : > { %v765_v51 = vadd.f32 %v761_v49, %v3811_v4 }
 0x284   : > { %v766_v52 = vadd.f32 %v762_v50, %v3803_v1 }
 0x285   : > { %769 = vst [vmem:[%s3845_s27 + $0x10] sm:$0xff] %v765_v51  ;;  %v3857_v54 = vpack.c.bf16 %v765_v51, %v763_v44 }
 0x286   : > { %770 = vst [vmem:[%s3845_s27 + $0x18] sm:$0xff] %v766_v52  ;;  %v3855_v53 = vpack.c.bf16 %v766_v52, %v764_v47 }
 0x287   : > { %4666 = vst [vmem:[#allocation8_spill] sm:$0xff] %v3857_v54 }
 0x288   : > { %4665 = vst [vmem:[#allocation7_spill] sm:$0xff] %v3855_v53  ;;  %3246 = vmatprep.subr.bf16.mxu1 %v3855_v53  ;;  %3250 = vmatprep.subr.bf16.mxu0 %v3855_v53 }
 0x289   : > { %3248 = vmatpush1.bf16.msra.mxu1 %v3857_v54  ;;  %3252 = vmatpush1.bf16.msra.mxu0 %v3857_v54 }
 0x28a   : > { %3254 = vmatprep.subr.bf16.mxu1 %v3855_v53 }
 0x28c   : > { %3178 = vmatmul.mubr.msk.f32.vlgmr.msra.gmra.mrb[4].mxu1 %vm643_vm0, %v771_v55  ;;  %3179 = vmatmul.mubr.msk.f32.vlgmr.msra.gmra.mrb[4].mxu0 %vm643_vm0, %v852_v56 }
 0x28d   : > { %3256 = vmatpush1.bf16.msra.mxu1 %v3857_v54  ;;  %1262 = vmatprep.mubr.f32.mxu0 %v4639_v12 }
 0x28e   : > { %1017 = vmatprep.mubr.f32.mxu1 %v4639_v12 }
 0x290   : > { %3180 = vmatmul.mubr.msk.f32.vlgmr.msra.gmra.mrb[6].mxu1 %vm643_vm0, %v933_v38 }
 0x291   : > { %1023 = vmatprep.mubr.f32.mxu1 %v4639_v12 }
 0x294   : > { %3181 = vmatmul.mubr.msk.f32.gmra.mrb[8].mxu1 %vm643_vm0, %v934_v39 }
 0x35f   : > { %v847_v59 = vpop.f32.mrb[4].mxu1  ;;  %v928_v60 = vpop.f32.mrb[4].mxu0 }
 0x360   : > { %v848_v61 = vadd.f32 %v847_v59, %v776_v57  ;;  %v849_v62 = vpop.f32.mrb[5].mxu1  ;;  %v929_v63 = vadd.f32 %v928_v60, %v857_v58  ;;  %v930_v0 = vpop.f32.mrb[5].mxu0 }
 0x361   : > { %v850_v1 = vadd.f32 %v849_v62, %v776_v57  ;;  %v931_v2 = vadd.f32 %v930_v0, %v857_v58 }
 0x362   : > { %1030 = vxpose.xlu1.b32.start.end [1/1] (short) %v848_v61, 128 }
 0x363   : > { %1062 = vxpose.xlu0.b32.start.end [1/1] (short) %v850_v1, 128  ;;  %3182 = vmatprep.subr.msk.mxu0 %vm1191_vm1, %v931_v2 }
 0x364   : > { %3183 = vmatpush1.msk.msra.mxu0 %vm1191_vm1, %v929_v63 }
 0x3e2   : > { %v1046_v4 = vpop.trf.xlu1 }
 0x3e3   : > { %3184 = vmatmul.mubr.msk.f32.vlgmr.msra.gmra.mrb[6].mxu0 %vm1094_vm2, %v1046_v4  ;;  %v1078_v15 = vpop.trf.xlu0 }
 0x3e4   : > { %1268 = vmatprep.mubr.f32.mxu0 %v4639_v12 }
 0x3e6   : > { %v1047_v6 = vpop.trf.xlu1 }
 0x3e7   : > { %3185 = vmatmul.mubr.msk.f32.gmra.mrb[8].mxu0 %vm1094_vm2, %v1047_v6  ;;  %v1079_v17 = vpop.trf.xlu0 }
 0x3e8   : > { %1274 = vmatprep.mubr.f32.mxu0 %v4639_v12 }
 0x3ea   : > { %v1048_v7 = vpop.trf.xlu1 }
 0x3eb   : > { %3186 = vmatmul.mubr.msk.f32.gmra.mrb[10].mxu0 %vm1094_vm2, %v1048_v7  ;;  %v1080_v20 = vpop.trf.xlu0 }
 0x3ec   : > { %1280 = vmatprep.mubr.f32.mxu0 %v4639_v12 }
 0x3ee   : > { %v1049_v8 = vpop.trf.xlu1 }
 0x3ef   : > { %3187 = vmatmul.mubr.msk.f32.gmra.mrb[12].mxu0 %vm1094_vm2, %v1049_v8  ;;  %v1081_v22 = vpop.trf.xlu0 }
 0x3f0   : > { %1286 = vmatprep.mubr.f32.mxu0 %v4639_v12 }
 0x3f2   : > { %v1050_v9 = vpop.trf.xlu1 }
 0x3f3   : > { %3188 = vmatmul.mubr.msk.f32.gmra.mrb[14].mxu0 %vm1094_vm2, %v1050_v9  ;;  %v1082_v25 = vpop.trf.xlu0 }
 0x3f4   : > { %1292 = vmatprep.mubr.f32.mxu0 %v4639_v12 }
 0x3f6   : > { %v1051_v10 = vpop.trf.xlu1 }
 0x3f7   : > { %3189 = vmatmul.mubr.msk.f32.gmra.mrb[16].mxu0 %vm1094_vm2, %v1051_v10  ;;  %v1083_v27 = vpop.trf.xlu0 }
 0x3f8   : > { %1298 = vmatprep.mubr.f32.mxu0 %v4639_v12 }
 0x3fa   : > { %v1052_v11 = vpop.trf.xlu1 }
 0x3fb   : > { %3190 = vmatmul.mubr.msk.f32.gmra.mrb[18].mxu0 %vm1094_vm2, %v1052_v11  ;;  %v1084_v28 = vpop.trf.xlu0 }
 0x3fc   : > { %1304 = vmatprep.mubr.f32.mxu0 %v4639_v12 }
 0x3fe   : > { %v1053_v13 = vpop.trf.xlu1 }
 0x3ff   : > { %3191 = vmatmul.mubr.msk.f32.gmra.mrb[20].mxu0 %vm1094_vm2, %v1053_v13  ;;  %v1085_v29 = vpop.trf.xlu0 }
 0x400   : > { %1310 = vmatprep.mubr.f32.mxu0 %v4639_v12 }
 0x402   : > { %v1054_v14 = vpop.trf.xlu1 }
 0x403   : > { %3192 = vmatmul.mubr.msk.f32.gmra.mrb[22].mxu0 %vm1094_vm2, %v1054_v14  ;;  %v1086_v30 = vpop.trf.xlu0 }
 0x404   : > { %1316 = vmatprep.mubr.f32.mxu0 %v4639_v12 }
 0x406   : > { %v1055_v16 = vpop.trf.xlu1 }
 0x407   : > { %3193 = vmatmul.mubr.msk.f32.gmra.mrb[24].mxu0 %vm1094_vm2, %v1055_v16  ;;  %v1087_v31 = vpop.trf.xlu0 }
 0x408   : > { %1322 = vmatprep.mubr.f32.mxu0 %v4639_v12 }
 0x40a   : > { %v1056_v18 = vpop.trf.xlu1 }
 0x40b   : > { %3194 = vmatmul.mubr.msk.f32.gmra.mrb[26].mxu0 %vm1094_vm2, %v1056_v18  ;;  %v1088_v32 = vpop.trf.xlu0 }
 0x40c   : > { %1328 = vmatprep.mubr.f32.mxu0 %v4639_v12 }
 0x40e   : > { %v1057_v19 = vpop.trf.xlu1 }
 0x40f   : > { %3195 = vmatmul.mubr.msk.f32.gmra.mrb[28].mxu0 %vm1094_vm2, %v1057_v19  ;;  %v1089_v33 = vpop.trf.xlu0 }
 0x410   : > { %1334 = vmatprep.mubr.f32.mxu0 %v4639_v12 }
 0x412   : > { %v1058_v21 = vpop.trf.xlu1 }
 0x413   : > { %3196 = vmatmul.mubr.msk.f32.gmra.mrb[30].mxu0 %vm1094_vm2, %v1058_v21  ;;  %v1090_v34 = vpop.trf.xlu0 }
 0x414   : > { %1340 = vmatprep.mubr.f32.mxu0 %v4639_v12 }
 0x416   : > { %v1059_v23 = vpop.trf.xlu1 }
 0x417   : > { %3197 = vmatmul.mubr.msk.f32.gmra.mrb[32].mxu0 %vm1094_vm2, %v1059_v23  ;;  %v1091_v35 = vpop.trf.xlu0 }
 0x418   : > { %1346 = vmatprep.mubr.f32.mxu0 %v4639_v12 }
 0x41a   : > { %v1060_v24 = vpop.trf.xlu1 }
 0x41b   : > { %3198 = vmatmul.mubr.msk.f32.gmra.mrb[34].mxu0 %vm1094_vm2, %v1060_v24  ;;  %v1092_v36 = vpop.trf.xlu0 }
 0x41c   : > { %1352 = vmatprep.mubr.f32.mxu0 %v4639_v12 }
 0x41e   : > { %v1061_v26 = vpop.trf.xlu1 }
 0x41f   : > { %3199 = vmatmul.mubr.msk.f32.gmra.mrb[36].mxu0 %vm1094_vm2, %v1061_v26  ;;  %v1093_v37 = vpop.trf.xlu0 }
 0x420   : > { %1358 = vmatprep.mubr.f32.mxu0 %v4639_v12 }
 0x423   : > { %3200 = vmatmul.mubr.msk.f32.gmra.mrb[38].mxu0 %vm1094_vm2, %v1078_v15 }
 0x424   : > { %1364 = vmatprep.mubr.f32.mxu0 %v4639_v12 }
 0x427   : > { %3201 = vmatmul.mubr.msk.f32.gmra.mrb[40].mxu0 %vm1094_vm2, %v1079_v17 }
 0x428   : > { %1370 = vmatprep.mubr.f32.mxu0 %v4639_v12 }
 0x42b   : > { %3202 = vmatmul.mubr.msk.f32.gmra.mrb[42].mxu0 %vm1094_vm2, %v1080_v20 }
 0x42c   : > { %1376 = vmatprep.mubr.f32.mxu0 %v4639_v12 }
 0x42f   : > { %3203 = vmatmul.mubr.msk.f32.gmra.mrb[44].mxu0 %vm1094_vm2, %v1081_v22 }
 0x430   : > { %1382 = vmatprep.mubr.f32.mxu0 %v4639_v12 }
 0x433   : > { %3204 = vmatmul.mubr.msk.f32.gmra.mrb[46].mxu0 %vm1094_vm2, %v1082_v25 }
 0x434   : > { %1388 = vmatprep.mubr.f32.mxu0 %v4639_v12 }
 0x437   : > { %3205 = vmatmul.mubr.msk.f32.gmra.mrb[48].mxu0 %vm1094_vm2, %v1083_v27 }
 0x438   : > { %1394 = vmatprep.mubr.f32.mxu0 %v4639_v12 }
 0x43b   : > { %3206 = vmatmul.mubr.msk.f32.gmra.mrb[50].mxu0 %vm1094_vm2, %v1084_v28 }
 0x43c   : > { %1400 = vmatprep.mubr.f32.mxu0 %v4639_v12 }
 0x43f   : > { %3207 = vmatmul.mubr.msk.f32.gmra.mrb[52].mxu0 %vm1094_vm2, %v1085_v29 }
 0x440   : > { %1406 = vmatprep.mubr.f32.mxu0 %v4639_v12 }
 0x443   : > { %3208 = vmatmul.mubr.msk.f32.gmra.mrb[54].mxu0 %vm1094_vm2, %v1086_v30 }
 0x444   : > { %1412 = vmatprep.mubr.f32.mxu0 %v4639_v12 }
 0x447   : > { %3209 = vmatmul.mubr.msk.f32.gmra.mrb[56].mxu0 %vm1094_vm2, %v1087_v31 }
 0x448   : > { %1418 = vmatprep.mubr.f32.mxu0 %v4639_v12 }
 0x44b   : > { %3210 = vmatmul.mubr.msk.f32.gmra.mrb[58].mxu0 %vm1094_vm2, %v1088_v32 }
 0x44c   : > { %1424 = vmatprep.mubr.f32.mxu0 %v4639_v12 }
 0x44f   : > { %3211 = vmatmul.mubr.msk.f32.gmra.mrb[60].mxu0 %vm1094_vm2, %v1089_v33 }
 0x450   : > { %1430 = vmatprep.mubr.f32.mxu0 %v4639_v12 }
 0x453   : > { %3212 = vmatmul.mubr.msk.f32.gmra.mrb[62].mxu0 %vm1094_vm2, %v1090_v34 }
 0x454   : > { %1436 = vmatprep.mubr.f32.mxu0 %v4639_v12 }
 0x457   : > { %3213 = vmatmul.mubr.msk.f32.gmra.mrb[64].mxu0 %vm1094_vm2, %v1091_v35 }
 0x458   : > { %1442 = vmatprep.mubr.f32.mxu0 %v4639_v12 }
 0x45b   : > { %3214 = vmatmul.mubr.msk.f32.gmra.mrb[66].mxu0 %vm1094_vm2, %v1092_v36 }
 0x45c   : > { %1448 = vmatprep.mubr.f32.mxu0 %v4639_v12 }
 0x45f   : > { %3215 = vmatmul.mubr.msk.f32.gmra.mrb[68].mxu0 %vm1094_vm2, %v1093_v37 }
 0x4b6   : > { %v3947_v40 = vpop.f32.mrb[6].mxu0 }
 0x4b7   : > { %v3949_v41 = vpop.f32.mrb[7].mxu0 }
 0x4b8   : > { %v1455_v42 = vmax.f32 %v3947_v40, %v3949_v41 }
 0x4ba   : > { %1456 = vmax.xlane.f32.xlu1 %v1455_v42  ;;  %v3953_v43 = vpop.f32.mrb[8].mxu0 }
 0x4bb   : > { %v3955_v44 = vpop.f32.mrb[9].mxu0 }
 0x4bc   : > { %v1458_v45 = vmax.f32 %v3953_v43, %v3955_v44 }
 0x4be   : > { %1459 = vmax.xlane.f32.xlu0 %v1458_v45  ;;  %v3959_v46 = vpop.f32.mrb[10].mxu0 }
 0x4bf   : > { %v3961_v47 = vpop.f32.mrb[11].mxu0 }
 0x4c0   : > { %v1461_v48 = vmax.f32 %v3959_v46, %v3961_v47 }
 0x4c2   : > { %1462 = vmax.xlane.f32.xlu1 %v1461_v48  ;;  %v3965_v49 = vpop.f32.mrb[12].mxu0 }
 0x4c3   : > { %v3967_v50 = vpop.f32.mrb[13].mxu0 }
 0x4c4   : > { %v1464_v51 = vmax.f32 %v3965_v49, %v3967_v50 }
 0x4c6   : > { %1465 = vmax.xlane.f32.xlu1 %v1464_v51  ;;  %v3971_v52 = vpop.f32.mrb[14].mxu0 }
 0x4c7   : > { %v3973_v55 = vpop.f32.mrb[15].mxu0 }
 0x4c8   : > { %v1467_v56 = vmax.f32 %v3971_v52, %v3973_v55 }
 0x4ca   : > { %1468 = vmax.xlane.f32.xlu1 %v1467_v56  ;;  %v3977_v57 = vpop.f32.mrb[16].mxu0 }
 0x4cb   : > { %v3979_v58 = vpop.f32.mrb[17].mxu0 }
 0x4cc   : > { %v1470_v59 = vmax.f32 %v3977_v57, %v3979_v58 }
 0x4ce   : > { %1471 = vmax.xlane.f32.xlu1 %v1470_v59  ;;  %v3983_v60 = vpop.f32.mrb[18].mxu0 }
 0x4cf   : > { %v3985_v61 = vpop.f32.mrb[19].mxu0 }
 0x4d0   : > { %v1473_v62 = vmax.f32 %v3983_v60, %v3985_v61 }
 0x4d2   : > { %1474 = vmax.xlane.f32.xlu1 %v1473_v62  ;;  %v3989_v63 = vpop.f32.mrb[20].mxu0 }
 0x4d3   : > { %v3991_v0 = vpop.f32.mrb[21].mxu0 }
 0x4d4   : > { %v1476_v1 = vmax.f32 %v3989_v63, %v3991_v0 }
 0x4d6   : > { %1477 = vmax.xlane.f32.xlu1 %v1476_v1  ;;  %v3995_v2 = vpop.f32.mrb[22].mxu0 }
 0x4d7   : > { %v3997_v4 = vpop.f32.mrb[23].mxu0 }
 0x4d8   : > { %v1479_v6 = vmax.f32 %v3995_v2, %v3997_v4 }
 0x4da   : > { %1480 = vmax.xlane.f32.xlu0 %v1479_v6  ;;  %v4001_v7 = vpop.f32.mrb[24].mxu0 }
 0x4db   : > { %v4003_v8 = vpop.f32.mrb[25].mxu0 }
 0x4dc   : > { %v1482_v9 = vmax.f32 %v4001_v7, %v4003_v8 }
 0x4de   : > { %1483 = vmax.xlane.f32.xlu1 %v1482_v9  ;;  %v4007_v10 = vpop.f32.mrb[26].mxu0 }
 0x4df   : > { %v4009_v11 = vpop.f32.mrb[27].mxu0 }
 0x4e0   : > { %v1485_v13 = vmax.f32 %v4007_v10, %v4009_v11 }
 0x4e2   : > { %1486 = vmax.xlane.f32.xlu0 %v1485_v13  ;;  %v4013_v14 = vpop.f32.mrb[28].mxu0 }
 0x4e3   : > { %v4015_v15 = vpop.f32.mrb[29].mxu0 }
 0x4e4   : > { %v1488_v16 = vmax.f32 %v4013_v14, %v4015_v15 }
 0x4e6   : > { %1489 = vmax.xlane.f32.xlu1 %v1488_v16  ;;  %v4019_v17 = vpop.f32.mrb[30].mxu0 }
 0x4e7   : > { %v4021_v18 = vpop.f32.mrb[31].mxu0 }
 0x4e8   : > { %v1491_v19 = vmax.f32 %v4019_v17, %v4021_v18 }
 0x4ea   : > { %1492 = vmax.xlane.f32.xlu0 %v1491_v19  ;;  %v4025_v20 = vpop.f32.mrb[32].mxu0 }
 0x4eb   : > { %v4027_v21 = vpop.f32.mrb[33].mxu0 }
 0x4ec   : > { %v1494_v22 = vmax.f32 %v4025_v20, %v4027_v21 }
 0x4ee   : > { %1495 = vmax.xlane.f32.xlu1 %v1494_v22  ;;  %v4031_v23 = vpop.f32.mrb[34].mxu0 }
 0x4ef   : > { %v4033_v24 = vpop.f32.mrb[35].mxu0 }
 0x4f0   : > { %v1497_v25 = vmax.f32 %v4031_v23, %v4033_v24 }
 0x4f2   : > { %1498 = vmax.xlane.f32.xlu0 %v1497_v25  ;;  %v4037_v26 = vpop.f32.mrb[36].mxu0 }
 0x4f3   : > { %v4039_v27 = vpop.f32.mrb[37].mxu0 }
 0x4f4   : > { %v1500_v28 = vmax.f32 %v4037_v26, %v4039_v27 }
 0x4f6   : > { %1501 = vmax.xlane.f32.xlu1 %v1500_v28  ;;  %v4043_v29 = vpop.f32.mrb[38].mxu0 }
 0x4f7   : > { %v4045_v30 = vpop.f32.mrb[39].mxu0 }
 0x4f8   : > { %v1503_v31 = vmax.f32 %v4043_v29, %v4045_v30 }
 0x4fa   : > { %1504 = vmax.xlane.f32.xlu0 %v1503_v31  ;;  %v4049_v32 = vpop.f32.mrb[40].mxu0 }
 0x4fb   : > { %v4051_v33 = vpop.f32.mrb[41].mxu0 }
 0x4fc   : > { %v1506_v34 = vmax.f32 %v4049_v32, %v4051_v33 }
 0x4fe   : > { %1507 = vmax.xlane.f32.xlu1 %v1506_v34  ;;  %v4055_v35 = vpop.f32.mrb[42].mxu0 }
 0x4ff   : > { %v4057_v36 = vpop.f32.mrb[43].mxu0 }
 0x500   : > { %v1509_v37 = vmax.f32 %v4055_v35, %v4057_v36 }
 0x502   : > { %1510 = vmax.xlane.f32.xlu0 %v1509_v37  ;;  %v4061_v38 = vpop.f32.mrb[44].mxu0 }
 0x503   : > { %v4063_v39 = vpop.f32.mrb[45].mxu0 }
 0x504   : > { %v1512_v42 = vmax.f32 %v4061_v38, %v4063_v39 }
 0x506   : > { %1513 = vmax.xlane.f32.xlu1 %v1512_v42  ;;  %v4067_v45 = vpop.f32.mrb[46].mxu0 }
 0x507   : > { %v4069_v48 = vpop.f32.mrb[47].mxu0 }
 0x508   : > { %v1515_v51 = vmax.f32 %v4067_v45, %v4069_v48 }
 0x50a   : > { %1516 = vmax.xlane.f32.xlu0 %v1515_v51  ;;  %v4073_v56 = vpop.f32.mrb[48].mxu0 }
 0x50b   : > { %v4075_v59 = vpop.f32.mrb[49].mxu0 }
 0x50c   : > { %v1518_v62 = vmax.f32 %v4073_v56, %v4075_v59 }
 0x50e   : > { %1519 = vmax.xlane.f32.xlu1 %v1518_v62  ;;  %v4079_v1 = vpop.f32.mrb[50].mxu0 }
 0x50f   : > { %v4081_v6 = vpop.f32.mrb[51].mxu0 }
 0x510   : > { %v1521_v9 = vmax.f32 %v4079_v1, %v4081_v6 }
 0x512   : > { %1522 = vmax.xlane.f32.xlu0 %v1521_v9  ;;  %v4085_v13 = vpop.f32.mrb[52].mxu0 }
 0x513   : > { %v4087_v16 = vpop.f32.mrb[53].mxu0 }
 0x514   : > { %v1524_v19 = vmax.f32 %v4085_v13, %v4087_v16 }
 0x516   : > { %1525 = vmax.xlane.f32.xlu1 %v1524_v19  ;;  %v4091_v22 = vpop.f32.mrb[54].mxu0 }
 0x517   : > { %v4093_v25 = vpop.f32.mrb[55].mxu0 }
 0x518   : > { %v1527_v28 = vmax.f32 %v4091_v22, %v4093_v25 }
 0x51a   : > { %1528 = vmax.xlane.f32.xlu0 %v1527_v28  ;;  %v4097_v31 = vpop.f32.mrb[56].mxu0 }
 0x51b   : > { %v4099_v34 = vpop.f32.mrb[57].mxu0 }
 0x51c   : > { %4667 = vst [vmem:[#allocation9_spill] sm:$0xff] %v4099_v34  ;;  %v1530_v37 = vmax.f32 %v4097_v31, %v4099_v34 }
 0x51e   : > { %1531 = vmax.xlane.f32.xlu1 %v1530_v37  ;;  %v4103_v42 = vpop.f32.mrb[58].mxu0 }
 0x51f   : > { %4668 = vst [vmem:[#allocation10_spill] sm:$0xff] %v4103_v42  ;;  %v4105_v51 = vpop.f32.mrb[59].mxu0 }
 0x520   : > { %4669 = vst [vmem:[#allocation11_spill] sm:$0xff] %v4105_v51  ;;  %v1533_v62 = vmax.f32 %v4103_v42, %v4105_v51 }
 0x522   : > { %1534 = vmax.xlane.f32.xlu0 %v1533_v62  ;;  %v4109_v9 = vpop.f32.mrb[60].mxu0 }
 0x523   : > { %4670 = vst [vmem:[#allocation12_spill] sm:$0xff] %v4109_v9  ;;  %v4111_v19 = vpop.f32.mrb[61].mxu0 }
 0x524   : > { %4671 = vst [vmem:[#allocation13_spill] sm:$0xff] %v4111_v19  ;;  %v1536_v28 = vmax.f32 %v4109_v9, %v4111_v19 }
 0x526   : > { %1537 = vmax.xlane.f32.xlu1 %v1536_v28  ;;  %v4115_v12 = vpop.f32.mrb[62].mxu0 }
 0x527   : > { %4672 = vst [vmem:[#allocation14_spill] sm:$0xff] %v4115_v12  ;;  %v4117_v5 = vpop.f32.mrb[63].mxu0 }
 0x528   : > { %4673 = vst [vmem:[#allocation15_spill] sm:$0xff] %v4117_v5  ;;  %v1539_v37 = vmax.f32 %v4115_v12, %v4117_v5 }
 0x52a   : > { %1540 = vmax.xlane.f32.xlu0 %v1539_v37  ;;  %v4121_v3 = vpop.f32.mrb[64].mxu0 }
 0x52b   : > { %4674 = vst [vmem:[#allocation16_spill] sm:$0xff] %v4121_v3  ;;  %v4123_v54 = vpop.f32.mrb[65].mxu0 }
 0x52c   : > { %4675 = vst [vmem:[#allocation17_spill] sm:$0xff] %v4123_v54  ;;  %v1542_v62 = vmax.f32 %v4121_v3, %v4123_v54  ;;  %v935_v54 = vld [vmem:[%s4627_s7] sm:$0xff]  ;;  %v4145_v3 = vpop.f32.mrb[6].mxu1 }
 0x52d   : > { %4680 = vst [vmem:[#allocation22_spill] sm:$0xff] %v4145_v3  ;;  %v2185_v3 = vld [vmem:[%s4631_s11 + $0x8] sm:$0xff] }
 0x52e   : > { %1543 = vmax.xlane.f32.xlu1 %v1542_v62  ;;  %v4127_v53 = vpop.f32.mrb[66].mxu0  ;;  %v936_v62 = vld [vmem:[%s4627_s7 + $0x8] sm:$0xff] }
 0x52f   : > { %4676 = vst [vmem:[#allocation18_spill] sm:$0xff] %v4127_v53  ;;  %v4129_v19 = vpop.f32.mrb[67].mxu0 }
 0x530   : > { %4677 = vst [vmem:[#allocation19_spill] sm:$0xff] %v4129_v19  ;;  %v1545_v28 = vmax.f32 %v4127_v53, %v4129_v19  ;;  %v4147_v19 = vpop.f32.mrb[7].mxu1 }
 0x531   : > { %4681 = vst [vmem:[#allocation23_spill] sm:$0xff] %v4147_v19  ;;  %v4149_v53 = vpop.f32.mrb[8].mxu1 }
 0x532   : > { %1546 = vmax.xlane.f32.xlu0 %v1545_v28  ;;  %v4133_v9 = vpop.f32.mrb[68].mxu0  ;;  %4682 = vst [vmem:[#allocation24_spill] sm:$0xff] %v4149_v53 }
 0x533   : > { %4678 = vst [vmem:[#allocation20_spill] sm:$0xff] %v4133_v9  ;;  %v4135_v5 = vpop.f32.mrb[69].mxu0 }
 0x534   : > { %4679 = vst [vmem:[#allocation21_spill] sm:$0xff] %v4135_v5  ;;  %v1548_v37 = vmax.f32 %v4133_v9, %v4135_v5  ;;  %v2184_v5 = vld [vmem:[%s4631_s11] sm:$0xff]  ;;  %v4156_v9 = vpop.f32.mrb[9].mxu1 }
 0x535   : > { %4683 = vst [vmem:[#allocation25_spill] sm:$0xff] %v4156_v9 }
 0x536   : > { %1549 = vmax.xlane.f32.xlu1 %v1548_v37 }
 0x547   : > { %v1457_v28 = vpop.xlane.xlu1 %1456  ;;  %944 = vperm.xlu1 %3471, %v936_v62  }
 0x548   : > { %v1551_v12 = vsub.f32 %v3947_v40, %v1457_v28  ;;  %v1552_v37 = vsub.f32 %v3949_v41, %v1457_v28  ;;  %939 = vperm.xlu0 %3470, %v935_v54  }
 0x54a   : > { %v1615_v19 = vmul.f32 1.442695, %v1551_v12  ;;  %v1617_v51 = vmul.f32 1.442695, %v1552_v37 }
 0x54b   : > { %v1460_v62 = vpop.xlane.xlu0 %1459  ;;  %2188 = vperm.xlu1 %3471, %v2184_v5  }
 0x54c   : > { %v1553_v53 = vsub.f32 %v3953_v43, %v1460_v62  ;;  %v1554_v40 = vsub.f32 %v3955_v44, %v1460_v62  ;;  %2193 = vperm.xlu0 %3470, %v2185_v3   ;;  %3480 = vpow2.f32 %v1615_v19 }
 0x54d   : > { %3482 = vpow2.f32 %v1617_v51 }
 0x54e   : > { %v1619_v54 = vmul.f32 1.442695, %v1553_v53  ;;  %v1621_v41 = vmul.f32 1.442695, %v1554_v40 }
 0x54f   : > { %v1463_v28 = vpop.xlane.xlu1 %1462 }
 0x550   : > { %3484 = vpow2.f32 %v1619_v54  ;;  %v1555_v9 = vsub.f32 %v3959_v46, %v1463_v28  ;;  %v1556_v42 = vsub.f32 %v3961_v47, %v1463_v28 }
 0x551   : > { %3486 = vpow2.f32 %v1621_v41 }
 0x552   : > { %v1623_v12 = vmul.f32 1.442695, %v1555_v9  ;;  %v1625_v37 = vmul.f32 1.442695, %v1556_v42  ;;  %v3641_v9 = vmov 1.0  }
 0x553   : > { %v1466_v34 = vpop.xlane.xlu1 %1465  ;;  %1884 = vmatprep.mubr.f32.mxu0 %v3641_v9 }
 0x554   : > { %v1557_v5 = vsub.f32 %v3965_v49, %v1466_v34  ;;  %v1558_v43 = vsub.f32 %v3967_v50, %v1466_v34  ;;  %3488 = vpow2.f32 %v1623_v12 }
 0x555   : > { %3490 = vpow2.f32 %v1625_v37 }
 0x556   : > { %v1627_v3 = vmul.f32 1.442695, %v1557_v5  ;;  %v1629_v44 = vmul.f32 1.442695, %v1558_v43  ;;  %v3481_v51 = vpop.eup %3480 }
 0x557   : > { %v1469_v53 = vpop.xlane.xlu1 %1468  ;;  %v3483_v47 = vpop.eup %3482 }
 0x558   : > { %3492 = vpow2.f32 %v1627_v3  ;;  %v1559_v19 = vsub.f32 %v3971_v52, %v1469_v53  ;;  %v1560_v46 = vsub.f32 %v3973_v55, %v1469_v53 }
 0x559   : > { %3494 = vpow2.f32 %v1629_v44 }
 0x55a   : > { %v3485_v42 = vpop.eup %3484  ;;  %v1631_v49 = vmul.f32 1.442695, %v1559_v19  ;;  %v1633_v50 = vmul.f32 1.442695, %v1560_v46 }
 0x55b   : > { %v3487_v62 = vpop.eup %3486  ;;  %v1472_v34 = vpop.xlane.xlu1 %1471  ;;  %v3259_v40 = vpack.c.bf16 %v3485_v42, %v3481_v51 }
 0x55c   : > { %v1561_v54 = vsub.f32 %v3977_v57, %v1472_v34  ;;  %v1562_v41 = vsub.f32 %v3979_v58, %v1472_v34  ;;  %v3257_v28 = vpack.c.bf16 %v3487_v62, %v3483_v47  ;;  %3496 = vpow2.f32 %v1631_v49 }
 0x55d   : > { %3498 = vpow2.f32 %v1633_v50 }
 0x55e   : > { %v1635_v52 = vmul.f32 1.442695, %v1561_v54  ;;  %v1637_v12 = vmul.f32 1.442695, %v1562_v41  ;;  %3258 = vmatprep.subr.bf16.mxu1 %v3257_v28  ;;  %3322 = vmatprep.subr.bf16.mxu0 %v3257_v28  ;;  %v3489_v37 = vpop.eup %3488 }
 0x55f   : > { %3260 = vmatpush1.bf16.xpose.msra.mxu1 %v3259_v40  ;;  %3324 = vmatpush1.bf16.xpose.msra.mxu0 %v3259_v40  ;;  %v1475_v55 = vpop.xlane.xlu1 %1474  ;;  %v3491_v3 = vpop.eup %3490 }
 0x560   : > { %3500 = vpow2.f32 %v1635_v52  ;;  %v1563_v5 = vsub.f32 %v3983_v60, %v1475_v55  ;;  %v1564_v43 = vsub.f32 %v3985_v61, %v1475_v55 }
 0x561   : > { %3502 = vpow2.f32 %v1637_v12 }
 0x562   : > { %v3493_v57 = vpop.eup %3492  ;;  %v1639_v58 = vmul.f32 1.442695, %v1563_v5  ;;  %v1641_v53 = vmul.f32 1.442695, %v1564_v43 }
 0x563   : > { %v3495_v44 = vpop.eup %3494  ;;  %v1478_v51 = vpop.xlane.xlu1 %1477  ;;  %v3263_v19 = vpack.c.bf16 %v3493_v57, %v3489_v37 }
 0x564   : > { %v1565_v46 = vsub.f32 %v3989_v63, %v1478_v51  ;;  %v1566_v47 = vsub.f32 %v3991_v0, %v1478_v51  ;;  %v3261_v42 = vpack.c.bf16 %v3495_v44, %v3491_v3  ;;  %3504 = vpow2.f32 %v1639_v58 }
 0x565   : > { %3506 = vpow2.f32 %v1641_v53 }
 0x566   : > { %v1643_v49 = vmul.f32 1.442695, %v1565_v46  ;;  %v1645_v62 = vmul.f32 1.442695, %v1566_v47  ;;  %3262 = vmatprep.subr.bf16.mxu1 %v3261_v42  ;;  %3326 = vmatprep.subr.bf16.mxu0 %v3261_v42  ;;  %v3497_v61 = vpop.eup %3496 }
 0x567   : > { %3264 = vmatpush1.bf16.xpose.msra.mxu1 %v3263_v19  ;;  %3328 = vmatpush1.bf16.xpose.msra.mxu0 %v3263_v19  ;;  %v1481_v60 = vpop.xlane.xlu0 %1480  ;;  %v3499_v40 = vpop.eup %3498 }
 0x568   : > { %3508 = vpow2.f32 %v1643_v49  ;;  %v1567_v50 = vsub.f32 %v3995_v2, %v1481_v60  ;;  %v1568_v34 = vsub.f32 %v3997_v4, %v1481_v60 }
 0x569   : > { %3510 = vpow2.f32 %v1645_v62 }
 0x56a   : > { %v3501_v63 = vpop.eup %3500  ;;  %v1647_v0 = vmul.f32 1.442695, %v1567_v50  ;;  %v1649_v41 = vmul.f32 1.442695, %v1568_v34 }
 0x56b   : > { %v3503_v54 = vpop.eup %3502  ;;  %v1484_v28 = vpop.xlane.xlu1 %1483  ;;  %v3267_v52 = vpack.c.bf16 %v3501_v63, %v3497_v61 }
 0x56c   : > { %v1569_v12 = vsub.f32 %v4001_v7, %v1484_v28  ;;  %v1570_v55 = vsub.f32 %v4003_v8, %v1484_v28  ;;  %v3265_v37 = vpack.c.bf16 %v3503_v54, %v3499_v40  ;;  %3512 = vpow2.f32 %v1647_v0 }
 0x56d   : > { %3514 = vpow2.f32 %v1649_v41 }
 0x56e   : > { %v1651_v5 = vmul.f32 1.442695, %v1569_v12  ;;  %v1653_v43 = vmul.f32 1.442695, %v1570_v55  ;;  %3266 = vmatprep.subr.bf16.mxu1 %v3265_v37  ;;  %3330 = vmatprep.subr.bf16.mxu0 %v3265_v37  ;;  %v3505_v4 = vpop.eup %3504 }
 0x56f   : > { %3268 = vmatpush1.bf16.xpose.msra.mxu1 %v3267_v52  ;;  %3332 = vmatpush1.bf16.xpose.msra.mxu0 %v3267_v52  ;;  %v1487_v2 = vpop.xlane.xlu0 %1486  ;;  %v3507_v58 = vpop.eup %3506 }
 0x570   : > { %3516 = vpow2.f32 %v1651_v5  ;;  %v1571_v3 = vsub.f32 %v4007_v10, %v1487_v2  ;;  %v1572_v57 = vsub.f32 %v4009_v11, %v1487_v2 }
 0x571   : > { %3518 = vpow2.f32 %v1653_v43 }
 0x572   : > { %v3509_v7 = vpop.eup %3508  ;;  %v1655_v8 = vmul.f32 1.442695, %v1571_v3  ;;  %v1657_v53 = vmul.f32 1.442695, %v1572_v57 }
 0x573   : > { %v3511_v44 = vpop.eup %3510  ;;  %v1490_v51 = vpop.xlane.xlu1 %1489  ;;  %v3271_v19 = vpack.c.bf16 %v3509_v7, %v3505_v4 }
 0x574   : > { %v1573_v46 = vsub.f32 %v4013_v14, %v1490_v51  ;;  %v1574_v47 = vsub.f32 %v4015_v15, %v1490_v51  ;;  %v3269_v42 = vpack.c.bf16 %v3511_v44, %v3507_v58  ;;  %3520 = vpow2.f32 %v1655_v8 }
 0x575   : > { %3522 = vpow2.f32 %v1657_v53 }
 0x576   : > { %v1659_v49 = vmul.f32 1.442695, %v1573_v46  ;;  %v1661_v62 = vmul.f32 1.442695, %v1574_v47  ;;  %3270 = vmatprep.subr.bf16.mxu1 %v3269_v42  ;;  %3334 = vmatprep.subr.bf16.mxu0 %v3269_v42  ;;  %v3513_v11 = vpop.eup %3512 }
 0x577   : > { %3272 = vmatpush1.bf16.xpose.msra.mxu1 %v3271_v19  ;;  %3336 = vmatpush1.bf16.xpose.msra.mxu0 %v3271_v19  ;;  %v1493_v10 = vpop.xlane.xlu0 %1492  ;;  %v3515_v50 = vpop.eup %3514 }
 0x578   : > { %3524 = vpow2.f32 %v1659_v49  ;;  %v1575_v60 = vsub.f32 %v4019_v17, %v1493_v10  ;;  %v1576_v61 = vsub.f32 %v4021_v18, %v1493_v10 }
 0x579   : > { %3526 = vpow2.f32 %v1661_v62 }
 0x57a   : > { %v3517_v14 = vpop.eup %3516  ;;  %v1663_v15 = vmul.f32 1.442695, %v1575_v60  ;;  %v1665_v40 = vmul.f32 1.442695, %v1576_v61 }
 0x57b   : > { %v3519_v34 = vpop.eup %3518  ;;  %v1496_v63 = vpop.xlane.xlu1 %1495  ;;  %v3275_v0 = vpack.c.bf16 %v3517_v14, %v3513_v11 }
 0x57c   : > { %v1577_v54 = vsub.f32 %v4025_v20, %v1496_v63  ;;  %v1578_v41 = vsub.f32 %v4027_v21, %v1496_v63  ;;  %v3273_v28 = vpack.c.bf16 %v3519_v34, %v3515_v50  ;;  %3528 = vpow2.f32 %v1663_v15 }
 0x57d   : > { %3530 = vpow2.f32 %v1665_v40 }
 0x57e   : > { %v1667_v52 = vmul.f32 1.442695, %v1577_v54  ;;  %v1669_v12 = vmul.f32 1.442695, %v1578_v41  ;;  %3274 = vmatprep.subr.bf16.mxu1 %v3273_v28  ;;  %3338 = vmatprep.subr.bf16.mxu0 %v3273_v28  ;;  %v3521_v18 = vpop.eup %3520 }
 0x57f   : > { %3276 = vmatpush1.bf16.xpose.msra.mxu1 %v3275_v0  ;;  %3340 = vmatpush1.bf16.xpose.msra.mxu0 %v3275_v0  ;;  %v1499_v17 = vpop.xlane.xlu0 %1498  ;;  %v3523_v5 = vpop.eup %3522 }
 0x580   : > { %3532 = vpow2.f32 %v1667_v52  ;;  %v1579_v55 = vsub.f32 %v4031_v23, %v1499_v17  ;;  %v1580_v37 = vsub.f32 %v4033_v24, %v1499_v17 }
 0x581   : > { %3534 = vpow2.f32 %v1669_v12 }
 0x582   : > { %v3525_v20 = vpop.eup %3524  ;;  %v1671_v21 = vmul.f32 1.442695, %v1579_v55  ;;  %v1673_v2 = vmul.f32 1.442695, %v1580_v37 }
 0x583   : > { %v3527_v43 = vpop.eup %3526  ;;  %v1502_v4 = vpop.xlane.xlu1 %1501  ;;  %v3279_v3 = vpack.c.bf16 %v3525_v20, %v3521_v18 }
 0x584   : > { %v1581_v57 = vsub.f32 %v4037_v26, %v1502_v4  ;;  %v1582_v58 = vsub.f32 %v4039_v27, %v1502_v4  ;;  %v3277_v7 = vpack.c.bf16 %v3527_v43, %v3523_v5  ;;  %3536 = vpow2.f32 %v1671_v21 }
 0x585   : > { %3538 = vpow2.f32 %v1673_v2 }
 0x586   : > { %v1675_v8 = vmul.f32 1.442695, %v1581_v57  ;;  %v1677_v44 = vmul.f32 1.442695, %v1582_v58  ;;  %3278 = vmatprep.subr.bf16.mxu1 %v3277_v7  ;;  %3342 = vmatprep.subr.bf16.mxu0 %v3277_v7  ;;  %v3529_v24 = vpop.eup %3528 }
 0x587   : > { %3280 = vmatpush1.bf16.xpose.msra.mxu1 %v3279_v3  ;;  %3344 = vmatpush1.bf16.xpose.msra.mxu0 %v3279_v3  ;;  %v1505_v23 = vpop.xlane.xlu0 %1504  ;;  %v3531_v19 = vpop.eup %3530 }
 0x588   : > { %3540 = vpow2.f32 %v1675_v8  ;;  %v1583_v53 = vsub.f32 %v4043_v29, %v1505_v23  ;;  %v1584_v51 = vsub.f32 %v4045_v30, %v1505_v23 }
 0x589   : > { %3542 = vpow2.f32 %v1677_v44 }
 0x58a   : > { %v3533_v26 = vpop.eup %3532  ;;  %v1679_v27 = vmul.f32 1.442695, %v1583_v53  ;;  %v1681_v47 = vmul.f32 1.442695, %v1584_v51 }
 0x58b   : > { %v3535_v46 = vpop.eup %3534  ;;  %v1508_v42 = vpop.xlane.xlu1 %1507  ;;  %v3283_v49 = vpack.c.bf16 %v3533_v26, %v3529_v24 }
 0x58c   : > { %v1585_v62 = vsub.f32 %v4049_v32, %v1508_v42  ;;  %v1586_v10 = vsub.f32 %v4051_v33, %v1508_v42  ;;  %v3281_v11 = vpack.c.bf16 %v3535_v46, %v3531_v19  ;;  %3544 = vpow2.f32 %v1679_v27 }
 0x58d   : > { %3546 = vpow2.f32 %v1681_v47 }
 0x58e   : > { %v1683_v60 = vmul.f32 1.442695, %v1585_v62  ;;  %v1685_v61 = vmul.f32 1.442695, %v1586_v10  ;;  %3282 = vmatprep.subr.bf16.mxu1 %v3281_v11  ;;  %3346 = vmatprep.subr.bf16.mxu0 %v3281_v11  ;;  %v3537_v30 = vpop.eup %3536 }
 0x58f   : > { %3284 = vmatpush1.bf16.xpose.msra.mxu1 %v3283_v49  ;;  %3348 = vmatpush1.bf16.xpose.msra.mxu0 %v3283_v49  ;;  %v1511_v29 = vpop.xlane.xlu0 %1510  ;;  %v3539_v15 = vpop.eup %3538 }
 0x590   : > { %3548 = vpow2.f32 %v1683_v60  ;;  %v1587_v50 = vsub.f32 %v4055_v35, %v1511_v29  ;;  %v1588_v14 = vsub.f32 %v4057_v36, %v1511_v29  ;;  %v4684_v29 = vld [vmem:[#allocation9_spill] sm:$0xff] }
 0x591   : > { %3550 = vpow2.f32 %v1685_v61 }
 0x592   : > { %v3541_v32 = vpop.eup %3540  ;;  %v1687_v33 = vmul.f32 1.442695, %v1587_v50  ;;  %v1689_v40 = vmul.f32 1.442695, %v1588_v14 }
 0x593   : > { %v3543_v34 = vpop.eup %3542  ;;  %v1514_v63 = vpop.xlane.xlu1 %1513  ;;  %v3287_v0 = vpack.c.bf16 %v3541_v32, %v3537_v30  ;;  %v4685_v32 = vld [vmem:[#allocation10_spill] sm:$0xff] }
 0x594   : > { %v1589_v54 = vsub.f32 %v4061_v38, %v1514_v63  ;;  %v1590_v41 = vsub.f32 %v4063_v39, %v1514_v63  ;;  %v3285_v28 = vpack.c.bf16 %v3543_v34, %v3539_v15  ;;  %3552 = vpow2.f32 %v1687_v33  ;;  %v4686_v34 = vld [vmem:[#allocation11_spill] sm:$0xff] }
 0x595   : > { %3554 = vpow2.f32 %v1689_v40 }
 0x596   : > { %v1691_v52 = vmul.f32 1.442695, %v1589_v54  ;;  %v1693_v12 = vmul.f32 1.442695, %v1590_v41  ;;  %3286 = vmatprep.subr.bf16.mxu1 %v3285_v28  ;;  %3350 = vmatprep.subr.bf16.mxu0 %v3285_v28  ;;  %v3545_v36 = vpop.eup %3544 }
 0x597   : > { %3288 = vmatpush1.bf16.xpose.msra.mxu1 %v3287_v0  ;;  %3352 = vmatpush1.bf16.xpose.msra.mxu0 %v3287_v0  ;;  %v1517_v35 = vpop.xlane.xlu0 %1516  ;;  %v3547_v55 = vpop.eup %3546 }
 0x598   : > { %3556 = vpow2.f32 %v1691_v52  ;;  %v1591_v17 = vsub.f32 %v4067_v45, %v1517_v35  ;;  %v1592_v18 = vsub.f32 %v4069_v48, %v1517_v35 }
 0x599   : > { %3558 = vpow2.f32 %v1693_v12  ;;  %v4687_v12 = vld [vmem:[#allocation12_spill] sm:$0xff] }
 0x59a   : > { %v3549_v38 = vpop.eup %3548  ;;  %v1695_v39 = vmul.f32 1.442695, %v1591_v17  ;;  %v1697_v5 = vmul.f32 1.442695, %v1592_v18 }
 0x59b   : > { %v3551_v37 = vpop.eup %3550  ;;  %v1520_v20 = vpop.xlane.xlu1 %1519  ;;  %v3291_v21 = vpack.c.bf16 %v3549_v38, %v3545_v36  ;;  %v4688_v36 = vld [vmem:[#allocation13_spill] sm:$0xff] }
 0x59c   : > { %v1593_v43 = vsub.f32 %v4073_v56, %v1520_v20  ;;  %v1594_v2 = vsub.f32 %v4075_v59, %v1520_v20  ;;  %v3289_v4 = vpack.c.bf16 %v3551_v37, %v3547_v55  ;;  %3560 = vpow2.f32 %v1695_v39 }
 0x59d   : > { %3562 = vpow2.f32 %v1697_v5  ;;  %v4689_v5 = vld [vmem:[#allocation14_spill] sm:$0xff] }
 0x59e   : > { %v1699_v3 = vmul.f32 1.442695, %v1593_v43  ;;  %v1701_v57 = vmul.f32 1.442695, %v1594_v2  ;;  %3290 = vmatprep.subr.bf16.mxu1 %v3289_v4  ;;  %3354 = vmatprep.subr.bf16.mxu0 %v3289_v4  ;;  %v3553_v48 = vpop.eup %3552 }
 0x59f   : > { %3292 = vmatpush1.bf16.xpose.msra.mxu1 %v3291_v21  ;;  %3356 = vmatpush1.bf16.xpose.msra.mxu0 %v3291_v21  ;;  %v1523_v45 = vpop.xlane.xlu0 %1522  ;;  %v3555_v8 = vpop.eup %3554  ;;  %v4690_v21 = vld [vmem:[#allocation15_spill] sm:$0xff] }
 0x5a0   : > { %3564 = vpow2.f32 %v1699_v3  ;;  %v1595_v58 = vsub.f32 %v4079_v1, %v1523_v45  ;;  %v1596_v7 = vsub.f32 %v4081_v6, %v1523_v45 }
 0x5a1   : > { %3566 = vpow2.f32 %v1701_v57 }
 0x5a2   : > { %v3557_v56 = vpop.eup %3556  ;;  %v1703_v59 = vmul.f32 1.442695, %v1595_v58  ;;  %v1705_v23 = vmul.f32 1.442695, %v1596_v7  ;;  %v4691_v7 = vld [vmem:[#allocation16_spill] sm:$0xff] }
 0x5a3   : > { %v3559_v44 = vpop.eup %3558  ;;  %v1526_v24 = vpop.xlane.xlu1 %1525  ;;  %v3295_v53 = vpack.c.bf16 %v3557_v56, %v3553_v48  ;;  %v4692_v56 = vld [vmem:[#allocation17_spill] sm:$0xff] }
 0x5a4   : > { %v1597_v51 = vsub.f32 %v4085_v13, %v1526_v24  ;;  %v1598_v19 = vsub.f32 %v4087_v16, %v1526_v24  ;;  %v3293_v26 = vpack.c.bf16 %v3559_v44, %v3555_v8  ;;  %3568 = vpow2.f32 %v1703_v59 }
 0x5a5   : > { %3570 = vpow2.f32 %v1705_v23 }
 0x5a6   : > { %v1707_v27 = vmul.f32 1.442695, %v1597_v51  ;;  %v1709_v46 = vmul.f32 1.442695, %v1598_v19  ;;  %3294 = vmatprep.subr.bf16.mxu1 %v3293_v26  ;;  %3358 = vmatprep.subr.bf16.mxu0 %v3293_v26  ;;  %v3561_v6 = vpop.eup %3560  ;;  %v4693_v19 = vld [vmem:[#allocation18_spill] sm:$0xff] }
 0x5a7   : > { %3296 = vmatpush1.bf16.xpose.msra.mxu1 %v3295_v53  ;;  %3360 = vmatpush1.bf16.xpose.msra.mxu0 %v3295_v53  ;;  %v1529_v1 = vpop.xlane.xlu0 %1528  ;;  %v3563_v49 = vpop.eup %3562 }
 0x5a8   : > { %3572 = vpow2.f32 %v1707_v27  ;;  %v1599_v47 = vsub.f32 %v4091_v22, %v1529_v1  ;;  %v1600_v42 = vsub.f32 %v4093_v25, %v1529_v1  ;;  %v4694_v27 = vld [vmem:[#allocation19_spill] sm:$0xff] }
 0x5a9   : > { %3574 = vpow2.f32 %v1709_v46 }
 0x5aa   : > { %v3565_v13 = vpop.eup %3564  ;;  %v1711_v16 = vmul.f32 1.442695, %v1599_v47  ;;  %v1713_v10 = vmul.f32 1.442695, %v1600_v42 }
 0x5ab   : > { %v3567_v62 = vpop.eup %3566  ;;  %v1532_v11 = vpop.xlane.xlu1 %1531  ;;  %v3299_v60 = vpack.c.bf16 %v3565_v13, %v3561_v6 }
 0x5ac   : > { %v1601_v61 = vsub.f32 %v4097_v31, %v1532_v11  ;;  %v1602_v30 = vsub.f32 %v4684_v29, %v1532_v11  ;;  %v3297_v50 = vpack.c.bf16 %v3567_v62, %v3563_v49  ;;  %3576 = vpow2.f32 %v1711_v16  ;;  %v4695_v62 = vld [vmem:[#allocation20_spill] sm:$0xff]  ;;  %v4696_v11 = vld [vmem:[#allocation21_spill] sm:$0xff] }
 0x5ad   : > { %3578 = vpow2.f32 %v1713_v10 }
 0x5ae   : > { %v1715_v14 = vmul.f32 1.442695, %v1601_v61  ;;  %v1717_v15 = vmul.f32 1.442695, %v1602_v30  ;;  %3298 = vmatprep.subr.bf16.mxu1 %v3297_v50  ;;  %3362 = vmatprep.subr.bf16.mxu0 %v3297_v50  ;;  %v3569_v25 = vpop.eup %3568 }
 0x5af   : > { %3300 = vmatpush1.bf16.xpose.msra.mxu1 %v3299_v60  ;;  %3364 = vmatpush1.bf16.xpose.msra.mxu0 %v3299_v60  ;;  %v1535_v22 = vpop.xlane.xlu0 %1534  ;;  %v3571_v63 = vpop.eup %3570 }
 0x5b0   : > { %3580 = vpow2.f32 %v1715_v14  ;;  %v1603_v33 = vsub.f32 %v4685_v32, %v1535_v22  ;;  %v1604_v40 = vsub.f32 %v4686_v34, %v1535_v22 }
 0x5b1   : > { %3582 = vpow2.f32 %v1717_v15  ;;  %v4697_v15 = vld [vmem:[#allocation23_spill] sm:$0xff] }
 0x5b2   : > { %v3573_v31 = vpop.eup %3572  ;;  %v1719_v0 = vmul.f32 1.442695, %v1603_v33  ;;  %v1721_v41 = vmul.f32 1.442695, %v1604_v40 }
 0x5b3   : > { %v3575_v54 = vpop.eup %3574  ;;  %v1538_v28 = vpop.xlane.xlu1 %1537  ;;  %v3303_v52 = vpack.c.bf16 %v3573_v31, %v3569_v25 }
 0x5b4   : > { %v1605_v35 = vsub.f32 %v4687_v12, %v1538_v28  ;;  %v1606_v17 = vsub.f32 %v4688_v36, %v1538_v28  ;;  %v3301_v18 = vpack.c.bf16 %v3575_v54, %v3571_v63  ;;  %3584 = vpow2.f32 %v1719_v0 }
 0x5b5   : > { %3586 = vpow2.f32 %v1721_v41 }
 0x5b6   : > { %v1723_v55 = vmul.f32 1.442695, %v1605_v35  ;;  %v1725_v38 = vmul.f32 1.442695, %v1606_v17  ;;  %3302 = vmatprep.subr.bf16.mxu1 %v3301_v18  ;;  %3366 = vmatprep.subr.bf16.mxu0 %v3301_v18  ;;  %v3577_v37 = vpop.eup %3576  ;;  %v4699_v35 = vld [vmem:[#allocation22_spill] sm:$0xff]  ;;  %v4700_v17 = vld [vmem:[#allocation25_spill] sm:$0xff] }
 0x5b7   : > { %3304 = vmatpush1.bf16.xpose.msra.mxu1 %v3303_v52  ;;  %3368 = vmatpush1.bf16.xpose.msra.mxu0 %v3303_v52  ;;  %v1541_v39 = vpop.xlane.xlu0 %1540  ;;  %v3579_v2 = vpop.eup %3578  ;;  %v4698_v52 = vld [vmem:[#allocation7_spill] sm:$0xff] }
 0x5b8   : > { %3588 = vpow2.f32 %v1723_v55  ;;  %v1607_v20 = vsub.f32 %v4689_v5, %v1541_v39  ;;  %v1608_v43 = vsub.f32 %v4690_v21, %v1541_v39  ;;  %v4701_v55 = vld [vmem:[#allocation8_spill] sm:$0xff]  ;;  %v4704_v5 = vld [vmem:[#allocation5_spill] sm:$0xff]  ;;  %v1928_v21 = vld [vmem:[%s4629_s9 + $0x8] sm:$0xff] }
 0x5b9   : > { %3590 = vpow2.f32 %v1725_v38  ;;  %v4702_v38 = vld [vmem:[#allocation24_spill] sm:$0xff] }
 0x5ba   : > { %v3581_v4 = vpop.eup %3580  ;;  %v1727_v3 = vmul.f32 1.442695, %v1607_v20  ;;  %v1729_v45 = vmul.f32 1.442695, %v1608_v43  ;;  %v1927_v20 = vld [vmem:[%s4629_s9] sm:$0xff] }
 0x5bb   : > { %v3583_v57 = vpop.eup %3582  ;;  %v1544_v48 = vpop.xlane.xlu1 %1543  ;;  %v3307_v58 = vpack.c.bf16 %v3581_v4, %v3577_v37  ;;  %v4703_v37 = vmov 0.0   ;;  %v1925_v43 = vld [vmem:[%s4628_s8] sm:$0xff] }
 0x5bc   : > { %v1609_v8 = vsub.f32 %v4691_v7, %v1544_v48  ;;  %v1610_v59 = vsub.f32 %v4692_v56, %v1544_v48  ;;  %v3305_v44 = vpack.c.bf16 %v3583_v57, %v3579_v2  ;;  %3592 = vpow2.f32 %v1727_v3  ;;  %v1926_v2 = vld [vmem:[%s4628_s8 + $0x8] sm:$0xff] }
 0x5bd   : > { %3594 = vpow2.f32 %v1729_v45  ;;  %v1900_v7 = vlaneseq }
 0x5be   : > { %v1731_v23 = vmul.f32 1.442695, %v1609_v8  ;;  %v1733_v24 = vmul.f32 1.442695, %v1610_v59  ;;  %3306 = vmatprep.subr.bf16.mxu1 %v3305_v44  ;;  %3370 = vmatprep.subr.bf16.mxu0 %v3305_v44  ;;  %v3585_v51 = vpop.eup %3584 }
 0x5bf   : > { %3308 = vmatpush1.bf16.xpose.msra.mxu1 %v3307_v58  ;;  %3372 = vmatpush1.bf16.xpose.msra.mxu0 %v3307_v58  ;;  %v1547_v53 = vpop.xlane.xlu0 %1546  ;;  %v3587_v1 = vpop.eup %3586  ;;  %v4256_v8 = vshrl.u32 %v1900_v7, 7 }
 0x5c0   : > { %3596 = vpow2.f32 %v1731_v23  ;;  %v1611_v26 = vsub.f32 %v4693_v19, %v1547_v53  ;;  %v1612_v46 = vsub.f32 %v4694_v27, %v1547_v53 }
 0x5c1   : > { %3598 = vpow2.f32 %v1733_v24  ;;  %v1902_v53 = vsub.s32 0, %v4256_v8 }
 0x5c2   : > { %v3589_v6 = vpop.eup %3588  ;;  %v1735_v47 = vmul.f32 1.442695, %v1611_v26  ;;  %v1737_v49 = vmul.f32 1.442695, %v1612_v46  ;;  %v1912_v46 = vstv %s3216_s28  ;;  %s3665_s28 = smov 1  }
 0x5c3   : > { %v3591_v42 = vpop.eup %3590  ;;  %v1550_v13 = vpop.xlane.xlu1 %1549  ;;  %v3311_v16 = vpack.c.bf16 %v3589_v6, %v3585_v51 }
 0x5c4   : > { %v1613_v10 = vsub.f32 %v4695_v62, %v1550_v13  ;;  %v1614_v60 = vsub.f32 %v4696_v11, %v1550_v13  ;;  %v3309_v61 = vpack.c.bf16 %v3591_v42, %v3587_v1  ;;  %3600 = vpow2.f32 %v1735_v47  ;;  %v3612_v11 = vld [vmem:[%s3845_s27] sm:$0xff] }
 0x5c5   : > { %3602 = vpow2.f32 %v1737_v49 }
 0x5c6   : > { %v1739_v29 = vmul.f32 1.442695, %v1613_v10  ;;  %v1741_v30 = vmul.f32 1.442695, %v1614_v60  ;;  %3310 = vmatprep.subr.bf16.mxu1 %v3309_v61  ;;  %3374 = vmatprep.subr.bf16.mxu0 %v3309_v61  ;;  %v3593_v14 = vpop.eup %3592  ;;  %v3613_v61 = vld [vmem:[%s3845_s27 + $0x10] sm:$0xff] }
 0x5c7   : > { %3312 = vmatpush1.bf16.xpose.msra.mxu1 %v3311_v16  ;;  %3376 = vmatpush1.bf16.xpose.msra.mxu0 %v3311_v16  ;;  %v940_v50 = vpop.permute.xlu0 %939  ;;  %v3595_v25 = vpop.eup %3594 }
 0x5c8   : > { %3604 = vpow2.f32 %v1739_v29  ;;  %v1022_v22 = vadd.f32 %v4697_v15, %v940_v50  ;;  %v945_v12 = vpop.permute.xlu1 %944  ;;  %v1020_v36 = vadd.f32 %v4699_v35, %v940_v50 }
 0x5c9   : > { %3606 = vpow2.f32 %v1741_v30  ;;  %v1028_v18 = vadd.f32 %v4700_v17, %v945_v12  ;;  %v1026_v39 = vadd.f32 %v4702_v38, %v945_v12  ;;  %v3614_v30 = vld [vmem:[%s3845_s27 + $0x18] sm:$0xff]  ;;  %v2204_v17 = vld [vmem:[%s4632_s12] sm:$0xff] }
 0x5ca   : > { %v3597_v32 = vpop.eup %3596  ;;  %1807 = vmatprep.mubr.f32.mxu1 %v1022_v22  ;;  %v2207_v38 = vld [vmem:[%s4632_s12 + $0x18] sm:$0xff] }
 0x5cb   : > { %v3599_v33 = vpop.eup %3598  ;;  %v3315_v34 = vpack.c.bf16 %v3597_v32, %v3593_v14  ;;  %v3615_v14 = vld [vmem:[%s3845_s27 + $0x8] sm:$0xff]  ;;  %v2095_v32 = vld [vmem:[%s4706_s21] sm:$0xff]  ;;  %s3646_s27 = smov 47  }
 0x5cc   : > { %v3313_v40 = vpack.c.bf16 %v3599_v33, %v3595_v25  ;;  %v2096_v33 = vld [vmem:[%s4706_s21 + $0x8] sm:$0xff] }
 0x5ce   : > { %3314 = vmatprep.subr.bf16.mxu1 %v3313_v40  ;;  %3378 = vmatprep.subr.bf16.mxu0 %v3313_v40  ;;  %v3601_v63 = vpop.eup %3600 }
 0x5cf   : > { %3316 = vmatpush1.bf16.xpose.msra.mxu1 %v3315_v34  ;;  %3380 = vmatpush1.bf16.xpose.msra.mxu0 %v3315_v34  ;;  %v3603_v31 = vpop.eup %3602  ;;  %v2189_v34 = vpop.permute.xlu1 %2188 }
 0x5d2   : > { %v3605_v0 = vpop.eup %3604 }
 0x5d3   : > { %v3607_v54 = vpop.eup %3606  ;;  %v3319_v41 = vpack.c.bf16 %v3605_v0, %v3601_v63 }
 0x5d4   : > { %v3317_v28 = vpack.c.bf16 %v3607_v54, %v3603_v31  ;;  %v2194_v54 = vpop.permute.xlu0 %2193 }
 0x5d6   : > { %3318 = vmatprep.subr.bf16.mxu1 %v3317_v28  ;;  %3382 = vmatprep.subr.bf16.mxu0 %v3317_v28 }
 0x5d7   : > { %3320 = vmatpush1.bf16.xpose.msra.mxu1 %v3319_v41  ;;  %3384 = vmatpush1.bf16.xpose.msra.mxu0 %v3319_v41 }
 0x5d8   : > { %3386 = vmatprep.subr.bf16.mxu0 %v4698_v52 }
 0x5de   : > { %1808 = vmatmul.mubr.f32.vlgmr.msra.gmra.mrb[10].mxu1 %v1020_v36  ;;  %1885 = vmatmul.mubr.f32.vlgmr.msra.gmra.mrb[70].mxu0 %v3641_v9  ;;  %v4705_v9 = vld [vmem:[#allocation6_spill] sm:$0xff] }
 0x5df   : > { %1813 = vmatprep.mubr.f32.mxu1 %v1028_v18  ;;  %3388 = vmatpush1.bf16.msra.mxu0 %v4701_v55  ;;  %v2205_v18 = vld [vmem:[%s4632_s12 + $0x8] sm:$0xff]  ;;  %v2206_v55 = vld [vmem:[%s4632_s12 + $0x10] sm:$0xff] }
 0x5e0   : > { %1999 = vmatprep.mubr.f32.mxu0 %v4703_v37  ;;  %3390 = vmatprep.subr.bf16.mxu0 %v4704_v5  ;;  %v2209_v5 = vld [vmem:[%s4632_s12 + $0x28] sm:$0xff] }
 0x5e2   : > { %1814 = vmatmul.mubr.f32.gmra.mrb[12].mxu1 %v1026_v39  ;;  %3217 = vmatmul.mubr.msk.f32.vlgmr.msra.gmra.mrb[72].mxu0 %vm643_vm0, %v1927_v20  ;;  %v2208_v39 = vld [vmem:[%s4632_s12 + $0x20] sm:$0xff]  ;;  %v2210_v20 = vld [vmem:[%s4632_s12 + $0x30] sm:$0x1] }
 0x5e3   : > { %2296 = vmatprep.mubr.f32.mxu1 %v4703_v37  ;;  %2005 = vmatprep.mubr.f32.mxu0 %v4703_v37 }
 0x5e4   : > { %3392 = vmatpush1.bf16.msra.mxu0 %v4705_v9  ;;  %v2339_v9 = vld [vmem:[%s4633_s13] sm:$0xff] }
 0x5e6   : > { %3218 = vmatmul.mubr.msk.f32.gmra.mrb[74].mxu0 %vm643_vm0, %v1928_v21  ;;  %v2340_v21 = vld [vmem:[%s4633_s13 + $0x8] sm:$0xff] }
 0x5e7   : > { %2082 = vmatprep.mubr.f32.mxu0 %v4703_v37 }
 0x5ea   : > { %3219 = vmatmul.mubr.msk.f32.vlgmr.msra.gmra.mrb[72].mxu0 %vm643_vm0, %v1925_v43 }
 0x5eb   : > { %2088 = vmatprep.mubr.f32.mxu0 %v4703_v37 }
 0x5ee   : > { %3220 = vmatmul.mubr.msk.f32.gmra.mrb[74].mxu0 %vm643_vm0, %v1926_v2 }
 0x5ef   : > { %2167 = vmatprep.mubr.f32.mxu0 %v4703_v37 }
 0x6b1   : > { %v1809_v4 = vpop.f32.mrb[10].mxu1  ;;  %v1886_v3 = vpop.f32.mrb[70].mxu0 }
 0x6b2   : > { %3608 = vrcp.f32 %v1886_v3  ;;  %v1811_v57 = vpop.f32.mrb[11].mxu1  ;;  %v1888_v45 = vpop.f32.mrb[71].mxu0 }
 0x6b3   : > { %3610 = vrcp.f32 %v1888_v45 }
 0x6b5   : > { %v1815_v48 = vpop.f32.mrb[12].mxu1 }
 0x6b6   : > { %v1817_v58 = vpop.f32.mrb[13].mxu1 }
 0x6bc   : > { %v3609_v56 = vpop.eup %3608 }
 0x6bd   : > { %v3611_v59 = vpop.eup %3610  ;;  %v1894_v44 = vmul.f32 %v3609_v56, %v1886_v3 }
 0x6be   : > { %v1895_v23 = vmul.f32 %v3611_v59, %v1888_v45 }
 0x6bf   : > { %v1896_v24 = vsub.f32 2.0, %v1894_v44 }
 0x6c0   : > { %v1897_v51 = vsub.f32 2.0, %v1895_v23 }
 0x6c1   : > { %v1898_v19 = vmul.f32 %v3609_v56, %v1896_v24 }
 0x6c2   : > { %v1899_v26 = vmul.f32 %v3611_v59, %v1897_v51 }
 0x6c3   : > { %v1903_v27 = vrot.slane %v1898_v19, %v1902_v53 }
 0x6c4   : > { %v1907_v1 = vrot.slane %v1899_v26, %v1902_v53 }
 0x6c5   : > { %v1908_v6 = vmul.f32 %v1903_v27, %v1809_v4  ;;  %v1910_v47 = vmul.f32 %v1903_v27, %v1815_v48 }
 0x6c6   : > { %v1909_v42 = vmul.f32 %v1907_v1, %v1811_v57  ;;  %v1911_v49 = vmul.f32 %v1907_v1, %v1817_v58 }
 0x6c7   : > { %v1913_v13 = vmul.f32 %v1912_v46, %v1908_v6  ;;  %v1915_v16 = vmul.f32 %v1912_v46, %v1910_v47 }
 0x6c8   : > { %v1914_v62 = vmul.f32 %v1912_v46, %v1909_v42  ;;  %v1916_v10 = vmul.f32 %v1912_v46, %v1911_v49  ;;  %v2341_v49 = vld [vmem:[%s4633_s13 + $0x10] sm:$0xff] }
 0x6c9   : > { %v1917_v60 = vadd.f32 %v3612_v11, %v1913_v13  ;;  %v1919_v29 = vadd.f32 %v3613_v61, %v1915_v16 }
 0x6ca   : > { %v1920_v50 = vadd.f32 %v3614_v30, %v1916_v10  ;;  %v1918_v15 = vadd.f32 %v3615_v14, %v1914_v62  ;;  %v2342_v62 = vld [vmem:[%s4633_s13 + $0x18] sm:$0xff] }
 0x6cb   : > { %1921 = vst [vmem:[%s554_s19] sm:$0xff] %v1917_v60  ;;  %1923 = vst [vmem:[%s554_s19 + $0x10] sm:$0xff] %v1919_v29  ;;  %v3395_v22 = vpack.c.bf16 %v1919_v29, %v1917_v60 }
 0x6cc   : > { %1924 = vst [vmem:[%s554_s19 + $0x18] sm:$0xff] %v1920_v50  ;;  %1922 = vst [vmem:[%s554_s19 + $0x8] sm:$0xff] %v1918_v15  ;;  %v3393_v25 = vpack.c.bf16 %v1920_v50, %v1918_v15  ;;  %s3642_s19 = smov 51  }
 0x6ce   : > { %3394 = vmatprep.subr.bf16.mxu0 %v3393_v25 }
 0x6cf   : > { %3396 = vmatpush1.bf16.msra.mxu0 %v3395_v22 }
 0x6d2   : > { %3221 = vmatmul.mubr.msk.f32.vlgmr.msra.gmra.mrb[72].mxu0 %vm643_vm0, %v2095_v32 }
 0x6d3   : > { %2173 = vmatprep.mubr.f32.mxu0 %v4703_v37 }
 0x6d6   : > { %3222 = vmatmul.mubr.msk.f32.gmra.mrb[74].mxu0 %vm643_vm0, %v2096_v33 }
 0x7a5   : > { %v2169_v40 = vpop.f32.mrb[72].mxu0 }
 0x7a6   : > { %v2196_v63 = vadd.f32 %v2189_v34, %v2169_v40  ;;  %v2171_v31 = vpop.f32.mrb[73].mxu0 }
 0x7a7   : > { %v2197_v0 = vadd.f32 %v2189_v34, %v2171_v31  ;;  %v2343_v31 = vld [vmem:[%s4633_s13 + $0x20] sm:$0xff] }
 0x7a8   : > { %2200 = vst [vmem:[%s559_s25] sm:$0xff] %v2196_v63 }
 0x7a9   : > { %2201 = vst [vmem:[%s559_s25 + $0x8] sm:$0xff] %v2197_v0  ;;  %v2175_v41 = vpop.f32.mrb[74].mxu0 }
 0x7aa   : > { %v2198_v28 = vadd.f32 %v2194_v54, %v2175_v41  ;;  %v2177_v52 = vpop.f32.mrb[75].mxu0  ;;  %v2344_v41 = vld [vmem:[%s4633_s13 + $0x28] sm:$0xff] }
 0x7ab   : > { %v2199_v12 = vadd.f32 %v2194_v54, %v2177_v52 }
 0x7ac   : > { %2202 = vst [vmem:[%s559_s25 + $0x10] sm:$0xff] %v2198_v28  ;;  %v3399_v35 = vpack.c.bf16 %v2198_v28, %v2196_v63 }
 0x7ad   : > { %2203 = vst [vmem:[%s559_s25 + $0x18] sm:$0xff] %v2199_v12  ;;  %v3397_v36 = vpack.c.bf16 %v2199_v12, %v2197_v0  ;;  %s3672_s25 = smov 112  }
 0x7af   : > { %3398 = vmatprep.subr.bf16.mxu1 %v3397_v36 }
 0x7b0   : > { %3400 = vmatpush1.bf16.msra.mxu1 %v3399_v35 }
 0x7b3   : > { %3223 = vmatmul.mubr.msk.f32.vlgmr.msra.gmra.mrb[14].mxu1 %vm643_vm0, %v2204_v17 }
 0x7b4   : > { %2302 = vmatprep.mubr.f32.mxu1 %v4703_v37 }
 0x7b7   : > { %3224 = vmatmul.mubr.msk.f32.gmra.mrb[16].mxu1 %vm643_vm0, %v2205_v18 }
 0x7b8   : > { %2308 = vmatprep.mubr.f32.mxu1 %v4703_v37 }
 0x7bb   : > { %3225 = vmatmul.mubr.msk.f32.gmra.mrb[18].mxu1 %vm643_vm0, %v2206_v55 }
 0x7bc   : > { %2314 = vmatprep.mubr.f32.mxu1 %v4703_v37 }
 0x7bf   : > { %3226 = vmatmul.mubr.msk.f32.gmra.mrb[20].mxu1 %vm643_vm0, %v2207_v38 }
 0x7c0   : > { %2320 = vmatprep.mubr.f32.mxu1 %v4703_v37 }
 0x7c3   : > { %3227 = vmatmul.mubr.msk.f32.gmra.mrb[22].mxu1 %vm643_vm0, %v2208_v39 }
 0x7c4   : > { %2326 = vmatprep.mubr.f32.mxu1 %v4703_v37 }
 0x7c7   : > { %3228 = vmatmul.mubr.msk.f32.gmra.mrb[24].mxu1 %vm643_vm0, %v2209_v5 }
 0x7c8   : > { %2332 = vmatprep.mubr.f32.mxu1 %v4703_v37 }
 0x7cb   : > { %3229 = vmatmul.mubr.msk.f32.gmra.mrb[26].mxu1 %vm643_vm0, %v2210_v20 }
 0x886   : > { %v2298_v43 = vpop.f32.mrb[14].mxu1 }
 0x887   : > { %v2353_v2 = vmul.f32 %v2339_v9, %v2298_v43  ;;  %v2300_v4 = vpop.f32.mrb[15].mxu1  ;;  %v2345_v43 = vld [vmem:[%s4633_s13 + $0x30] sm:$0xff] }
 0x888   : > { %v2354_v3 = vmul.f32 %v2340_v21, %v2300_v4  ;;  %v2346_v4 = vld [vmem:[%s4633_s13 + $0x38] sm:$0xff] }
 0x889   : > { %2367 = vrot.lane.b32.xlu1 %v2353_v2, %s3642_s19  ;;  %v2380_v57 = vrot.slane %v2353_v2, 1  ;;  %v2393_v56 = vrot.slane %v2353_v2, 2  ;;  %v2406_v24 = vrot.slane %v2353_v2, 3  ;;  %v2419_v26 = vrot.slane %v2353_v2, 4 }
 0x88a   : > { %2369 = vrot.lane.b32.xlu0 %v2354_v3, %s3642_s19  ;;  %v2304_v37 = vpop.f32.mrb[16].mxu1  ;;  %v2381_v48 = vrot.slane %v2354_v3, 1  ;;  %v2394_v44 = vrot.slane %v2354_v3, 2  ;;  %v2407_v51 = vrot.slane %v2354_v3, 3  ;;  %v2420_v46 = vrot.slane %v2354_v3, 4  ;;  %s3651_s19 = smov 33  }
 0x88b   : > { %v2306_v45 = vpop.f32.mrb[17].mxu1  ;;  %v2432_v1 = vrot.slane %v2353_v2, 5  ;;  %v2433_v6 = vrot.slane %v2354_v3, 5  ;;  %v2445_v47 = vrot.slane %v2353_v2, 6  ;;  %v2446_v42 = vrot.slane %v2354_v3, 6 }
 0x88c   : > { %v2458_v16 = vrot.slane %v2353_v2, 7  ;;  %v2459_v11 = vrot.slane %v2354_v3, 7  ;;  %v2355_v60 = vmul.f32 %v2341_v49, %v2304_v37  ;;  %v2356_v61 = vmul.f32 %v2342_v62, %v2306_v45 }
 0x88d   : > { %2384 = vrot.lane.b32.xlu1 %v2380_v57, %s3643_s1 }
 0x88e   : > { %2386 = vrot.lane.b32.xlu0 %v2381_v48, %s3643_s1  ;;  %v4320_v58 = vpop.f32.mrb[18].mxu1  ;;  %v2482_v29 = vrot.slane %v2355_v60, 1  ;;  %v2483_v30 = vrot.slane %v2356_v61, 1  ;;  %v2495_v50 = vrot.slane %v2355_v60, 2  ;;  %v2496_v14 = vrot.slane %v2356_v61, 2  ;;  %s3652_s1 = smov 32  }
 0x88f   : > { %v4322_v59 = vpop.f32.mrb[19].mxu1  ;;  %v2508_v15 = vrot.slane %v2355_v60, 3  ;;  %v2509_v22 = vrot.slane %v2356_v61, 3  ;;  %v2521_v25 = vrot.slane %v2355_v60, 4  ;;  %v2522_v32 = vrot.slane %v2356_v61, 4 }
 0x890   : > { %v2534_v33 = vrot.slane %v2355_v60, 5  ;;  %v2535_v34 = vrot.slane %v2356_v61, 5  ;;  %v2547_v40 = vrot.slane %v2355_v60, 6  ;;  %v2548_v63 = vrot.slane %v2356_v61, 6 }
 0x891   : > { %2397 = vrot.lane.b32.xlu1 %v2393_v56, %s3644_s20  ;;  %v2560_v54 = vrot.slane %v2355_v60, 7  ;;  %v2561_v52 = vrot.slane %v2356_v61, 7  ;;  %v2357_v12 = vmul.f32 %v2343_v31, %v4320_v58  ;;  %v2358_v35 = vmul.f32 %v2344_v41, %v4322_v59 }
 0x892   : > { %2399 = vrot.lane.b32.xlu0 %v2394_v44, %s3644_s20  ;;  %v4324_v23 = vpop.f32.mrb[20].mxu1  ;;  %s3653_s20 = smov 31  }
 0x893   : > { %v4326_v53 = vpop.f32.mrb[21].mxu1  ;;  %v2584_v36 = vrot.slane %v2357_v12, 1  ;;  %v2585_v17 = vrot.slane %v2358_v35, 1  ;;  %v2597_v18 = vrot.slane %v2357_v12, 2  ;;  %v2598_v55 = vrot.slane %v2358_v35, 2 }
 0x894   : > { %v2610_v38 = vrot.slane %v2357_v12, 3  ;;  %v2611_v39 = vrot.slane %v2358_v35, 3  ;;  %v2623_v5 = vrot.slane %v2357_v12, 4  ;;  %v2624_v20 = vrot.slane %v2358_v35, 4 }
 0x895   : > { %2410 = vrot.lane.b32.xlu1 %v2406_v24, %s3645_s22  ;;  %v2636_v9 = vrot.slane %v2357_v12, 5  ;;  %v2637_v21 = vrot.slane %v2358_v35, 5  ;;  %v2649_v2 = vrot.slane %v2357_v12, 6  ;;  %v2650_v3 = vrot.slane %v2358_v35, 6 }
 0x896   : > { %2412 = vrot.lane.b32.xlu0 %v2407_v51, %s3645_s22  ;;  %v4328_v19 = vpop.f32.mrb[22].mxu1  ;;  %s3654_s22 = smov 30   ;;  %v4361_v37 = vmul.f32 %v2345_v43, %v4324_v23  ;;  %v4364_v57 = vmul.f32 %v2346_v4, %v4326_v53  ;;  %v2662_v45 = vrot.slane %v2357_v12, 7  ;;  %v2663_v48 = vrot.slane %v2358_v35, 7 }
 0x897   : > { %v4330_v27 = vpop.f32.mrb[23].mxu1 }
 0x898   : > { %v2679_v58 = vrot.slane %v4361_v37, 1  ;;  %v2680_v56 = vrot.slane %v4364_v57, 1  ;;  %v2692_v59 = vrot.slane %v4361_v37, 2  ;;  %v2693_v44 = vrot.slane %v4364_v57, 2 }
 0x899   : > { %2423 = vrot.lane.b32.xlu1 %v2419_v26, %s3646_s27  ;;  %v2705_v23 = vrot.slane %v4361_v37, 3  ;;  %v2706_v24 = vrot.slane %v4364_v57, 3  ;;  %v2718_v53 = vrot.slane %v4361_v37, 4  ;;  %v2719_v51 = vrot.slane %v4364_v57, 4 }
 0x89a   : > { %2425 = vrot.lane.b32.xlu0 %v2420_v46, %s3646_s27  ;;  %v4335_v13 = vpop.f32.mrb[24].mxu1  ;;  %s3655_s27 = smov 29   ;;  %v4375_v26 = vand.u32 127, %v1900_v7  ;;  %v2731_v46 = vrot.slane %v4361_v37, 5  ;;  %v2745_v49 = vrot.slane %v4364_v57, 6 }
 0x89b   : > { %v4340_v10 = vpop.f32.mrb[25].mxu1 }
 0x89c   : > { %vm2373_vm3 = vcmp.lt.s32.totalorder %v4375_v26, 51  ;;  %vm2388_vm4 = vcmp.lt.s32.totalorder %v4375_v26, 50  ;;  %vm2401_vm5 = vcmp.lt.s32.totalorder %v4375_v26, 49  ;;  %vm2414_vm6 = vcmp.lt.s32.totalorder %v4375_v26, 48 }
 0x89d   : > { %2436 = vrot.lane.b32.xlu1 %v2432_v1, %s3647_s23  ;;  %v2732_v1 = vrot.slane %v4364_v57, 5  ;;  %vm2427_vm7 = vcmp.lt.s32.totalorder %v4375_v26, 47  ;;  %vm2440_vm8 = vcmp.lt.s32.totalorder %v4375_v26, 46  ;;  %vm2453_vm9 = vcmp.lt.s32.totalorder %v4375_v26, 45 }
 0x89e   : > { %2438 = vrot.lane.b32.xlu0 %v2433_v6, %s3647_s23  ;;  %s3656_s23 = smov 19   ;;  %v4345_v0 = vpop.f32.mrb[26].mxu1  ;;  %vm2466_vm10 = vcmp.lt.s32.totalorder %v4375_v26, 35  ;;  %vm2475_vm11 = vcmp.lt.s32.totalorder %v4375_v26, 34  ;;  %vm2490_vm12 = vcmp.lt.s32.totalorder %v4375_v26, 33  ;;  %vm2503_vm13 = vcmp.lt.s32.totalorder %v4375_v26, 32 }
 0x89f   : > { %v4350_v28 = vpop.f32.mrb[27].mxu1  ;;  %vm2516_vm14 = vcmp.lt.s32.totalorder %v4375_v26, 31  ;;  %vm2529_vm15 = vcmp.lt.s32.totalorder %v4375_v26, 30  ;;  %vm2542_vm0 = vcmp.lt.s32.totalorder %v4375_v26, 29  ;;  %vm2555_vm1 = vcmp.lt.s32.totalorder %v4375_v26, 19 }
 0x8a0   : > { %vm2568_vm2 = vcmp.lt.s32.totalorder %v4375_v26, 18 }
 0x8a1   : > { %2449 = vrot.lane.b32.xlu1 %v2445_v47, %s3648_s24  ;;  %v2744_v47 = vrot.slane %v4361_v37, 6 }
 0x8a2   : > { %2451 = vrot.lane.b32.xlu0 %v2446_v42, %s3648_s24  ;;  %s3680_s24 = smov 95  }
 0x8a5   : > { %2462 = vrot.lane.b32.xlu1 %v2458_v16, %s3649_s30 }
 0x8a6   : > { %2464 = vrot.lane.b32.xlu0 %v2459_v11, %s3649_s30  ;;  %s3658_s30 = smov 17   ;;  %v2347_v11 = vld [vmem:[%s4633_s13 + $0x40] sm:$0xff] }
 0x8a9   : > { %2471 = vrot.lane.b32.xlu1 %v2355_v60, %s3650_s18 }
 0x8aa   : > { %2473 = vrot.lane.b32.xlu0 %v2356_v61, %s3650_s18  ;;  %s3659_s18 = smov 16   ;;  %v2757_v61 = vrot.slane %v4361_v37, 7 }
 0x8ad   : > { %2486 = vrot.lane.b32.xlu1 %v2482_v29, %s3651_s19  ;;  %v2348_v29 = vld [vmem:[%s4633_s13 + $0x48] sm:$0xff] }
 0x8ae   : > { %2488 = vrot.lane.b32.xlu0 %v2483_v30, %s3651_s19  ;;  %s3660_s19 = smov 15  }
 0x8b1   : > { %2499 = vrot.lane.b32.xlu1 %v2495_v50, %s3652_s1  ;;  %v2758_v50 = vrot.slane %v4364_v57, 7 }
 0x8b2   : > { %2501 = vrot.lane.b32.xlu0 %v2496_v14, %s3652_s1  ;;  %s3661_s1 = smov 14  }
 0x8b5   : > { %2512 = vrot.lane.b32.xlu1 %v2508_v15, %s3653_s20 }
 0x8b6   : > { %2514 = vrot.lane.b32.xlu0 %v2509_v22, %s3653_s20  ;;  %s3662_s20 = smov 13   ;;  %v4392_v22 = vmul.f32 %v2347_v11, %v4328_v19 }
 0x8b8   : > { %v2807_v4 = vrot.slane %v4392_v22, 3 }
 0x8b9   : > { %2525 = vrot.lane.b32.xlu1 %v2521_v25, %s3654_s22 }
 0x8ba   : > { %2527 = vrot.lane.b32.xlu0 %v2522_v32, %s3654_s22  ;;  %s3663_s22 = smov 3  }
 0x8bd   : > { %2538 = vrot.lane.b32.xlu1 %v2534_v33, %s3655_s27  ;;  %v4395_v33 = vmul.f32 %v2348_v29, %v4330_v27 }
 0x8be   : > { %2540 = vrot.lane.b32.xlu0 %v2535_v34, %s3655_s27 }
 0x8c1   : > { %2551 = vrot.lane.b32.xlu1 %v2547_v40, %s3656_s23 }
 0x8c2   : > { %2553 = vrot.lane.b32.xlu0 %v2548_v63, %s3656_s23  ;;  %s3688_s23 = smov 78  }
 0x8c5   : > { %2564 = vrot.lane.b32.xlu1 %v2560_v54, %s3657_s10 }
 0x8c6   : > { %2566 = vrot.lane.b32.xlu0 %v2561_v52, %s3657_s10  ;;  %s3666_s10 = smov 127   ;;  %v2781_v52 = vrot.slane %v4392_v22, 1 }
 0x8c9   : > { %2573 = vrot.lane.b32.xlu1 %v2357_v12, %s3658_s30  ;;  %v2782_v12 = vrot.slane %v4395_v33, 1 }
 0x8ca   : > { %2575 = vrot.lane.b32.xlu0 %v2358_v35, %s3658_s30  ;;  %s3667_s30 = smov 126  }
 0x8cd   : > { %2588 = vrot.lane.b32.xlu1 %v2584_v36, %s3659_s18 }
 0x8ce   : > { %2590 = vrot.lane.b32.xlu0 %v2585_v17, %s3659_s18  ;;  %s3668_s18 = smov 125  }
 0x8d1   : > { %2601 = vrot.lane.b32.xlu1 %v2597_v18, %s3660_s19 }
 0x8d2   : > { %2603 = vrot.lane.b32.xlu0 %v2598_v55, %s3660_s19  ;;  %s3669_s19 = smov 115  }
 0x8d5   : > { %2614 = vrot.lane.b32.xlu1 %v2610_v38, %s3661_s1  ;;  %v2794_v38 = vrot.slane %v4392_v22, 2 }
 0x8d6   : > { %2616 = vrot.lane.b32.xlu0 %v2611_v39, %s3661_s1  ;;  %s3670_s1 = smov 114  }
 0x8d9   : > { %2627 = vrot.lane.b32.xlu1 %v2623_v5, %s3662_s20  ;;  %v2795_v5 = vrot.slane %v4395_v33, 2 }
 0x8da   : > { %2629 = vrot.lane.b32.xlu0 %v2624_v20, %s3662_s20  ;;  %s3671_s20 = smov 113  }
 0x8dd   : > { %2640 = vrot.lane.b32.xlu1 %v2636_v9, %s3663_s22 }
 0x8de   : > { %2642 = vrot.lane.b32.xlu0 %v2637_v21, %s3663_s22 }
 0x8e1   : > { %2653 = vrot.lane.b32.xlu1 %v2649_v2, %s3664_s26 }
 0x8e2   : > { %2655 = vrot.lane.b32.xlu0 %v2650_v3, %s3664_s26  ;;  %s3673_s26 = smov 111  }
 0x8e5   : > { %2666 = vrot.lane.b32.xlu1 %v2662_v45, %s3665_s28  ;;  %v2808_v45 = vrot.slane %v4395_v33, 3 }
 0x8e6   : > { %2668 = vrot.lane.b32.xlu0 %v2663_v48, %s3665_s28  ;;  %s3674_s28 = smov 110  }
 0x8e9   : > { %2683 = vrot.lane.b32.xlu1 %v2679_v58, %s3666_s10 }
 0x8ea   : > { %2685 = vrot.lane.b32.xlu0 %v2680_v56, %s3666_s10  ;;  %s3675_s10 = smov 109  }
 0x8ed   : > { %2696 = vrot.lane.b32.xlu1 %v2692_v59, %s3667_s30 }
 0x8ee   : > { %2698 = vrot.lane.b32.xlu0 %v2693_v44, %s3667_s30  ;;  %s3676_s30 = smov 99  }
 0x8f1   : > { %2709 = vrot.lane.b32.xlu1 %v2705_v23, %s3668_s18  ;;  %v2820_v23 = vrot.slane %v4392_v22, 4 }
 0x8f2   : > { %2711 = vrot.lane.b32.xlu0 %v2706_v24, %s3668_s18  ;;  %s3677_s18 = smov 98  }
 0x8f5   : > { %2722 = vrot.lane.b32.xlu1 %v2718_v53, %s3669_s19  ;;  %v2821_v53 = vrot.slane %v4395_v33, 4 }
 0x8f6   : > { %2724 = vrot.lane.b32.xlu0 %v2719_v51, %s3669_s19  ;;  %s3678_s19 = smov 97  }
 0x8f9   : > { %2735 = vrot.lane.b32.xlu1 %v2731_v46, %s3670_s1 }
 0x8fa   : > { %2737 = vrot.lane.b32.xlu0 %v2732_v1, %s3670_s1  ;;  %s3679_s1 = smov 96  }
 0x8fb   : > { %v2368_v6 = vpop.permute.xlu1 %2367 }
 0x8fc   : > { %v2370_v42 = vpop.permute.xlu0 %2369 }
 0x8fd   : > { %v2374_v16 = vsel %vm2373_vm3, %v2368_v6, %v2370_v42  ;;  %v2375_v62 = vsel %vm2373_vm3, %v2370_v42, %v2368_v6  ;;  %2748 = vrot.lane.b32.xlu1 %v2744_v47, %s3671_s20  ;;  %v2833_v42 = vrot.slane %v4392_v22, 5  ;;  %vm2577_vm3 = vcmp.lt.s32.totalorder %v4375_v26, 17 }
 0x8fe   : > { %2750 = vrot.lane.b32.xlu0 %v2745_v49, %s3671_s20 }
 0x8ff   : > { %v2385_v60 = vpop.permute.xlu1 %2384 }
 0x900   : > { %v2387_v30 = vpop.permute.xlu0 %2386 }
 0x901   : > { %v2389_v14 = vsel %vm2388_vm4, %v2385_v60, %v2387_v30  ;;  %v2390_v15 = vsel %vm2388_vm4, %v2387_v30, %v2385_v60  ;;  %2761 = vrot.lane.b32.xlu1 %v2757_v61, %s3672_s25  ;;  %v2846_v30 = vrot.slane %v4392_v22, 6  ;;  %vm2592_vm4 = vcmp.lt.s32.totalorder %v4375_v26, 16 }
 0x902   : > { %v2391_v25 = vadd.f32 %v2390_v15, %v2375_v62  ;;  %v2392_v32 = vadd.f32 %v2389_v14, %v2374_v16  ;;  %2763 = vrot.lane.b32.xlu0 %v2758_v50, %s3672_s25  ;;  %v2834_v16 = vrot.slane %v4395_v33, 5  ;;  %v2847_v14 = vrot.slane %v4395_v33, 6  ;;  %s3681_s25 = smov 94  }
 0x903   : > { %v2398_v34 = vpop.permute.xlu1 %2397 }
 0x904   : > { %v2400_v40 = vpop.permute.xlu0 %2399 }
 0x905   : > { %v2402_v63 = vsel %vm2401_vm5, %v2398_v34, %v2400_v40  ;;  %v2403_v31 = vsel %vm2401_vm5, %v2400_v40, %v2398_v34  ;;  %2770 = vrot.lane.b32.xlu1 %v4392_v22, %s3673_s26  ;;  %v2349_v40 = vld [vmem:[%s4633_s13 + $0x50] sm:$0xff]  ;;  %vm2605_vm5 = vcmp.lt.s32.totalorder %v4375_v26, 15 }
 0x906   : > { %v2404_v54 = vadd.f32 %v2403_v31, %v2391_v25  ;;  %v2405_v41 = vadd.f32 %v2402_v63, %v2392_v32  ;;  %2772 = vrot.lane.b32.xlu0 %v4395_v33, %s3673_s26  ;;  %v2859_v31 = vrot.slane %v4392_v22, 7  ;;  %s3682_s26 = smov 93  }
 0x907   : > { %v2411_v19 = vpop.permute.xlu1 %2410 }
 0x908   : > { %v2413_v27 = vpop.permute.xlu0 %2412 }
 0x909   : > { %v2415_v35 = vsel %vm2414_vm6, %v2411_v19, %v2413_v27  ;;  %v2416_v36 = vsel %vm2414_vm6, %v2413_v27, %v2411_v19  ;;  %2785 = vrot.lane.b32.xlu1 %v2781_v52, %s3674_s28  ;;  %v2860_v19 = vrot.slane %v4395_v33, 7  ;;  %vm2618_vm6 = vcmp.lt.s32.totalorder %v4375_v26, 14 }
 0x90a   : > { %v2417_v17 = vadd.f32 %v2416_v36, %v2404_v54  ;;  %v2418_v18 = vadd.f32 %v2415_v35, %v2405_v41  ;;  %2787 = vrot.lane.b32.xlu0 %v2782_v12, %s3674_s28  ;;  %v2350_v54 = vld [vmem:[%s4633_s13 + $0x58] sm:$0xff]  ;;  %v4428_v12 = vmul.f32 %v2349_v40, %v4335_v13  ;;  %s3683_s28 = smov 83  }
 0x90b   : > { %v2424_v55 = vpop.permute.xlu1 %2423 }
 0x90c   : > { %v2426_v39 = vpop.permute.xlu0 %2425 }
 0x90d   : > { %v2428_v20 = vsel %vm2427_vm7, %v2424_v55, %v2426_v39  ;;  %v2429_v9 = vsel %vm2427_vm7, %v2426_v39, %v2424_v55  ;;  %2798 = vrot.lane.b32.xlu1 %v2794_v38, %s3675_s10  ;;  %vm2631_vm7 = vcmp.lt.s32.totalorder %v4375_v26, 13 }
 0x90e   : > { %v2430_v21 = vadd.f32 %v2429_v9, %v2417_v17  ;;  %v2431_v43 = vadd.f32 %v2428_v20, %v2418_v18  ;;  %2800 = vrot.lane.b32.xlu0 %v2795_v5, %s3675_s10  ;;  %v4431_v17 = vmul.f32 %v2350_v54, %v4340_v10  ;;  %v2883_v5 = vrot.slane %v4428_v12, 1  ;;  %s3684_s10 = smov 82  }
 0x90f   : > { %v2437_v2 = vpop.permute.xlu1 %2436  ;;  %v2961_v54 = vrot.slane %v4428_v12, 7 }
 0x910   : > { %v2439_v3 = vpop.permute.xlu0 %2438  ;;  %v2884_v20 = vrot.slane %v4431_v17, 1  ;;  %v2949_v40 = vrot.slane %v4431_v17, 6 }
 0x911   : > { %v2441_v48 = vsel %vm2440_vm8, %v2437_v2, %v2439_v3  ;;  %v2442_v58 = vsel %vm2440_vm8, %v2439_v3, %v2437_v2  ;;  %2811 = vrot.lane.b32.xlu1 %v2807_v4, %s3676_s30  ;;  %v2896_v3 = vrot.slane %v4428_v12, 2  ;;  %vm2644_vm8 = vcmp.lt.s32.totalorder %v4375_v26, 3 }
 0x912   : > { %v2443_v56 = vadd.f32 %v2442_v58, %v2430_v21  ;;  %v2444_v59 = vadd.f32 %v2441_v48, %v2431_v43  ;;  %2813 = vrot.lane.b32.xlu0 %v2808_v45, %s3676_s30  ;;  %v2897_v48 = vrot.slane %v4431_v17, 2  ;;  %s3685_s30 = smov 81  }
 0x913   : > { %v2450_v44 = vpop.permute.xlu1 %2449 }
 0x914   : > { %v2452_v24 = vpop.permute.xlu0 %2451 }
 0x915   : > { %v2454_v51 = vsel %vm2453_vm9, %v2450_v44, %v2452_v24  ;;  %v2455_v46 = vsel %vm2453_vm9, %v2452_v24, %v2450_v44  ;;  %2824 = vrot.lane.b32.xlu1 %v2820_v23, %s3677_s18  ;;  %v2909_v24 = vrot.slane %v4428_v12, 3  ;;  %vm2657_vm9 = vcmp.lt.s32.totalorder %v4375_v26, 2 }
 0x916   : > { %v2456_v1 = vadd.f32 %v2455_v46, %v2443_v56  ;;  %v2457_v6 = vadd.f32 %v2454_v51, %v2444_v59  ;;  %2826 = vrot.lane.b32.xlu0 %v2821_v53, %s3677_s18  ;;  %v2910_v51 = vrot.slane %v4431_v17, 3  ;;  %s3686_s18 = smov 80  }
 0x917   : > { %v2463_v47 = vpop.permute.xlu1 %2462 }
 0x918   : > { %v2465_v49 = vpop.permute.xlu0 %2464 }
 0x919   : > { %v2467_v62 = vsel %vm2466_vm10, %v2463_v47, %v2465_v49  ;;  %v2468_v11 = vsel %vm2466_vm10, %v2465_v49, %v2463_v47  ;;  %2837 = vrot.lane.b32.xlu1 %v2833_v42, %s3678_s19  ;;  %v2922_v49 = vrot.slane %v4428_v12, 4  ;;  %vm2670_vm10 = vcmp.lt.s32.totalorder %v4375_v26, 1 }
 0x91a   : > { %v2469_v60 = vadd.f32 %v2468_v11, %v2456_v1  ;;  %v2470_v61 = vadd.f32 %v2467_v62, %v2457_v6  ;;  %2839 = vrot.lane.b32.xlu0 %v2834_v16, %s3678_s19  ;;  %v2923_v62 = vrot.slane %v4431_v17, 4  ;;  %s3687_s19 = smov 79  }
 0x91b   : > { %v2472_v29 = vpop.permute.xlu1 %2471 }
 0x91c   : > { %v2474_v50 = vpop.permute.xlu0 %2473 }
 0x91d   : > { %v2476_v15 = vsel %vm2475_vm11, %v2472_v29, %v2474_v50  ;;  %v2477_v25 = vsel %vm2475_vm11, %v2474_v50, %v2472_v29  ;;  %2850 = vrot.lane.b32.xlu1 %v2846_v30, %s3679_s1  ;;  %v2935_v50 = vrot.slane %v4428_v12, 5  ;;  %vm2687_vm11 = vcmp.lt.s32.totalorder %v4375_v26, 127 }
 0x91e   : > { %v2478_v32 = vadd.f32 %v2477_v25, %v2469_v60  ;;  %v2479_v34 = vadd.f32 %v2476_v15, %v2470_v61  ;;  %2852 = vrot.lane.b32.xlu0 %v2847_v14, %s3679_s1  ;;  %v2936_v15 = vrot.slane %v4431_v17, 5 }
 0x91f   : > { %v2487_v63 = vpop.permute.xlu1 %2486 }
 0x920   : > { %v2489_v41 = vpop.permute.xlu0 %2488 }
 0x921   : > { %v2491_v52 = vsel %vm2490_vm12, %v2487_v63, %v2489_v41  ;;  %v2492_v27 = vsel %vm2490_vm12, %v2489_v41, %v2487_v63  ;;  %2863 = vrot.lane.b32.xlu1 %v2859_v31, %s3680_s24  ;;  %v2351_v63 = vld [vmem:[%s4633_s13 + $0x60] sm:$0x1]  ;;  %v2352_v41 = vld [vmem:[%s4633_s13 + $0x68] sm:$0x1]  ;;  %vm2700_vm12 = vcmp.lt.s32.totalorder %v4375_v26, 126 }
 0x922   : > { %v2493_v35 = vadd.f32 %v2492_v27, %v2478_v32  ;;  %v2494_v36 = vadd.f32 %v2491_v52, %v2479_v34  ;;  %2865 = vrot.lane.b32.xlu0 %v2860_v19, %s3680_s24  ;;  %v2948_v32 = vrot.slane %v4428_v12, 6  ;;  %v2962_v52 = vrot.slane %v4431_v17, 7  ;;  %s3689_s24 = smov 77  }
 0x923   : > { %v2500_v22 = vpop.permute.xlu1 %2499  ;;  %v2365_v27 = vmul.f32 %v2351_v63, %v4345_v0 }
 0x924   : > { %v2502_v18 = vpop.permute.xlu0 %2501 }
 0x925   : > { %v2504_v55 = vsel %vm2503_vm13, %v2500_v22, %v2502_v18  ;;  %v2505_v38 = vsel %vm2503_vm13, %v2502_v18, %v2500_v22  ;;  %2872 = vrot.lane.b32.xlu1 %v4428_v12, %s3681_s25  ;;  %vm2713_vm13 = vcmp.lt.s32.totalorder %v4375_v26, 125 }
 0x926   : > { %v2506_v33 = vadd.f32 %v2505_v38, %v2493_v35  ;;  %v2507_v39 = vadd.f32 %v2504_v55, %v2494_v36  ;;  %2874 = vrot.lane.b32.xlu0 %v4431_v17, %s3681_s25  ;;  %v2366_v35 = vmul.f32 %v2352_v41, %v4350_v28  ;;  %s3230_s25 = sld [smem:[#allocation3 + $0x2]] }
 0x927   : > { %v2513_v13 = vpop.permute.xlu1 %2512 }
 0x928   : > { %v2515_v10 = vpop.permute.xlu0 %2514 }
 0x929   : > { %v2517_v9 = vsel %vm2516_vm14, %v2513_v13, %v2515_v10  ;;  %v2518_v21 = vsel %vm2516_vm14, %v2515_v10, %v2513_v13  ;;  %2887 = vrot.lane.b32.xlu1 %v2883_v5, %s3682_s26  ;;  %vm2726_vm14 = vcmp.lt.s32.totalorder %v4375_v26, 115 }
 0x92a   : > { %v2519_v43 = vadd.f32 %v2518_v21, %v2506_v33  ;;  %v2520_v2 = vadd.f32 %v2517_v9, %v2507_v39  ;;  %2889 = vrot.lane.b32.xlu0 %v2884_v20, %s3682_s26  ;;  %s3175_s26 = sshll.u32 %s4708_s0, 1 }
 0x92b   : > { %v2526_v4 = vpop.permute.xlu1 %2525 }
 0x92c   : > { %v2528_v45 = vpop.permute.xlu0 %2527 }
 0x92d   : > { %v2530_v58 = vsel %vm2529_vm15, %v2526_v4, %v2528_v45  ;;  %v2531_v56 = vsel %vm2529_vm15, %v2528_v45, %v2526_v4  ;;  %2900 = vrot.lane.b32.xlu1 %v2896_v3, %s3683_s28  ;;  %vm2739_vm15 = vcmp.lt.s32.totalorder %v4375_v26, 114 }
 0x92e   : > { %v2532_v59 = vadd.f32 %v2531_v56, %v2519_v43  ;;  %v2533_v44 = vadd.f32 %v2530_v58, %v2520_v2  ;;  %2902 = vrot.lane.b32.xlu0 %v2897_v48, %s3683_s28 }
 0x92f   : > { %v2539_v23 = vpop.permute.xlu1 %2538 }
 0x930   : > { %v2541_v53 = vpop.permute.xlu0 %2540 }
 0x931   : > { %v2543_v46 = vsel %vm2542_vm0, %v2539_v23, %v2541_v53  ;;  %v2544_v1 = vsel %vm2542_vm0, %v2541_v53, %v2539_v23  ;;  %2913 = vrot.lane.b32.xlu1 %v2909_v24, %s3684_s10  ;;  %vm2752_vm0 = vcmp.lt.s32.totalorder %v4375_v26, 113 }
 0x932   : > { %v2545_v6 = vadd.f32 %v2544_v1, %v2532_v59  ;;  %v2546_v47 = vadd.f32 %v2543_v46, %v2533_v44  ;;  %2915 = vrot.lane.b32.xlu0 %v2910_v51, %s3684_s10 }
 0x933   : > { %v2552_v42 = vpop.permute.xlu1 %2551 }
 0x934   : > { %v2554_v16 = vpop.permute.xlu0 %2553 }
 0x935   : > { %v2556_v11 = vsel %vm2555_vm1, %v2552_v42, %v2554_v16  ;;  %v2557_v60 = vsel %vm2555_vm1, %v2554_v16, %v2552_v42  ;;  %2926 = vrot.lane.b32.xlu1 %v2922_v49, %s3685_s30  ;;  %vm2765_vm1 = vcmp.lt.s32.totalorder %v4375_v26, 112 }
 0x936   : > { %v4448_v61 = vadd.f32 %v2557_v60, %v2545_v6  ;;  %v4450_v29 = vadd.f32 %v2556_v11, %v2546_v47  ;;  %2928 = vrot.lane.b32.xlu0 %v2923_v62, %s3685_s30  ;;  %s563_s30 = scalar_lea.vmem %s4637_s17, %s3175_s26 }
 0x937   : > { %v2565_v30 = vpop.permute.xlu1 %2564 }
 0x938   : > { %v2567_v14 = vpop.permute.xlu0 %2566 }
 0x939   : > { %2939 = vrot.lane.b32.xlu1 %v2935_v50, %s3686_s18  ;;  %v2569_v56 = vsel %vm2568_vm2, %v2565_v30, %v2567_v14  ;;  %v2570_v59 = vsel %vm2568_vm2, %v2567_v14, %v2565_v30  ;;  %vm2774_vm2 = vcmp.lt.s32.totalorder %v4375_v26, 111 }
 0x93a   : > { %2941 = vrot.lane.b32.xlu0 %v2936_v15, %s3686_s18  ;;  %v2571_v53 = vadd.f32 %v2570_v59, %v4448_v61  ;;  %v2572_v51 = vadd.f32 %v2569_v56, %v4450_v29 }
 0x93b   : > { %v2574_v25 = vpop.permute.xlu1 %2573 }
 0x93c   : > { %v2576_v34 = vpop.permute.xlu0 %2575 }
 0x93d   : > { %2952 = vrot.lane.b32.xlu1 %v2948_v32, %s3687_s19  ;;  %v2578_v44 = vsel %vm2577_vm3, %v2574_v25, %v2576_v34  ;;  %v2579_v23 = vsel %vm2577_vm3, %v2576_v34, %v2574_v25  ;;  %vm2789_vm3 = vcmp.lt.s32.totalorder %v4375_v26, 110 }
 0x93e   : > { %2954 = vrot.lane.b32.xlu0 %v2949_v40, %s3687_s19  ;;  %v2580_v47 = vadd.f32 %v2579_v23, %v2571_v53  ;;  %v2581_v42 = vadd.f32 %v2578_v44, %v2572_v51 }
 0x93f   : > { %v2589_v31 = vpop.permute.xlu1 %2588 }
 0x940   : > { %v2591_v19 = vpop.permute.xlu0 %2590 }
 0x941   : > { %2965 = vrot.lane.b32.xlu1 %v2961_v54, %s3688_s23  ;;  %v2593_v1 = vsel %vm2592_vm4, %v2589_v31, %v2591_v19  ;;  %v2594_v6 = vsel %vm2592_vm4, %v2591_v19, %v2589_v31  ;;  %vm2802_vm4 = vcmp.lt.s32.totalorder %v4375_v26, 109 }
 0x942   : > { %2967 = vrot.lane.b32.xlu0 %v2962_v52, %s3688_s23  ;;  %v2595_v11 = vadd.f32 %v2594_v6, %v2580_v47  ;;  %v2596_v60 = vadd.f32 %v2593_v1, %v2581_v42 }
 0x943   : > { %v2602_v36 = vpop.permute.xlu1 %2601 }
 0x944   : > { %v2604_v22 = vpop.permute.xlu0 %2603 }
 0x945   : > { %2974 = vrot.lane.b32.xlu1 %v2365_v27, %s3689_s24  ;;  %v2606_v49 = vsel %vm2605_vm5, %v2602_v36, %v2604_v22  ;;  %v2607_v16 = vsel %vm2605_vm5, %v2604_v22, %v2602_v36  ;;  %vm2815_vm5 = vcmp.lt.s32.totalorder %v4375_v26, 99 }
 0x946   : > { %2976 = vrot.lane.b32.xlu0 %v2366_v35, %s3689_s24  ;;  %v2608_v50 = vadd.f32 %v2607_v16, %v2595_v11  ;;  %v2609_v14 = vadd.f32 %v2606_v49, %v2596_v60 }
 0x947   : > { %v2615_v12 = vpop.permute.xlu1 %2614 }
 0x948   : > { %v2617_v18 = vpop.permute.xlu0 %2616 }
 0x949   : > { %v2619_v29 = vsel %vm2618_vm6, %v2615_v12, %v2617_v18  ;;  %v2620_v30 = vsel %vm2618_vm6, %v2617_v18, %v2615_v12  ;;  %vm2828_vm6 = vcmp.lt.s32.totalorder %v4375_v26, 98 }
 0x94a   : > { %v2621_v34 = vadd.f32 %v2620_v30, %v2608_v50  ;;  %v2622_v40 = vadd.f32 %v2619_v29, %v2609_v14 }
 0x94b   : > { %v2628_v55 = vpop.permute.xlu1 %2627 }
 0x94c   : > { %v2630_v38 = vpop.permute.xlu0 %2629 }
 0x94d   : > { %v2632_v15 = vsel %vm2631_vm7, %v2628_v55, %v2630_v38  ;;  %v2633_v25 = vsel %vm2631_vm7, %v2630_v38, %v2628_v55  ;;  %vm2841_vm7 = vcmp.lt.s32.totalorder %v4375_v26, 97 }
 0x94e   : > { %v2634_v41 = vadd.f32 %v2633_v25, %v2621_v34  ;;  %v2635_v19 = vadd.f32 %v2632_v15, %v2622_v40 }
 0x94f   : > { %v2641_v33 = vpop.permute.xlu1 %2640 }
 0x950   : > { %v2643_v39 = vpop.permute.xlu0 %2642 }
 0x951   : > { %v2645_v31 = vsel %vm2644_vm8, %v2641_v33, %v2643_v39  ;;  %v2646_v54 = vsel %vm2644_vm8, %v2643_v39, %v2641_v33  ;;  %vm2854_vm8 = vcmp.lt.s32.totalorder %v4375_v26, 96 }
 0x952   : > { %v2647_v36 = vadd.f32 %v2646_v54, %v2634_v41  ;;  %v2648_v22 = vadd.f32 %v2645_v31, %v2635_v19 }
 0x953   : > { %v2654_v13 = vpop.permute.xlu1 %2653 }
 0x954   : > { %v2656_v17 = vpop.permute.xlu0 %2655 }
 0x955   : > { %v2658_v52 = vsel %vm2657_vm9, %v2654_v13, %v2656_v17  ;;  %v2659_v27 = vsel %vm2657_vm9, %v2656_v17, %v2654_v13  ;;  %vm2867_vm9 = vcmp.lt.s32.totalorder %v4375_v26, 95 }
 0x956   : > { %v2660_v38 = vadd.f32 %v2659_v27, %v2647_v36  ;;  %v2661_v56 = vadd.f32 %v2658_v52, %v2648_v22 }
 0x957   : > { %v4466_v5 = vpop.permute.xlu1 %2666 }
 0x958   : > { %v2669_v10 = vpop.permute.xlu0 %2668 }
 0x959   : > { %v2671_v18 = vsel %vm2670_vm10, %v4466_v5, %v2669_v10  ;;  %v2672_v55 = vsel %vm2670_vm10, %v2669_v10, %v4466_v5  ;;  %vm2876_vm10 = vcmp.lt.s32.totalorder %v4375_v26, 94 }
 0x95a   : > { %v2673_v33 = vadd.f32 %v2672_v55, %v2660_v38  ;;  %v2674_v39 = vadd.f32 %v2671_v18, %v2661_v56 }
 0x95b   : > { %v4468_v0 = vpop.permute.xlu1 %2683 }
 0x95c   : > { %v4470_v20 = vpop.permute.xlu0 %2685  ;;  %v2675_v17 = vadd.f32 %v2673_v33, %v4361_v37  ;;  %v2676_v23 = vadd.f32 %v2674_v39, %v4364_v57 }
 0x95d   : > { %v2688_v5 = vsel %vm2687_vm11, %v4468_v0, %v4470_v20  ;;  %v2689_v10 = vsel %vm2687_vm11, %v4470_v20, %v4468_v0  ;;  %vm2891_vm11 = vcmp.lt.s32.totalorder %v4375_v26, 93 }
 0x95e   : > { %v2690_v57 = vadd.f32 %v2688_v5, %v2675_v17  ;;  %v2691_v6 = vadd.f32 %v2689_v10, %v2676_v23 }
 0x95f   : > { %v4472_v28 = vpop.permute.xlu1 %2696 }
 0x960   : > { %v4474_v9 = vpop.permute.xlu0 %2698 }
 0x961   : > { %v2701_v51 = vsel %vm2700_vm12, %v4472_v28, %v4474_v9  ;;  %v2702_v37 = vsel %vm2700_vm12, %v4474_v9, %v4472_v28  ;;  %vm2904_vm12 = vcmp.lt.s32.totalorder %v4375_v26, 83 }
 0x962   : > { %v2703_v20 = vadd.f32 %v2701_v51, %v2690_v57  ;;  %v2704_v49 = vadd.f32 %v2702_v37, %v2691_v6 }
 0x963   : > { %v4476_v21 = vpop.permute.xlu1 %2709 }
 0x964   : > { %v4478_v43 = vpop.permute.xlu0 %2711 }
 0x965   : > { %v2714_v42 = vsel %vm2713_vm13, %v4476_v21, %v4478_v43  ;;  %v2715_v0 = vsel %vm2713_vm13, %v4478_v43, %v4476_v21  ;;  %vm2917_vm13 = vcmp.lt.s32.totalorder %v4375_v26, 82 }
 0x966   : > { %v2716_v11 = vadd.f32 %v2714_v42, %v2703_v20  ;;  %v2717_v60 = vadd.f32 %v2715_v0, %v2704_v49 }
 0x967   : > { %v4480_v2 = vpop.permute.xlu1 %2722 }
 0x968   : > { %v4482_v4 = vpop.permute.xlu0 %2724 }
 0x969   : > { %v2727_v28 = vsel %vm2726_vm14, %v4480_v2, %v4482_v4  ;;  %v2728_v9 = vsel %vm2726_vm14, %v4482_v4, %v4480_v2  ;;  %vm2930_vm14 = vcmp.lt.s32.totalorder %v4375_v26, 81 }
 0x96a   : > { %v2729_v43 = vadd.f32 %v2727_v28, %v2716_v11  ;;  %v2730_v50 = vadd.f32 %v2728_v9, %v2717_v60 }
 0x96b   : > { %v4484_v3 = vpop.permute.xlu1 %2735 }
 0x96c   : > { %v4486_v45 = vpop.permute.xlu0 %2737 }
 0x96d   : > { %v2740_v30 = vsel %vm2739_vm15, %v4484_v3, %v4486_v45  ;;  %v2741_v21 = vsel %vm2739_vm15, %v4486_v45, %v4484_v3  ;;  %vm2943_vm15 = vcmp.lt.s32.totalorder %v4375_v26, 80 }
 0x96e   : > { %v2742_v15 = vadd.f32 %v2740_v30, %v2729_v43  ;;  %v2743_v25 = vadd.f32 %v2741_v21, %v2730_v50 }
 0x96f   : > { %v4489_v48 = vpop.permute.xlu1 %2748 }
 0x970   : > { %v4492_v58 = vpop.permute.xlu0 %2750 }
 0x971   : > { %v2753_v14 = vsel %vm2752_vm0, %v4489_v48, %v4492_v58  ;;  %v2754_v2 = vsel %vm2752_vm0, %v4492_v58, %v4489_v48  ;;  %vm2956_vm0 = vcmp.lt.s32.totalorder %v4375_v26, 79 }
 0x972   : > { %v2755_v45 = vadd.f32 %v2753_v14, %v2742_v15  ;;  %v2756_v31 = vadd.f32 %v2754_v2, %v2743_v25 }
 0x973   : > { %v4495_v24 = vpop.permute.xlu1 %2761 }
 0x974   : > { %v4500_v46 = vpop.permute.xlu0 %2763 }
 0x975   : > { %v2766_v40 = vsel %vm2765_vm1, %v4495_v24, %v4500_v46  ;;  %v2767_v3 = vsel %vm2765_vm1, %v4500_v46, %v4495_v24  ;;  %vm2969_vm1 = vcmp.lt.s32.totalorder %v4375_v26, 78 }
 0x976   : > { %v2768_v41 = vadd.f32 %v2766_v40, %v2755_v45  ;;  %v2769_v19 = vadd.f32 %v2767_v3, %v2756_v31 }
 0x977   : > { %v4503_v62 = vpop.permute.xlu1 %2770 }
 0x978   : > { %v4506_v61 = vpop.permute.xlu0 %2772 }
 0x979   : > { %v2775_v54 = vsel %vm2774_vm2, %v4503_v62, %v4506_v61  ;;  %v2776_v48 = vsel %vm2774_vm2, %v4506_v61, %v4503_v62  ;;  %vm2978_vm2 = vcmp.lt.s32.totalorder %v4375_v26, 77 }
 0x97a   : > { %v2777_v46 = vadd.f32 %v2775_v54, %v2768_v41  ;;  %v2778_v36 = vadd.f32 %v2776_v48, %v2769_v19 }
 0x97b   : > { %v4509_v32 = vpop.permute.xlu1 %2785 }
 0x97c   : > { %v4512_v63 = vpop.permute.xlu0 %2787 }
 0x97d   : > { %v2790_v27 = vsel %vm2789_vm3, %v4509_v32, %v4512_v63  ;;  %v2791_v24 = vsel %vm2789_vm3, %v4512_v63, %v4509_v32  ;;  %vm3007_vm3 = vcmp.lt.s32.totalorder %v1900_v7, 256 }
 0x97e   : > { %v2792_v18 = vadd.f32 %v2790_v27, %v2777_v46  ;;  %v2793_v55 = vadd.f32 %v2791_v24, %v2778_v36 }
 0x97f   : > { %v4515_v35 = vpop.permute.xlu1 %2798 }
 0x980   : > { %v4517_v12 = vpop.permute.xlu0 %2800 }
 0x981   : > { %v2803_v22 = vsel %vm2802_vm4, %v4515_v35, %v4517_v12  ;;  %v2804_v62 = vsel %vm2802_vm4, %v4517_v12, %v4515_v35 }
 0x982   : > { %v2805_v63 = vadd.f32 %v2803_v22, %v2792_v18  ;;  %v2806_v33 = vadd.f32 %v2804_v62, %v2793_v55 }
 0x983   : > { %v4521_v59 = vpop.permute.xlu1 %2811 }
 0x984   : > { %v4523_v44 = vpop.permute.xlu0 %2813 }
 0x985   : > { %v2816_v56 = vsel %vm2815_vm5, %v4521_v59, %v4523_v44  ;;  %v2817_v32 = vsel %vm2815_vm5, %v4523_v44, %v4521_v59 }
 0x986   : > { %v2818_v17 = vadd.f32 %v2816_v56, %v2805_v63  ;;  %v2819_v23 = vadd.f32 %v2817_v32, %v2806_v33 }
 0x987   : > { %v4526_v13 = vpop.permute.xlu1 %2824 }
 0x988   : > { %v4531_v53 = vpop.permute.xlu0 %2826 }
 0x989   : > { %v2829_v39 = vsel %vm2828_vm6, %v4526_v13, %v4531_v53  ;;  %v2830_v35 = vsel %vm2828_vm6, %v4531_v53, %v4526_v13 }
 0x98a   : > { %v2831_v44 = vadd.f32 %v2829_v39, %v2818_v17  ;;  %v2832_v51 = vadd.f32 %v2830_v35, %v2819_v23 }
 0x98b   : > { %v4542_v1 = vpop.permute.xlu1 %2837 }
 0x98c   : > { %v4545_v47 = vpop.permute.xlu0 %2839 }
 0x98d   : > { %v2842_v10 = vsel %vm2841_vm7, %v4542_v1, %v4545_v47  ;;  %v2843_v59 = vsel %vm2841_vm7, %v4545_v47, %v4542_v1 }
 0x98e   : > { %v2844_v13 = vadd.f32 %v2842_v10, %v2831_v44  ;;  %v2845_v53 = vadd.f32 %v2843_v59, %v2832_v51  ;;  %v2984_v10 = vstv %s3230_s25 }
 0x98f   : > { %v2851_v16 = vpop.permute.xlu1 %2850 }
 0x990   : > { %v2853_v29 = vpop.permute.xlu0 %2852 }
 0x991   : > { %v2855_v37 = vsel %vm2854_vm8, %v2851_v16, %v2853_v29  ;;  %v2856_v57 = vsel %vm2854_vm8, %v2853_v29, %v2851_v16 }
 0x992   : > { %v2857_v49 = vadd.f32 %v2855_v37, %v2844_v13  ;;  %v2858_v28 = vadd.f32 %v2856_v57, %v2845_v53 }
 0x993   : > { %v2864_v4 = vpop.permute.xlu1 %2863 }
 0x994   : > { %v2866_v34 = vpop.permute.xlu0 %2865 }
 0x995   : > { %v2868_v0 = vsel %vm2867_vm9, %v2864_v4, %v2866_v34  ;;  %v2869_v20 = vsel %vm2867_vm9, %v2866_v34, %v2864_v4 }
 0x996   : > { %v2870_v11 = vadd.f32 %v2868_v0, %v2857_v49  ;;  %v2871_v60 = vadd.f32 %v2869_v20, %v2858_v28 }
 0x997   : > { %v2873_v58 = vpop.permute.xlu1 %2872 }
 0x998   : > { %v2875_v52 = vpop.permute.xlu0 %2874 }
 0x999   : > { %v2877_v9 = vsel %vm2876_vm10, %v2873_v58, %v2875_v52  ;;  %v2878_v1 = vsel %vm2876_vm10, %v2875_v52, %v2873_v58 }
 0x99a   : > { %v2879_v21 = vadd.f32 %v2877_v9, %v2870_v11  ;;  %v2880_v43 = vadd.f32 %v2878_v1, %v2871_v60 }
 0x99b   : > { %v2888_v61 = vpop.permute.xlu1 %2887 }
 0x99c   : > { %v2890_v38 = vpop.permute.xlu0 %2889 }
 0x99d   : > { %v2892_v29 = vsel %vm2891_vm11, %v2888_v61, %v2890_v38  ;;  %v2893_v30 = vsel %vm2891_vm11, %v2890_v38, %v2888_v61  ;;  %v3690_v61 = vmov 1966171168  }
 0x99e   : > { %v2894_v4 = vadd.f32 %v2892_v29, %v2879_v21  ;;  %v2895_v15 = vadd.f32 %v2893_v30, %v2880_v43  ;;  %v2991_v18 = vunpack.c.l.s4 %v3690_v61 }
 0x99f   : > { %v2901_v12 = vpop.permute.xlu1 %2900 }
 0x9a0   : > { %v2903_v5 = vpop.permute.xlu0 %2902 }
 0x9a1   : > { %v2905_v50 = vsel %vm2904_vm12, %v2901_v12, %v2903_v5  ;;  %v2906_v14 = vsel %vm2904_vm12, %v2903_v5, %v2901_v12  ;;  %v2992_v12 = vunpack.c.0.s8 %v2991_v18 }
 0x9a2   : > { %v2907_v3 = vadd.f32 %v2905_v50, %v2894_v4  ;;  %v2908_v45 = vadd.f32 %v2906_v14, %v2895_v15 }
 0x9a3   : > { %v2914_v6 = vpop.permute.xlu1 %2913  ;;  %v2995_v57 = vsub.s32 %v2992_v12, %v4256_v8 }
 0x9a4   : > { %v2916_v42 = vpop.permute.xlu0 %2915 }
 0x9a5   : > { %v2918_v34 = vsel %vm2917_vm13, %v2914_v6, %v2916_v42  ;;  %v2919_v40 = vsel %vm2917_vm13, %v2916_v42, %v2914_v6 }
 0x9a6   : > { %v2920_v58 = vadd.f32 %v2918_v34, %v2907_v3  ;;  %v2921_v41 = vadd.f32 %v2919_v40, %v2908_v45 }
 0x9a7   : > { %v2927_v47 = vpop.permute.xlu1 %2926 }
 0x9a8   : > { %v2929_v16 = vpop.permute.xlu0 %2928 }
 0x9a9   : > { %v2931_v31 = vsel %vm2930_vm14, %v2927_v47, %v2929_v16  ;;  %v2932_v54 = vsel %vm2930_vm14, %v2929_v16, %v2927_v47 }
 0x9aa   : > { %v2933_v24 = vadd.f32 %v2931_v31, %v2920_v58  ;;  %v2934_v46 = vadd.f32 %v2932_v54, %v2921_v41 }
 0x9ab   : > { %v2940_v2 = vpop.permute.xlu1 %2939 }
 0x9ac   : > { %v2942_v25 = vpop.permute.xlu0 %2941 }
 0x9ad   : > { %v2944_v52 = vsel %vm2943_vm15, %v2940_v2, %v2942_v25  ;;  %v2945_v27 = vsel %vm2943_vm15, %v2942_v25, %v2940_v2 }
 0x9ae   : > { %v2946_v55 = vadd.f32 %v2944_v52, %v2933_v24  ;;  %v2947_v38 = vadd.f32 %v2945_v27, %v2934_v46 }
 0x9af   : > { %v2953_v48 = vpop.permute.xlu1 %2952 }
 0x9b0   : > { %v2955_v19 = vpop.permute.xlu0 %2954 }
 0x9b1   : > { %v2957_v36 = vsel %vm2956_vm0, %v2953_v48, %v2955_v19  ;;  %v2958_v22 = vsel %vm2956_vm0, %v2955_v19, %v2953_v48 }
 0x9b2   : > { %v2959_v33 = vadd.f32 %v2957_v36, %v2946_v55  ;;  %v2960_v39 = vadd.f32 %v2958_v22, %v2947_v38 }
 0x9b3   : > { %v2966_v62 = vpop.permute.xlu1 %2965 }
 0x9b4   : > { %v2968_v56 = vpop.permute.xlu0 %2967 }
 0x9b5   : > { %v2970_v32 = vsel %vm2969_vm1, %v2966_v62, %v2968_v56  ;;  %v2971_v63 = vsel %vm2969_vm1, %v2968_v56, %v2966_v62 }
 0x9b6   : > { %v2972_v17 = vadd.f32 %v2970_v32, %v2959_v33  ;;  %v2973_v23 = vadd.f32 %v2971_v63, %v2960_v39 }
 0x9b7   : > { %v2975_v35 = vpop.permute.xlu1 %2974 }
 0x9b8   : > { %v2977_v5 = vpop.permute.xlu0 %2976 }
 0x9b9   : > { %v2979_v59 = vsel %vm2978_vm2, %v2975_v35, %v2977_v5  ;;  %v2980_v44 = vsel %vm2978_vm2, %v2977_v5, %v2975_v35 }
 0x9ba   : > { %v2981_v51 = vadd.f32 %v2979_v59, %v2972_v17  ;;  %v2982_v37 = vadd.f32 %v2980_v44, %v2973_v23 }
 0x9bc   : > { %v2985_v6 = vadd.f32 %v2984_v10, %v2981_v51  ;;  %v2986_v13 = vadd.f32 %v2984_v10, %v2982_v37 }
 0x9be   : > { %v2989_v53 = vcombine.low %v2985_v6, %v2986_v13 }
 0x9c0   : > { %v2996_v42 = vrot.slane %v2989_v53, %v2995_v57 }
 0x9c2   : > { %v3003_v26 = vrot.slane %v2996_v42, %v2995_v57 }
 0x9c4   : > { %3009 = vst.msk [vmem:[%s563_s30] sm:$0x3] %vm3007_vm3, %v3003_v26 }
 0x9c5 PF: > { %s34_s29 = sadd.s32 1, %s3636_s29  }
 0x9c6   : > { %p31_p9 = scmp.ge.s32.totalorder %s34_s29, 4  }
 0x9c8   :  { %33 = sbr.rel (!%p31_p9) target bundleno = 23 (0x17), region = 138 }

</bundles_post_ra>
